<compile_context>
chip_gen: v6e
topology: v6e:2x2x1
jax: 0.10.0
libtpu: 0.0.40
codegen_flags: <defaults>
</compile_context>

<pallas_src>
import math
import functools

import jax
import jax.numpy as jnp
from jax.experimental import pallas as pl
from jax.experimental.pallas import tpu as pltpu

BF16 = jnp.bfloat16
_VMEM_LIMIT = 32 * 1024 * 1024


# ------------------------------ helpers -------------------------------------

def _pick_slabs(nt, slab_bytes, budget=6 << 20):
    """Largest divisor b of nt with b*slab_bytes <= budget, preferring >=2 steps."""
    divs = [b for b in range(1, nt + 1) if nt % b == 0]
    fit = [b for b in divs if b * slab_bytes <= budget] or [1]
    multi = [b for b in fit if nt // b >= 2]
    return max(multi) if multi else max(fit)


def _compiler_params(n_axes):
    return pltpu.CompilerParams(
        dimension_semantics=("parallel",) * n_axes,
        vmem_limit_bytes=_VMEM_LIMIT)


def pad_slabs(x, w_valid, k):
    """x: (NT, C, H, Wsrc) where only the first w_valid columns are valid.
    Returns (NT, C, Lp) bf16 zero-padded flattened slabs for spatial_conv,
    Lp = (H + 2p + 1) * (w_valid + 2p)  (one extra bottom row gives the
    flattened per-tap slices their headroom)."""
    p = k // 2
    nt, c, h, _ = x.shape
    x = x[:, :, :, :w_valid]
    x = jnp.pad(x, ((0, 0), (0, 0), (p, p + 1), (p, p)))
    hp1, wp = h + 2 * p + 1, w_valid + 2 * p
    return x.reshape(nt, c, hp1 * wp).astype(BF16)


# --------------------------- spatial conv (+ BN stats) ----------------------

def _spatial_conv_kernel(x_ref, w_ref, y_ref, stat_ref, col_ref,
                         *, k, B, H, W, Wp, Cin):
    # x_ref:   (B, Cin, Lp) bf16 padded slabs
    # w_ref:   (Cmid, k*k*Cin) bf16 packed weights (resident)
    # y_ref:   (B, Cmid, H*Wp) bf16 activation out
    # stat_ref:(Cmid, 2) f32 masked partial [sum, sum_sq]
    # col_ref: (k*k*Cin, B*H*Wp) bf16 im2col panel (VMEM scratch)
    R = H * Wp
    # im2col: one contiguous (Cin, R) stripe per (slab, tap); a (dh, dw) tap is
    # just the flat offset dh*Wp + dw into the padded slab.
    for b in range(B):
        for dh in range(k):
            for dw in range(k):
                tap = dh * k + dw
                off = dh * Wp + dw
                col_ref[tap * Cin:(tap + 1) * Cin, b * R:(b + 1) * R] = (
                    x_ref[b, :, off:off + R])
    # Single deep MXU contraction per grid step (bf16 operands, f32 accum).
    y = jnp.dot(w_ref[...], col_ref[...], preferred_element_type=jnp.float32)
    # Fused BatchNorm partial statistics (mask the Wp-W garbage columns).
    pos = jax.lax.broadcasted_iota(jnp.int32, (1, B * R), 1)
    yv = jnp.where((pos % Wp) < W, y, 0.0)
    stat_ref[:, 0:1] = jnp.sum(yv, axis=1, keepdims=True)
    stat_ref[:, 1:2] = jnp.sum(yv * yv, axis=1, keepdims=True)
    for b in range(B):
        y_ref[b] = y[:, b * R:(b + 1) * R].astype(y_ref.dtype)


def spatial_conv(xp, w, *, k, H, W):
    """xp: (NT, Cin, Lp) bf16 padded slabs; w: (Cmid, k*k*Cin) bf16.
    Returns y (NT, Cmid, H*Wp) bf16 and BN partial sums (G, Cmid, 2) f32."""
    NT, Cin, Lp = xp.shape
    Cmid, KC = w.shape
    p = k // 2
    Wp = W + 2 * p
    R = H * Wp
    assert KC == k * k * Cin and Lp == (H + 2 * p + 1) * Wp
    slab_bytes = 2 * (2 * Cin * Lp + 2 * KC * R + 4 * Cmid * R + 2 * Cmid * R)
    B = _pick_slabs(NT, slab_bytes)
    G = NT // B
    return pl.pallas_call(
        functools.partial(_spatial_conv_kernel,
                          k=k, B=B, H=H, W=W, Wp=Wp, Cin=Cin),
        out_shape=(jax.ShapeDtypeStruct((NT, Cmid, R), BF16),
                   jax.ShapeDtypeStruct((G, Cmid, 2), jnp.float32)),
        grid=(G,),
        in_specs=[pl.BlockSpec((B, Cin, Lp), lambda i: (i, 0, 0)),
                  pl.BlockSpec((Cmid, KC), lambda i: (0, 0))],     # resident
        out_specs=(pl.BlockSpec((B, Cmid, R), lambda i: (i, 0, 0)),
                   pl.BlockSpec((None, Cmid, 2), lambda i: (i, 0, 0))),
        scratch_shapes=[pltpu.VMEM((KC, B * R), BF16)],
        compiler_params=_compiler_params(1),
    )(xp, w)


# ----------------- temporal conv (+ fused mid-BN/relu, + BN stats) -----------

def _temporal_conv_kernel(y_ref, ss_ref, w_ref, z_ref, stat_ref, col_ref,
                          *, kt, T, R, Cmid, W, Wp):
    # y_ref:   (T, Cmid, R) bf16  -- all slabs of one sample
    # ss_ref:  (Cmid, 2) f32 interim-BN [scale, shift]
    # w_ref:   (Cout, kt*Cmid) bf16 packed weights (resident)
    # z_ref:   (T, Cout, R) bf16 output slabs
    # stat_ref:(Cout, 2) f32 masked partial [sum, sum_sq]
    # col_ref: (kt*Cmid, T*R) bf16 im2col panel (VMEM scratch)
    p = kt // 2
    scale = ss_ref[:, 0:1]
    shift = ss_ref[:, 1:2]
    for dt in range(kt):
        for t in range(T):
            src = t + dt - p
            rows = slice(dt * Cmid, (dt + 1) * Cmid)
            cols = slice(t * R, (t + 1) * R)
            if 0 <= src < T:
                # Fused interim BatchNorm apply + relu on the conv input.
                a = y_ref[src].astype(jnp.float32) * scale + shift
                col_ref[rows, cols] = jnp.maximum(a, 0.0).astype(col_ref.dtype)
            else:
                # Temporal zero-halo built in-kernel (no host-side pad).
                col_ref[rows, cols] = jnp.zeros((Cmid, R), col_ref.dtype)
    z = jnp.dot(w_ref[...], col_ref[...], preferred_element_type=jnp.float32)
    pos = jax.lax.broadcasted_iota(jnp.int32, (1, T * R), 1)
    zv = jnp.where((pos % Wp) < W, z, 0.0)
    stat_ref[:, 0:1] = jnp.sum(zv, axis=1, keepdims=True)
    stat_ref[:, 1:2] = jnp.sum(zv * zv, axis=1, keepdims=True)
    for t in range(T):
        z_ref[t] = z[:, t * R:(t + 1) * R].astype(z_ref.dtype)


def temporal_conv(y, ss_mid, w, *, kt, T, W, Wp):
    """y: (NT, Cmid, R) bf16; ss_mid: (Cmid, 2) f32; w: (Cout, kt*Cmid) bf16.
    Returns z (NT, Cout, R) bf16 and BN partial sums (N, Cout, 2) f32."""
    NT, Cmid, R = y.shape
    Cout, KtC = w.shape
    assert KtC == kt * Cmid and NT % T == 0
    N = NT // T
    return pl.pallas_call(
        functools.partial(_temporal_conv_kernel,
                          kt=kt, T=T, R=R, Cmid=Cmid, W=W, Wp=Wp),
        out_shape=(jax.ShapeDtypeStruct((NT, Cout, R), BF16),
                   jax.ShapeDtypeStruct((N, Cout, 2), jnp.float32)),
        grid=(N,),
        in_specs=[pl.BlockSpec((T, Cmid, R), lambda n: (n, 0, 0)),
                  pl.BlockSpec((Cmid, 2), lambda n: (0, 0)),
                  pl.BlockSpec((Cout, KtC), lambda n: (0, 0))],    # resident
        out_specs=(pl.BlockSpec((T, Cout, R), lambda n: (n, 0, 0)),
                   pl.BlockSpec((None, Cout, 2), lambda n: (n, 0, 0))),
        scratch_shapes=[pltpu.VMEM((KtC, T * R), BF16)],
        compiler_params=_compiler_params(1),
    )(y, ss_mid, w)


# ------------------------- BatchNorm helpers --------------------------------

def bn_scale_shift(partials, gamma, beta, count, eps=1e-5):
    """Combine masked per-step [sum, sum_sq] partials -> (C, 2) [scale, shift]."""
    s = jnp.sum(partials, axis=0)                       # (C, 2) f32
    mean = s[:, 0] / count
    var = s[:, 1] / count - mean * mean                 # biased batch stats
    # TODO(synk): single-pass variance can cancel for large activation means;
    # switch to a shifted two-pass if BN outputs drift vs the PyTorch reference.
    scale = gamma * jax.lax.rsqrt(var + eps)
    return jnp.stack([scale, beta - mean * scale], axis=1)


def _bn_dual_kernel(z_ref, ss_ref, bn_ref, relu_ref):
    y = z_ref[...].astype(jnp.float32) * ss_ref[:, 0:1] + ss_ref[:, 1:2]
    bn_ref[...] = y.astype(bn_ref.dtype)
    relu_ref[...] = jnp.maximum(y, 0.0).astype(relu_ref.dtype)


def _bn_add_relu_kernel(z_ref, ss_ref, r_ref, o_ref):
    y = z_ref[...].astype(jnp.float32) * ss_ref[:, 0:1] + ss_ref[:, 1:2]
    o_ref[...] = jnp.maximum(y + r_ref[...].astype(jnp.float32),
                             0.0).astype(o_ref.dtype)


def bn_dual(z, ss):
    """y = z*scale+shift; returns (y bf16, relu(y) bf16), both (NT, C, R)."""
    NT, C, R = z.shape
    Bc = _pick_slabs(NT, 8 * C * R * 2)
    spec = pl.BlockSpec((Bc, C, R), lambda i: (i, 0, 0))
    return pl.pallas_call(
        _bn_dual_kernel,
        out_shape=(jax.ShapeDtypeStruct((NT, C, R), BF16),
                   jax.ShapeDtypeStruct((NT, C, R), BF16)),
        grid=(NT // Bc,),
        in_specs=[spec, pl.BlockSpec((C, 2), lambda i: (0, 0))],
        out_specs=(spec, spec),
        compiler_params=_compiler_params(1),
    )(z, ss)


def bn_add_relu(z, ss, res):
    """relu(z*scale+shift + res) -> (NT, C, R) bf16."""
    NT, C, R = z.shape
    Bc = _pick_slabs(NT, 8 * C * R * 2)
    spec = pl.BlockSpec((Bc, C, R), lambda i: (i, 0, 0))
    return pl.pallas_call(
        _bn_add_relu_kernel,
        out_shape=jax.ShapeDtypeStruct((NT, C, R), BF16),
        grid=(NT // Bc,),
        in_specs=[spec, pl.BlockSpec((C, 2), lambda i: (0, 0)), spec],
        out_specs=spec,
        compiler_params=_compiler_params(1),
    )(z, ss, res)


# ------------------------- module forward passes ----------------------------

def block_forward(xp, bp, *, k, T, H, W):
    # block: spatialConv -> BatchNorm3d(interim) -> relu -> temporalConv
    # xp: (NT, Cin, Lp) bf16 padded slabs.  Returns z (NT, Cout, H*Wp) bf16 and
    # the masked BN partial sums of z (for the enclosing residual BatchNorm).
    NT, Cin, _ = xp.shape
    Cmid = bp['w_spatial'].shape[-1]
    Cout = bp['w_temporal'].shape[-1]
    Wp = W + 2 * (k // 2)
    w_sp = bp['w_spatial'].reshape(k * k * Cin, Cmid).T.astype(BF16)  # (Cmid, k*k*Cin)
    w_tm = bp['w_temporal'].reshape(k * Cmid, Cout).T.astype(BF16)    # (Cout, k*Cmid)
    y, part_mid = spatial_conv(xp, w_sp, k=k, H=H, W=W)
    ss_mid = bn_scale_shift(part_mid, bp['bn_gamma'], bp['bn_beta'],
                            count=float(NT * H * W))
    z, part_out = temporal_conv(y, ss_mid, w_tm, kt=k, T=T, W=W, Wp=Wp)
    return z, part_out


def residual_block_forward(xp, rp, *, k, T, H, W):
    # res  = BN(Conv1(x)); res1 = relu(res)
    # out  = relu(BN(Conv2(res)) + res1)     (same gamma/beta for both BN calls,
    #                                         fresh batch statistics each call)
    NT = xp.shape[0]
    count = float(NT * H * W)
    Wp = W + 2 * (k // 2)

    z1, p1 = block_forward(xp, rp['conv1'], k=k, T=T, H=H, W=W)
    ss1 = bn_scale_shift(p1, rp['bn_gamma'], rp['bn_beta'], count)
    bn1, res1 = bn_dual(z1, ss1)                       # both (NT, Cout, H*Wp) bf16

    Cout = bn1.shape[1]
    xp2 = pad_slabs(bn1.reshape(NT, Cout, H, Wp), W, k)
    z2, p2 = block_forward(xp2, rp['conv2'], k=k, T=T, H=H, W=W)
    ss2 = bn_scale_shift(p2, rp['bn_gamma'], rp['bn_beta'], count)
    return bn_add_relu(z2, ss2, res1)                  # (NT, Cout, H*Wp) bf16


def r2plus1d_forward(x, params, *, k):
    """x: (N, T, H, W, Cin) float32 -> (N, T, H, W, Cout) float32."""
    N, T, H, W, Cin = x.shape
    Wp = W + 2 * (k // 2)
    xs = jnp.transpose(x, (0, 1, 4, 2, 3)).reshape(N * T, Cin, H, W)
    act = pad_slabs(xs, W, k)                          # (NT, Cin, Lp) bf16
    out = None
    for rp in params['res_blocks']:
        if out is not None:
            act = pad_slabs(out.reshape(N * T, out.shape[1], H, Wp), W, k)
        out = residual_block_forward(act, rp, k=k, T=T, H=H, W=W)
    Cout = out.shape[1]
    out = out.reshape(N, T, Cout, H, Wp)[:, :, :, :, :W]   # drop garbage cols
    return jnp.transpose(out, (0, 1, 3, 4, 2)).astype(jnp.float32)


# ------------------------- deterministic init -------------------------------

def _uniform(key, shape, bound):
    return jax.random.uniform(key, shape, jnp.float32, -bound, bound)


def init_block_params(key, cin, cout, k):
    cmid = int(math.floor(k * k * k * cin * cout / (k * k * cin + k * cout)))
    ks = jax.random.split(key, 4)
    bs = 1.0 / math.sqrt(cin * k * k)     # spatial conv fan_in
    bt = 1.0 / math.sqrt(cmid * k)        # temporal conv fan_in
    return {
        'w_spatial': _uniform(ks[0], (k * k, cin, cmid), bs),   # (kh*kw, Cin, Cmid)
        'b_spatial': _uniform(ks[1], (cmid,), bs),   # parity only; cancelled by BN
        'bn_gamma': jnp.ones((cmid,), jnp.float32),
        'bn_beta': jnp.zeros((cmid,), jnp.float32),
        'w_temporal': _uniform(ks[2], (k, cmid, cout), bt),     # (kt, Cmid, Cout)
        'b_temporal': _uniform(ks[3], (cout,), bt),  # parity only; cancelled by BN
    }


def init_residual_block_params(key, cin, cout, k):
    k1, k2 = jax.random.split(key)
    return {
        'conv1': init_block_params(k1, cin, cout, k),
        'conv2': init_block_params(k2, cout, cout, k),
        'bn_gamma': jnp.ones((cout,), jnp.float32),
        'bn_beta': jnp.zeros((cout,), jnp.float32),
    }


def init_r2plus1d_params(key, cin, cout, k, depth):
    keys = jax.random.split(key, depth + 2)
    blocks = [init_residual_block_params(keys[0], cin, cout, k)]
    for i in range(depth + 1):
        blocks.append(init_residual_block_params(keys[i + 1], cout, cout, k))
    return {'res_blocks': blocks}


# --------------------------------- main --------------------------------------

if __name__ == "__main__":
    key = jax.random.PRNGKey(0)
    kparams, kx = jax.random.split(key)

    in_channels, out_channels, kernel, depth = 4, 8, 3, 0
    N, T, H, W = 2, 4, 8, 8

    params = init_r2plus1d_params(kparams, in_channels, out_channels, kernel,
                                  depth)
    # Channels-last NTHWC input (== PyTorch NCDHW input (2, 4, 4, 8, 8)
    # transposed to channels-last).
    x = jax.random.normal(kx, (N, T, H, W, in_channels), jnp.float32)

    fwd = jax.jit(functools.partial(r2plus1d_forward, k=kernel))
    out = jax.block_until_ready(fwd(x, params))

    assert out.shape == (N, T, H, W, out_channels), out.shape
    assert out.dtype == jnp.float32
    assert bool(jnp.all(jnp.isfinite(out)))
    print("KERNEL_OK")
</pallas_src>

<mosaic_0001>
module attributes {stable_mosaic.version = 11 : i64} {
  func.func @_spatial_conv_kernel(%arg0: i32, %arg1: memref<4x4x110xbf16, #tpu.memory_space<vmem>>, %arg2: memref<14x36xbf16, #tpu.memory_space<vmem>>, %arg3: memref<4x14x80xbf16, #tpu.memory_space<vmem>>, %arg4: memref<1x14x2xf32, #tpu.memory_space<vmem>>, %arg5: memref<36x320xbf16, #tpu.memory_space<vmem>>) attributes {dimension_semantics = [#tpu.dimension_semantics<parallel>], iteration_bounds = array<i64: 2>, scalar_prefetch = 0 : i64, scratch_operands = 1 : i64, tpu.core_type = #tpu.core_type<tc>, window_params = [{transform_indices = @transform_0, window_bounds = array<i64: 4, 4, 110>}, {pipeline_mode = #tpu.pipeline_mode<synchronous>, transform_indices = @transform_1, window_bounds = array<i64: 14, 36>}, {transform_indices = @transform_2, window_bounds = array<i64: 4, 14, 80>}, {transform_indices = @transform_3, window_bounds = array<i64: 1, 14, 2>}]} {
    %c0 = arith.constant 0 : index
    %c0_0 = arith.constant 0 : index
    %c0_1 = arith.constant 0 : index
    %0 = vector.load %arg1[%c0, %c0_0, %c0_1] : memref<4x4x110xbf16, #tpu.memory_space<vmem>>, vector<1x4x80xbf16>
    %1 = vector.shape_cast %0 : vector<1x4x80xbf16> to vector<4x80xbf16>
    %c0_2 = arith.constant 0 : index
    %c0_3 = arith.constant 0 : index
    %2 = vector.load %arg5[%c0_2, %c0_3] : memref<36x320xbf16, #tpu.memory_space<vmem>>, vector<4x80xbf16>
    tpu.vector_store %arg5[%c0_2, %c0_3], %1 {strides = array<i32>} : memref<36x320xbf16, #tpu.memory_space<vmem>>, vector<4x80xbf16>,
    %c0_4 = arith.constant 0 : index
    %c0_5 = arith.constant 0 : index
    %c1 = arith.constant 1 : index
    %3 = vector.load %arg1[%c0_4, %c0_5, %c1] : memref<4x4x110xbf16, #tpu.memory_space<vmem>>, vector<1x4x80xbf16>
    %4 = vector.shape_cast %3 : vector<1x4x80xbf16> to vector<4x80xbf16>
    %c4 = arith.constant 4 : index
    %c0_6 = arith.constant 0 : index
    %5 = vector.load %arg5[%c4, %c0_6] : memref<36x320xbf16, #tpu.memory_space<vmem>>, vector<4x80xbf16>
    tpu.vector_store %arg5[%c4, %c0_6], %4 {strides = array<i32>} : memref<36x320xbf16, #tpu.memory_space<vmem>>, vector<4x80xbf16>,
    %c0_7 = arith.constant 0 : index
    %c0_8 = arith.constant 0 : index
    %c2 = arith.constant 2 : index
    %6 = vector.load %arg1[%c0_7, %c0_8, %c2] : memref<4x4x110xbf16, #tpu.memory_space<vmem>>, vector<1x4x80xbf16>
    %7 = vector.shape_cast %6 : vector<1x4x80xbf16> to vector<4x80xbf16>
    %c8 = arith.constant 8 : index
    %c0_9 = arith.constant 0 : index
    %8 = vector.load %arg5[%c8, %c0_9] : memref<36x320xbf16, #tpu.memory_space<vmem>>, vector<4x80xbf16>
    tpu.vector_store %arg5[%c8, %c0_9], %7 {strides = array<i32>} : memref<36x320xbf16, #tpu.memory_space<vmem>>, vector<4x80xbf16>,
    %c0_10 = arith.constant 0 : index
    %c0_11 = arith.constant 0 : index
    %c10 = arith.constant 10 : index
    %9 = vector.load %arg1[%c0_10, %c0_11, %c10] : memref<4x4x110xbf16, #tpu.memory_space<vmem>>, vector<1x4x80xbf16>
    %10 = vector.shape_cast %9 : vector<1x4x80xbf16> to vector<4x80xbf16>
    %c12 = arith.constant 12 : index
    %c0_12 = arith.constant 0 : index
    %11 = vector.load %arg5[%c12, %c0_12] : memref<36x320xbf16, #tpu.memory_space<vmem>>, vector<4x80xbf16>
    tpu.vector_store %arg5[%c12, %c0_12], %10 {strides = array<i32>} : memref<36x320xbf16, #tpu.memory_space<vmem>>, vector<4x80xbf16>,
    %c0_13 = arith.constant 0 : index
    %c0_14 = arith.constant 0 : index
    %c11 = arith.constant 11 : index
    %12 = vector.load %arg1[%c0_13, %c0_14, %c11] : memref<4x4x110xbf16, #tpu.memory_space<vmem>>, vector<1x4x80xbf16>
    %13 = vector.shape_cast %12 : vector<1x4x80xbf16> to vector<4x80xbf16>
    %c16 = arith.constant 16 : index
    %c0_15 = arith.constant 0 : index
    %14 = vector.load %arg5[%c16, %c0_15] : memref<36x320xbf16, #tpu.memory_space<vmem>>, vector<4x80xbf16>
    tpu.vector_store %arg5[%c16, %c0_15], %13 {strides = array<i32>} : memref<36x320xbf16, #tpu.memory_space<vmem>>, vector<4x80xbf16>,
    %c0_16 = arith.constant 0 : index
    %c0_17 = arith.constant 0 : index
    %c12_18 = arith.constant 12 : index
    %15 = vector.load %arg1[%c0_16, %c0_17, %c12_18] : memref<4x4x110xbf16, #tpu.memory_space<vmem>>, vector<1x4x80xbf16>
    %16 = vector.shape_cast %15 : vector<1x4x80xbf16> to vector<4x80xbf16>
    %c20 = arith.constant 20 : index
    %c0_19 = arith.constant 0 : index
    %17 = vector.load %arg5[%c20, %c0_19] : memref<36x320xbf16, #tpu.memory_space<vmem>>, vector<4x80xbf16>
    tpu.vector_store %arg5[%c20, %c0_19], %16 {strides = array<i32>} : memref<36x320xbf16, #tpu.memory_space<vmem>>, vector<4x80xbf16>,
    %c0_20 = arith.constant 0 : index
    %c0_21 = arith.constant 0 : index
    %c20_22 = arith.constant 20 : index
    %18 = vector.load %arg1[%c0_20, %c0_21, %c20_22] : memref<4x4x110xbf16, #tpu.memory_space<vmem>>, vector<1x4x80xbf16>
    %19 = vector.shape_cast %18 : vector<1x4x80xbf16> to vector<4x80xbf16>
    %c24 = arith.constant 24 : index
    %c0_23 = arith.constant 0 : index
    %20 = vector.load %arg5[%c24, %c0_23] : memref<36x320xbf16, #tpu.memory_space<vmem>>, vector<4x80xbf16>
    tpu.vector_store %arg5[%c24, %c0_23], %19 {strides = array<i32>} : memref<36x320xbf16, #tpu.memory_space<vmem>>, vector<4x80xbf16>,
    %c0_24 = arith.constant 0 : index
    %c0_25 = arith.constant 0 : index
    %c21 = arith.constant 21 : index
    %21 = vector.load %arg1[%c0_24, %c0_25, %c21] : memref<4x4x110xbf16, #tpu.memory_space<vmem>>, vector<1x4x80xbf16>
    %22 = vector.shape_cast %21 : vector<1x4x80xbf16> to vector<4x80xbf16>
    %c28 = arith.constant 28 : index
    %c0_26 = arith.constant 0 : index
    %23 = vector.load %arg5[%c28, %c0_26] : memref<36x320xbf16, #tpu.memory_space<vmem>>, vector<4x80xbf16>
    tpu.vector_store %arg5[%c28, %c0_26], %22 {strides = array<i32>} : memref<36x320xbf16, #tpu.memory_space<vmem>>, vector<4x80xbf16>,
    %c0_27 = arith.constant 0 : index
    %c0_28 = arith.constant 0 : index
    %c22 = arith.constant 22 : index
    %24 = vector.load %arg1[%c0_27, %c0_28, %c22] : memref<4x4x110xbf16, #tpu.memory_space<vmem>>, vector<1x4x80xbf16>
    %25 = vector.shape_cast %24 : vector<1x4x80xbf16> to vector<4x80xbf16>
    %c32 = arith.constant 32 : index
    %c0_29 = arith.constant 0 : index
    %26 = vector.load %arg5[%c32, %c0_29] : memref<36x320xbf16, #tpu.memory_space<vmem>>, vector<4x80xbf16>
    tpu.vector_store %arg5[%c32, %c0_29], %25 {strides = array<i32>} : memref<36x320xbf16, #tpu.memory_space<vmem>>, vector<4x80xbf16>,
    %c1_30 = arith.constant 1 : index
    %c0_31 = arith.constant 0 : index
    %c0_32 = arith.constant 0 : index
    %27 = vector.load %arg1[%c1_30, %c0_31, %c0_32] : memref<4x4x110xbf16, #tpu.memory_space<vmem>>, vector<1x4x80xbf16>
    %28 = vector.shape_cast %27 : vector<1x4x80xbf16> to vector<4x80xbf16>
    %c0_33 = arith.constant 0 : index
    %c80 = arith.constant 80 : index
    %29 = vector.load %arg5[%c0_33, %c80] : memref<36x320xbf16, #tpu.memory_space<vmem>>, vector<4x80xbf16>
    tpu.vector_store %arg5[%c0_33, %c80], %28 {strides = array<i32>} : memref<36x320xbf16, #tpu.memory_space<vmem>>, vector<4x80xbf16>,
    %c1_34 = arith.constant 1 : index
    %c0_35 = arith.constant 0 : index
    %c1_36 = arith.constant 1 : index
    %30 = vector.load %arg1[%c1_34, %c0_35, %c1_36] : memref<4x4x110xbf16, #tpu.memory_space<vmem>>, vector<1x4x80xbf16>
    %31 = vector.shape_cast %30 : vector<1x4x80xbf16> to vector<4x80xbf16>
    %c4_37 = arith.constant 4 : index
    %c80_38 = arith.constant 80 : index
    %32 = vector.load %arg5[%c4_37, %c80_38] : memref<36x320xbf16, #tpu.memory_space<vmem>>, vector<4x80xbf16>
    tpu.vector_store %arg5[%c4_37, %c80_38], %31 {strides = array<i32>} : memref<36x320xbf16, #tpu.memory_space<vmem>>, vector<4x80xbf16>,
    %c1_39 = arith.constant 1 : index
    %c0_40 = arith.constant 0 : index
    %c2_41 = arith.constant 2 : index
    %33 = vector.load %arg1[%c1_39, %c0_40, %c2_41] : memref<4x4x110xbf16, #tpu.memory_space<vmem>>, vector<1x4x80xbf16>
    %34 = vector.shape_cast %33 : vector<1x4x80xbf16> to vector<4x80xbf16>
    %c8_42 = arith.constant 8 : index
    %c80_43 = arith.constant 80 : index
    %35 = vector.load %arg5[%c8_42, %c80_43] : memref<36x320xbf16, #tpu.memory_space<vmem>>, vector<4x80xbf16>
    tpu.vector_store %arg5[%c8_42, %c80_43], %34 {strides = array<i32>} : memref<36x320xbf16, #tpu.memory_space<vmem>>, vector<4x80xbf16>,
    %c1_44 = arith.constant 1 : index
    %c0_45 = arith.constant 0 : index
    %c10_46 = arith.constant 10 : index
    %36 = vector.load %arg1[%c1_44, %c0_45, %c10_46] : memref<4x4x110xbf16, #tpu.memory_space<vmem>>, vector<1x4x80xbf16>
    %37 = vector.shape_cast %36 : vector<1x4x80xbf16> to vector<4x80xbf16>
    %c12_47 = arith.constant 12 : index
    %c80_48 = arith.constant 80 : index
    %38 = vector.load %arg5[%c12_47, %c80_48] : memref<36x320xbf16, #tpu.memory_space<vmem>>, vector<4x80xbf16>
    tpu.vector_store %arg5[%c12_47, %c80_48], %37 {strides = array<i32>} : memref<36x320xbf16, #tpu.memory_space<vmem>>, vector<4x80xbf16>,
    %c1_49 = arith.constant 1 : index
    %c0_50 = arith.constant 0 : index
    %c11_51 = arith.constant 11 : index
    %39 = vector.load %arg1[%c1_49, %c0_50, %c11_51] : memref<4x4x110xbf16, #tpu.memory_space<vmem>>, vector<1x4x80xbf16>
    %40 = vector.shape_cast %39 : vector<1x4x80xbf16> to vector<4x80xbf16>
    %c16_52 = arith.constant 16 : index
    %c80_53 = arith.constant 80 : index
    %41 = vector.load %arg5[%c16_52, %c80_53] : memref<36x320xbf16, #tpu.memory_space<vmem>>, vector<4x80xbf16>
    tpu.vector_store %arg5[%c16_52, %c80_53], %40 {strides = array<i32>} : memref<36x320xbf16, #tpu.memory_space<vmem>>, vector<4x80xbf16>,
    %c1_54 = arith.constant 1 : index
    %c0_55 = arith.constant 0 : index
    %c12_56 = arith.constant 12 : index
    %42 = vector.load %arg1[%c1_54, %c0_55, %c12_56] : memref<4x4x110xbf16, #tpu.memory_space<vmem>>, vector<1x4x80xbf16>
    %43 = vector.shape_cast %42 : vector<1x4x80xbf16> to vector<4x80xbf16>
    %c20_57 = arith.constant 20 : index
    %c80_58 = arith.constant 80 : index
    %44 = vector.load %arg5[%c20_57, %c80_58] : memref<36x320xbf16, #tpu.memory_space<vmem>>, vector<4x80xbf16>
    tpu.vector_store %arg5[%c20_57, %c80_58], %43 {strides = array<i32>} : memref<36x320xbf16, #tpu.memory_space<vmem>>, vector<4x80xbf16>,
    %c1_59 = arith.constant 1 : index
    %c0_60 = arith.constant 0 : index
    %c20_61 = arith.constant 20 : index
    %45 = vector.load %arg1[%c1_59, %c0_60, %c20_61] : memref<4x4x110xbf16, #tpu.memory_space<vmem>>, vector<1x4x80xbf16>
    %46 = vector.shape_cast %45 : vector<1x4x80xbf16> to vector<4x80xbf16>
    %c24_62 = arith.constant 24 : index
    %c80_63 = arith.constant 80 : index
    %47 = vector.load %arg5[%c24_62, %c80_63] : memref<36x320xbf16, #tpu.memory_space<vmem>>, vector<4x80xbf16>
    tpu.vector_store %arg5[%c24_62, %c80_63], %46 {strides = array<i32>} : memref<36x320xbf16, #tpu.memory_space<vmem>>, vector<4x80xbf16>,
    %c1_64 = arith.constant 1 : index
    %c0_65 = arith.constant 0 : index
    %c21_66 = arith.constant 21 : index
    %48 = vector.load %arg1[%c1_64, %c0_65, %c21_66] : memref<4x4x110xbf16, #tpu.memory_space<vmem>>, vector<1x4x80xbf16>
    %49 = vector.shape_cast %48 : vector<1x4x80xbf16> to vector<4x80xbf16>
    %c28_67 = arith.constant 28 : index
    %c80_68 = arith.constant 80 : index
    %50 = vector.load %arg5[%c28_67, %c80_68] : memref<36x320xbf16, #tpu.memory_space<vmem>>, vector<4x80xbf16>
    tpu.vector_store %arg5[%c28_67, %c80_68], %49 {strides = array<i32>} : memref<36x320xbf16, #tpu.memory_space<vmem>>, vector<4x80xbf16>,
    %c1_69 = arith.constant 1 : index
    %c0_70 = arith.constant 0 : index
    %c22_71 = arith.constant 22 : index
    %51 = vector.load %arg1[%c1_69, %c0_70, %c22_71] : memref<4x4x110xbf16, #tpu.memory_space<vmem>>, vector<1x4x80xbf16>
    %52 = vector.shape_cast %51 : vector<1x4x80xbf16> to vector<4x80xbf16>
    %c32_72 = arith.constant 32 : index
    %c80_73 = arith.constant 80 : index
    %53 = vector.load %arg5[%c32_72, %c80_73] : memref<36x320xbf16, #tpu.memory_space<vmem>>, vector<4x80xbf16>
    tpu.vector_store %arg5[%c32_72, %c80_73], %52 {strides = array<i32>} : memref<36x320xbf16, #tpu.memory_space<vmem>>, vector<4x80xbf16>,
    %c2_74 = arith.constant 2 : index
    %c0_75 = arith.constant 0 : index
    %c0_76 = arith.constant 0 : index
    %54 = vector.load %arg1[%c2_74, %c0_75, %c0_76] : memref<4x4x110xbf16, #tpu.memory_space<vmem>>, vector<1x4x80xbf16>
    %55 = vector.shape_cast %54 : vector<1x4x80xbf16> to vector<4x80xbf16>
    %c0_77 = arith.constant 0 : index
    %c160 = arith.constant 160 : index
    %56 = vector.load %arg5[%c0_77, %c160] : memref<36x320xbf16, #tpu.memory_space<vmem>>, vector<4x80xbf16>
    tpu.vector_store %arg5[%c0_77, %c160], %55 {strides = array<i32>} : memref<36x320xbf16, #tpu.memory_space<vmem>>, vector<4x80xbf16>,
    %c2_78 = arith.constant 2 : index
    %c0_79 = arith.constant 0 : index
    %c1_80 = arith.constant 1 : index
    %57 = vector.load %arg1[%c2_78, %c0_79, %c1_80] : memref<4x4x110xbf16, #tpu.memory_space<vmem>>, vector<1x4x80xbf16>
    %58 = vector.shape_cast %57 : vector<1x4x80xbf16> to vector<4x80xbf16>
    %c4_81 = arith.constant 4 : index
    %c160_82 = arith.constant 160 : index
    %59 = vector.load %arg5[%c4_81, %c160_82] : memref<36x320xbf16, #tpu.memory_space<vmem>>, vector<4x80xbf16>
    tpu.vector_store %arg5[%c4_81, %c160_82], %58 {strides = array<i32>} : memref<36x320xbf16, #tpu.memory_space<vmem>>, vector<4x80xbf16>,
    %c2_83 = arith.constant 2 : index
    %c0_84 = arith.constant 0 : index
    %c2_85 = arith.constant 2 : index
    %60 = vector.load %arg1[%c2_83, %c0_84, %c2_85] : memref<4x4x110xbf16, #tpu.memory_space<vmem>>, vector<1x4x80xbf16>
    %61 = vector.shape_cast %60 : vector<1x4x80xbf16> to vector<4x80xbf16>
    %c8_86 = arith.constant 8 : index
    %c160_87 = arith.constant 160 : index
    %62 = vector.load %arg5[%c8_86, %c160_87] : memref<36x320xbf16, #tpu.memory_space<vmem>>, vector<4x80xbf16>
    tpu.vector_store %arg5[%c8_86, %c160_87], %61 {strides = array<i32>} : memref<36x320xbf16, #tpu.memory_space<vmem>>, vector<4x80xbf16>,
    %c2_88 = arith.constant 2 : index
    %c0_89 = arith.constant 0 : index
    %c10_90 = arith.constant 10 : index
    %63 = vector.load %arg1[%c2_88, %c0_89, %c10_90] : memref<4x4x110xbf16, #tpu.memory_space<vmem>>, vector<1x4x80xbf16>
    %64 = vector.shape_cast %63 : vector<1x4x80xbf16> to vector<4x80xbf16>
    %c12_91 = arith.constant 12 : index
    %c160_92 = arith.constant 160 : index
    %65 = vector.load %arg5[%c12_91, %c160_92] : memref<36x320xbf16, #tpu.memory_space<vmem>>, vector<4x80xbf16>
    tpu.vector_store %arg5[%c12_91, %c160_92], %64 {strides = array<i32>} : memref<36x320xbf16, #tpu.memory_space<vmem>>, vector<4x80xbf16>,
    %c2_93 = arith.constant 2 : index
    %c0_94 = arith.constant 0 : index
    %c11_95 = arith.constant 11 : index
    %66 = vector.load %arg1[%c2_93, %c0_94, %c11_95] : memref<4x4x110xbf16, #tpu.memory_space<vmem>>, vector<1x4x80xbf16>
    %67 = vector.shape_cast %66 : vector<1x4x80xbf16> to vector<4x80xbf16>
    %c16_96 = arith.constant 16 : index
    %c160_97 = arith.constant 160 : index
    %68 = vector.load %arg5[%c16_96, %c160_97] : memref<36x320xbf16, #tpu.memory_space<vmem>>, vector<4x80xbf16>
    tpu.vector_store %arg5[%c16_96, %c160_97], %67 {strides = array<i32>} : memref<36x320xbf16, #tpu.memory_space<vmem>>, vector<4x80xbf16>,
    %c2_98 = arith.constant 2 : index
    %c0_99 = arith.constant 0 : index
    %c12_100 = arith.constant 12 : index
    %69 = vector.load %arg1[%c2_98, %c0_99, %c12_100] : memref<4x4x110xbf16, #tpu.memory_space<vmem>>, vector<1x4x80xbf16>
    %70 = vector.shape_cast %69 : vector<1x4x80xbf16> to vector<4x80xbf16>
    %c20_101 = arith.constant 20 : index
    %c160_102 = arith.constant 160 : index
    %71 = vector.load %arg5[%c20_101, %c160_102] : memref<36x320xbf16, #tpu.memory_space<vmem>>, vector<4x80xbf16>
    tpu.vector_store %arg5[%c20_101, %c160_102], %70 {strides = array<i32>} : memref<36x320xbf16, #tpu.memory_space<vmem>>, vector<4x80xbf16>,
    %c2_103 = arith.constant 2 : index
    %c0_104 = arith.constant 0 : index
    %c20_105 = arith.constant 20 : index
    %72 = vector.load %arg1[%c2_103, %c0_104, %c20_105] : memref<4x4x110xbf16, #tpu.memory_space<vmem>>, vector<1x4x80xbf16>
    %73 = vector.shape_cast %72 : vector<1x4x80xbf16> to vector<4x80xbf16>
    %c24_106 = arith.constant 24 : index
    %c160_107 = arith.constant 160 : index
    %74 = vector.load %arg5[%c24_106, %c160_107] : memref<36x320xbf16, #tpu.memory_space<vmem>>, vector<4x80xbf16>
    tpu.vector_store %arg5[%c24_106, %c160_107], %73 {strides = array<i32>} : memref<36x320xbf16, #tpu.memory_space<vmem>>, vector<4x80xbf16>,
    %c2_108 = arith.constant 2 : index
    %c0_109 = arith.constant 0 : index
    %c21_110 = arith.constant 21 : index
    %75 = vector.load %arg1[%c2_108, %c0_109, %c21_110] : memref<4x4x110xbf16, #tpu.memory_space<vmem>>, vector<1x4x80xbf16>
    %76 = vector.shape_cast %75 : vector<1x4x80xbf16> to vector<4x80xbf16>
    %c28_111 = arith.constant 28 : index
    %c160_112 = arith.constant 160 : index
    %77 = vector.load %arg5[%c28_111, %c160_112] : memref<36x320xbf16, #tpu.memory_space<vmem>>, vector<4x80xbf16>
    tpu.vector_store %arg5[%c28_111, %c160_112], %76 {strides = array<i32>} : memref<36x320xbf16, #tpu.memory_space<vmem>>, vector<4x80xbf16>,
    %c2_113 = arith.constant 2 : index
    %c0_114 = arith.constant 0 : index
    %c22_115 = arith.constant 22 : index
    %78 = vector.load %arg1[%c2_113, %c0_114, %c22_115] : memref<4x4x110xbf16, #tpu.memory_space<vmem>>, vector<1x4x80xbf16>
    %79 = vector.shape_cast %78 : vector<1x4x80xbf16> to vector<4x80xbf16>
    %c32_116 = arith.constant 32 : index
    %c160_117 = arith.constant 160 : index
    %80 = vector.load %arg5[%c32_116, %c160_117] : memref<36x320xbf16, #tpu.memory_space<vmem>>, vector<4x80xbf16>
    tpu.vector_store %arg5[%c32_116, %c160_117], %79 {strides = array<i32>} : memref<36x320xbf16, #tpu.memory_space<vmem>>, vector<4x80xbf16>,
    %c3 = arith.constant 3 : index
    %c0_118 = arith.constant 0 : index
    %c0_119 = arith.constant 0 : index
    %81 = vector.load %arg1[%c3, %c0_118, %c0_119] : memref<4x4x110xbf16, #tpu.memory_space<vmem>>, vector<1x4x80xbf16>
    %82 = vector.shape_cast %81 : vector<1x4x80xbf16> to vector<4x80xbf16>
    %c0_120 = arith.constant 0 : index
    %c240 = arith.constant 240 : index
    %83 = vector.load %arg5[%c0_120, %c240] : memref<36x320xbf16, #tpu.memory_space<vmem>>, vector<4x80xbf16>
    tpu.vector_store %arg5[%c0_120, %c240], %82 {strides = array<i32>} : memref<36x320xbf16, #tpu.memory_space<vmem>>, vector<4x80xbf16>,
    %c3_121 = arith.constant 3 : index
    %c0_122 = arith.constant 0 : index
    %c1_123 = arith.constant 1 : index
    %84 = vector.load %arg1[%c3_121, %c0_122, %c1_123] : memref<4x4x110xbf16, #tpu.memory_space<vmem>>, vector<1x4x80xbf16>
    %85 = vector.shape_cast %84 : vector<1x4x80xbf16> to vector<4x80xbf16>
    %c4_124 = arith.constant 4 : index
    %c240_125 = arith.constant 240 : index
    %86 = vector.load %arg5[%c4_124, %c240_125] : memref<36x320xbf16, #tpu.memory_space<vmem>>, vector<4x80xbf16>
    tpu.vector_store %arg5[%c4_124, %c240_125], %85 {strides = array<i32>} : memref<36x320xbf16, #tpu.memory_space<vmem>>, vector<4x80xbf16>,
    %c3_126 = arith.constant 3 : index
    %c0_127 = arith.constant 0 : index
    %c2_128 = arith.constant 2 : index
    %87 = vector.load %arg1[%c3_126, %c0_127, %c2_128] : memref<4x4x110xbf16, #tpu.memory_space<vmem>>, vector<1x4x80xbf16>
    %88 = vector.shape_cast %87 : vector<1x4x80xbf16> to vector<4x80xbf16>
    %c8_129 = arith.constant 8 : index
    %c240_130 = arith.constant 240 : index
    %89 = vector.load %arg5[%c8_129, %c240_130] : memref<36x320xbf16, #tpu.memory_space<vmem>>, vector<4x80xbf16>
    tpu.vector_store %arg5[%c8_129, %c240_130], %88 {strides = array<i32>} : memref<36x320xbf16, #tpu.memory_space<vmem>>, vector<4x80xbf16>,
    %c3_131 = arith.constant 3 : index
    %c0_132 = arith.constant 0 : index
    %c10_133 = arith.constant 10 : index
    %90 = vector.load %arg1[%c3_131, %c0_132, %c10_133] : memref<4x4x110xbf16, #tpu.memory_space<vmem>>, vector<1x4x80xbf16>
    %91 = vector.shape_cast %90 : vector<1x4x80xbf16> to vector<4x80xbf16>
    %c12_134 = arith.constant 12 : index
    %c240_135 = arith.constant 240 : index
    %92 = vector.load %arg5[%c12_134, %c240_135] : memref<36x320xbf16, #tpu.memory_space<vmem>>, vector<4x80xbf16>
    tpu.vector_store %arg5[%c12_134, %c240_135], %91 {strides = array<i32>} : memref<36x320xbf16, #tpu.memory_space<vmem>>, vector<4x80xbf16>,
    %c3_136 = arith.constant 3 : index
    %c0_137 = arith.constant 0 : index
    %c11_138 = arith.constant 11 : index
    %93 = vector.load %arg1[%c3_136, %c0_137, %c11_138] : memref<4x4x110xbf16, #tpu.memory_space<vmem>>, vector<1x4x80xbf16>
    %94 = vector.shape_cast %93 : vector<1x4x80xbf16> to vector<4x80xbf16>
    %c16_139 = arith.constant 16 : index
    %c240_140 = arith.constant 240 : index
    %95 = vector.load %arg5[%c16_139, %c240_140] : memref<36x320xbf16, #tpu.memory_space<vmem>>, vector<4x80xbf16>
    tpu.vector_store %arg5[%c16_139, %c240_140], %94 {strides = array<i32>} : memref<36x320xbf16, #tpu.memory_space<vmem>>, vector<4x80xbf16>,
    %c3_141 = arith.constant 3 : index
    %c0_142 = arith.constant 0 : index
    %c12_143 = arith.constant 12 : index
    %96 = vector.load %arg1[%c3_141, %c0_142, %c12_143] : memref<4x4x110xbf16, #tpu.memory_space<vmem>>, vector<1x4x80xbf16>
    %97 = vector.shape_cast %96 : vector<1x4x80xbf16> to vector<4x80xbf16>
    %c20_144 = arith.constant 20 : index
    %c240_145 = arith.constant 240 : index
    %98 = vector.load %arg5[%c20_144, %c240_145] : memref<36x320xbf16, #tpu.memory_space<vmem>>, vector<4x80xbf16>
    tpu.vector_store %arg5[%c20_144, %c240_145], %97 {strides = array<i32>} : memref<36x320xbf16, #tpu.memory_space<vmem>>, vector<4x80xbf16>,
    %c3_146 = arith.constant 3 : index
    %c0_147 = arith.constant 0 : index
    %c20_148 = arith.constant 20 : index
    %99 = vector.load %arg1[%c3_146, %c0_147, %c20_148] : memref<4x4x110xbf16, #tpu.memory_space<vmem>>, vector<1x4x80xbf16>
    %100 = vector.shape_cast %99 : vector<1x4x80xbf16> to vector<4x80xbf16>
    %c24_149 = arith.constant 24 : index
    %c240_150 = arith.constant 240 : index
    %101 = vector.load %arg5[%c24_149, %c240_150] : memref<36x320xbf16, #tpu.memory_space<vmem>>, vector<4x80xbf16>
    tpu.vector_store %arg5[%c24_149, %c240_150], %100 {strides = array<i32>} : memref<36x320xbf16, #tpu.memory_space<vmem>>, vector<4x80xbf16>,
    %c3_151 = arith.constant 3 : index
    %c0_152 = arith.constant 0 : index
    %c21_153 = arith.constant 21 : index
    %102 = vector.load %arg1[%c3_151, %c0_152, %c21_153] : memref<4x4x110xbf16, #tpu.memory_space<vmem>>, vector<1x4x80xbf16>
    %103 = vector.shape_cast %102 : vector<1x4x80xbf16> to vector<4x80xbf16>
    %c28_154 = arith.constant 28 : index
    %c240_155 = arith.constant 240 : index
    %104 = vector.load %arg5[%c28_154, %c240_155] : memref<36x320xbf16, #tpu.memory_space<vmem>>, vector<4x80xbf16>
    tpu.vector_store %arg5[%c28_154, %c240_155], %103 {strides = array<i32>} : memref<36x320xbf16, #tpu.memory_space<vmem>>, vector<4x80xbf16>,
    %c3_156 = arith.constant 3 : index
    %c0_157 = arith.constant 0 : index
    %c22_158 = arith.constant 22 : index
    %105 = vector.load %arg1[%c3_156, %c0_157, %c22_158] : memref<4x4x110xbf16, #tpu.memory_space<vmem>>, vector<1x4x80xbf16>
    %106 = vector.shape_cast %105 : vector<1x4x80xbf16> to vector<4x80xbf16>
    %c32_159 = arith.constant 32 : index
    %c240_160 = arith.constant 240 : index
    %107 = vector.load %arg5[%c32_159, %c240_160] : memref<36x320xbf16, #tpu.memory_space<vmem>>, vector<4x80xbf16>
    tpu.vector_store %arg5[%c32_159, %c240_160], %106 {strides = array<i32>} : memref<36x320xbf16, #tpu.memory_space<vmem>>, vector<4x80xbf16>,
    %c0_161 = arith.constant 0 : index
    %c0_162 = arith.constant 0 : index
    %108 = vector.load %arg2[%c0_161, %c0_162] : memref<14x36xbf16, #tpu.memory_space<vmem>>, vector<14x36xbf16>
    %c0_163 = arith.constant 0 : index
    %c0_164 = arith.constant 0 : index
    %109 = vector.load %arg5[%c0_163, %c0_164] : memref<36x320xbf16, #tpu.memory_space<vmem>>, vector<36x320xbf16>
    %cst = arith.constant dense<0.000000e+00> : vector<14x320xf32>
    %110 = tpu.matmul %108, %109, %cst {dimension_numbers = #tpu.dot_dimension_numbers<[1], [0], [0], [1], [0, 0, 1, 1], [], []>} : vector<14x36xbf16>, vector<36x320xbf16>, vector<14x320xf32> -> vector<14x320xf32>
    %111 = tpu.iota {dimensions = array<i32: 1>} : vector<1x320xi32>
    %c10_i32 = arith.constant 10 : i32
    %c0_i32 = arith.constant 0 : i32
    %112 = arith.cmpi eq, %c10_i32, %c0_i32 : i32
    %c1_i32 = arith.constant 1 : i32
    %113 = arith.select %112, %c1_i32, %c10_i32 : i32
    %114 = vector.broadcast %113 : i32 to vector<1x320xi32>
    %115 = arith.remsi %111, %114 : vector<1x320xi32>
    %c0_i32_165 = arith.constant 0 : i32
    %116 = vector.broadcast %c0_i32_165 : i32 to vector<1x320xi32>
    %117 = arith.cmpi ne, %115, %116 : vector<1x320xi32>
    %c0_i32_166 = arith.constant 0 : i32
    %118 = vector.broadcast %c0_i32_166 : i32 to vector<1x320xi32>
    %119 = arith.cmpi slt, %115, %118 : vector<1x320xi32>
    %c0_i32_167 = arith.constant 0 : i32
    %120 = arith.cmpi slt, %113, %c0_i32_167 : i32
    %121 = vector.broadcast %120 : i1 to vector<1x320xi1>
    %122 = vector.broadcast %121 : vector<1x320xi1> to vector<1x320xi1>
    %123 = arith.xori %119, %122 : vector<1x320xi1>
    %124 = arith.andi %123, %117 : vector<1x320xi1>
    %125 = vector.broadcast %113 : i32 to vector<1x320xi32>
    %126 = arith.addi %115, %125 : vector<1x320xi32>
    %127 = arith.select %124, %126, %115 : vector<1x320xi1>, vector<1x320xi32>
    %c8_i32 = arith.constant 8 : i32
    %128 = vector.broadcast %c8_i32 : i32 to vector<1x320xi32>
    %129 = arith.cmpi slt, %127, %128 : vector<1x320xi32>
    %cst_168 = arith.constant 0.000000e+00 : f32
    %130 = vector.shape_cast %129 : vector<1x320xi1> to vector<1x320xi1>
    %131 = vector.broadcast %130 : vector<1x320xi1> to vector<14x320xi1>
    %132 = vector.broadcast %cst_168 : f32 to vector<14x320xf32>
    %133 = arith.select %131, %110, %132 : vector<14x320xi1>, vector<14x320xf32>
    %cst_169 = arith.constant dense<0.000000e+00> : vector<14xf32>
    %134 = vector.multi_reduction <add>, %133, %cst_169 [1] : vector<14x320xf32> to vector<14xf32>
    %135 = vector.shape_cast %134 : vector<14xf32> to vector<14x1xf32>
    %c0_170 = arith.constant 0 : index
    %c0_171 = arith.constant 0 : index
    %c0_172 = arith.constant 0 : index
    %136 = vector.load %arg4[%c0_170, %c0_171, %c0_172] : memref<1x14x2xf32, #tpu.memory_space<vmem>>, vector<1x14x1xf32>
    %137 = vector.shape_cast %136 : vector<1x14x1xf32> to vector<14x1xf32>
    %138 = vector.shape_cast %135 : vector<14x1xf32> to vector<1x14x1xf32>
    tpu.vector_store %arg4[%c0_170, %c0_171, %c0_172], %138 {strides = array<i32>} : memref<1x14x2xf32, #tpu.memory_space<vmem>>, vector<1x14x1xf32>,
    %139 = arith.mulf %133, %133 : vector<14x320xf32>
    %cst_173 = arith.constant dense<0.000000e+00> : vector<14xf32>
    %140 = vector.multi_reduction <add>, %139, %cst_173 [1] : vector<14x320xf32> to vector<14xf32>
    %141 = vector.shape_cast %140 : vector<14xf32> to vector<14x1xf32>
    %c0_174 = arith.constant 0 : index
    %c0_175 = arith.constant 0 : index
    %c1_176 = arith.constant 1 : index
    %142 = vector.load %arg4[%c0_174, %c0_175, %c1_176] : memref<1x14x2xf32, #tpu.memory_space<vmem>>, vector<1x14x1xf32>
    %143 = vector.shape_cast %142 : vector<1x14x1xf32> to vector<14x1xf32>
    %144 = vector.shape_cast %141 : vector<14x1xf32> to vector<1x14x1xf32>
    tpu.vector_store %arg4[%c0_174, %c0_175, %c1_176], %144 {strides = array<i32>} : memref<1x14x2xf32, #tpu.memory_space<vmem>>, vector<1x14x1xf32>,
    %145 = vector.extract_strided_slice %110 {offsets = [0, 0], sizes = [14, 80], strides = [1, 1]} : vector<14x320xf32> to vector<14x80xf32>
    %146 = arith.truncf %145 : vector<14x80xf32> to vector<14x80xbf16>
    %c0_177 = arith.constant 0 : index
    %c0_178 = arith.constant 0 : index
    %c0_179 = arith.constant 0 : index
    %147 = vector.load %arg3[%c0_177, %c0_178, %c0_179] : memref<4x14x80xbf16, #tpu.memory_space<vmem>>, vector<1x14x80xbf16>
    %148 = vector.shape_cast %147 : vector<1x14x80xbf16> to vector<14x80xbf16>
    %149 = vector.shape_cast %146 : vector<14x80xbf16> to vector<1x14x80xbf16>
    tpu.vector_store %arg3[%c0_177, %c0_178, %c0_179], %149 {strides = array<i32>} : memref<4x14x80xbf16, #tpu.memory_space<vmem>>, vector<1x14x80xbf16>,
    %150 = vector.extract_strided_slice %110 {offsets = [0, 80], sizes = [14, 80], strides = [1, 1]} : vector<14x320xf32> to vector<14x80xf32>
    %151 = arith.truncf %150 : vector<14x80xf32> to vector<14x80xbf16>
    %c1_180 = arith.constant 1 : index
    %c0_181 = arith.constant 0 : index
    %c0_182 = arith.constant 0 : index
    %152 = vector.load %arg3[%c1_180, %c0_181, %c0_182] : memref<4x14x80xbf16, #tpu.memory_space<vmem>>, vector<1x14x80xbf16>
    %153 = vector.shape_cast %152 : vector<1x14x80xbf16> to vector<14x80xbf16>
    %154 = vector.shape_cast %151 : vector<14x80xbf16> to vector<1x14x80xbf16>
    tpu.vector_store %arg3[%c1_180, %c0_181, %c0_182], %154 {strides = array<i32>} : memref<4x14x80xbf16, #tpu.memory_space<vmem>>, vector<1x14x80xbf16>,
    %155 = vector.extract_strided_slice %110 {offsets = [0, 160], sizes = [14, 80], strides = [1, 1]} : vector<14x320xf32> to vector<14x80xf32>
    %156 = arith.truncf %155 : vector<14x80xf32> to vector<14x80xbf16>
    %c2_183 = arith.constant 2 : index
    %c0_184 = arith.constant 0 : index
    %c0_185 = arith.constant 0 : index
    %157 = vector.load %arg3[%c2_183, %c0_184, %c0_185] : memref<4x14x80xbf16, #tpu.memory_space<vmem>>, vector<1x14x80xbf16>
    %158 = vector.shape_cast %157 : vector<1x14x80xbf16> to vector<14x80xbf16>
    %159 = vector.shape_cast %156 : vector<14x80xbf16> to vector<1x14x80xbf16>
    tpu.vector_store %arg3[%c2_183, %c0_184, %c0_185], %159 {strides = array<i32>} : memref<4x14x80xbf16, #tpu.memory_space<vmem>>, vector<1x14x80xbf16>,
    %160 = vector.extract_strided_slice %110 {offsets = [0, 240], sizes = [14, 80], strides = [1, 1]} : vector<14x320xf32> to vector<14x80xf32>
    %161 = arith.truncf %160 : vector<14x80xf32> to vector<14x80xbf16>
    %c3_186 = arith.constant 3 : index
    %c0_187 = arith.constant 0 : index
    %c0_188 = arith.constant 0 : index
    %162 = vector.load %arg3[%c3_186, %c0_187, %c0_188] : memref<4x14x80xbf16, #tpu.memory_space<vmem>>, vector<1x14x80xbf16>
    %163 = vector.shape_cast %162 : vector<1x14x80xbf16> to vector<14x80xbf16>
    %164 = vector.shape_cast %161 : vector<14x80xbf16> to vector<1x14x80xbf16>
    tpu.vector_store %arg3[%c3_186, %c0_187, %c0_188], %164 {strides = array<i32>} : memref<4x14x80xbf16, #tpu.memory_space<vmem>>, vector<1x14x80xbf16>,
    return
  }
  func.func @transform_0(%arg0: i32) -> (i32, i32, i32) {
    %c0_i32 = arith.constant 0 : i32
    %c0_i32_0 = arith.constant 0 : i32
    %c0_i32_1 = arith.constant 0 : i32
    return %arg0, %c0_i32, %c0_i32_0 : i32, i32, i32
  }
  func.func @transform_1(%arg0: i32) -> (i32, i32) {
    %c0_i32 = arith.constant 0 : i32
    %c0_i32_0 = arith.constant 0 : i32
    %c0_i32_1 = arith.constant 0 : i32
    return %c0_i32, %c0_i32_0 : i32, i32
  }
  func.func @transform_2(%arg0: i32) -> (i32, i32, i32) {
    %c0_i32 = arith.constant 0 : i32
    %c0_i32_0 = arith.constant 0 : i32
    %c0_i32_1 = arith.constant 0 : i32
    return %arg0, %c0_i32, %c0_i32_0 : i32, i32, i32
  }
  func.func @transform_3(%arg0: i32) -> (i32, i32, i32) {
    %c0_i32 = arith.constant 0 : i32
    %c0_i32_0 = arith.constant 0 : i32
    %c0_i32_1 = arith.constant 0 : i32
    return %arg0, %c0_i32, %c0_i32_0 : i32, i32, i32
  }
}

module attributes {stable_mosaic.version = 11 : i64} {
  func.func @_temporal_conv_kernel(%arg0: i32, %arg1: memref<4x14x80xbf16, #tpu.memory_space<vmem>>, %arg2: memref<14x2xf32, #tpu.memory_space<vmem>>, %arg3: memref<8x42xbf16, #tpu.memory_space<vmem>>, %arg4: memref<4x8x80xbf16, #tpu.memory_space<vmem>>, %arg5: memref<1x8x2xf32, #tpu.memory_space<vmem>>, %arg6: memref<42x320xbf16, #tpu.memory_space<vmem>>) attributes {dimension_semantics = [#tpu.dimension_semantics<parallel>], iteration_bounds = array<i64: 2>, scalar_prefetch = 0 : i64, scratch_operands = 1 : i64, tpu.core_type = #tpu.core_type<tc>, window_params = [{transform_indices = @transform_0, window_bounds = array<i64: 4, 14, 80>}, {pipeline_mode = #tpu.pipeline_mode<synchronous>, transform_indices = @transform_1, window_bounds = array<i64: 14, 2>}, {pipeline_mode = #tpu.pipeline_mode<synchronous>, transform_indices = @transform_2, window_bounds = array<i64: 8, 42>}, {transform_indices = @transform_3, window_bounds = array<i64: 4, 8, 80>}, {transform_indices = @transform_4, window_bounds = array<i64: 1, 8, 2>}]} {
    %c0 = arith.constant 0 : index
    %c0_0 = arith.constant 0 : index
    %0 = vector.load %arg2[%c0, %c0_0] : memref<14x2xf32, #tpu.memory_space<vmem>>, vector<14x1xf32>
    %c0_1 = arith.constant 0 : index
    %c1 = arith.constant 1 : index
    %1 = vector.load %arg2[%c0_1, %c1] : memref<14x2xf32, #tpu.memory_space<vmem>>, vector<14x1xf32>
    %cst = arith.constant 0.000000e+00 : bf16
    %2 = vector.broadcast %cst : bf16 to vector<14x80xbf16>
    %c0_2 = arith.constant 0 : index
    %c0_3 = arith.constant 0 : index
    %3 = vector.load %arg6[%c0_2, %c0_3] : memref<42x320xbf16, #tpu.memory_space<vmem>>, vector<14x80xbf16>
    tpu.vector_store %arg6[%c0_2, %c0_3], %2 {strides = array<i32>} : memref<42x320xbf16, #tpu.memory_space<vmem>>, vector<14x80xbf16>,
    %c0_4 = arith.constant 0 : index
    %c0_5 = arith.constant 0 : index
    %c0_6 = arith.constant 0 : index
    %4 = vector.load %arg1[%c0_4, %c0_5, %c0_6] : memref<4x14x80xbf16, #tpu.memory_space<vmem>>, vector<1x14x80xbf16>
    %5 = vector.shape_cast %4 : vector<1x14x80xbf16> to vector<14x80xbf16>
    %6 = arith.extf %5 : vector<14x80xbf16> to vector<14x80xf32>
    %7 = vector.broadcast %0 : vector<14x1xf32> to vector<14x80xf32>
    %8 = arith.mulf %6, %7 : vector<14x80xf32>
    %9 = vector.broadcast %1 : vector<14x1xf32> to vector<14x80xf32>
    %10 = arith.addf %8, %9 : vector<14x80xf32>
    %cst_7 = arith.constant 0.000000e+00 : f32
    %11 = vector.broadcast %cst_7 : f32 to vector<14x80xf32>
    %12 = arith.maximumf %10, %11 : vector<14x80xf32>
    %13 = arith.truncf %12 : vector<14x80xf32> to vector<14x80xbf16>
    %c0_8 = arith.constant 0 : index
    %c80 = arith.constant 80 : index
    %14 = vector.load %arg6[%c0_8, %c80] : memref<42x320xbf16, #tpu.memory_space<vmem>>, vector<14x80xbf16>
    tpu.vector_store %arg6[%c0_8, %c80], %13 {strides = array<i32>} : memref<42x320xbf16, #tpu.memory_space<vmem>>, vector<14x80xbf16>,
    %c1_9 = arith.constant 1 : index
    %c0_10 = arith.constant 0 : index
    %c0_11 = arith.constant 0 : index
    %15 = vector.load %arg1[%c1_9, %c0_10, %c0_11] : memref<4x14x80xbf16, #tpu.memory_space<vmem>>, vector<1x14x80xbf16>
    %16 = vector.shape_cast %15 : vector<1x14x80xbf16> to vector<14x80xbf16>
    %17 = arith.extf %16 : vector<14x80xbf16> to vector<14x80xf32>
    %18 = vector.broadcast %0 : vector<14x1xf32> to vector<14x80xf32>
    %19 = arith.mulf %17, %18 : vector<14x80xf32>
    %20 = vector.broadcast %1 : vector<14x1xf32> to vector<14x80xf32>
    %21 = arith.addf %19, %20 : vector<14x80xf32>
    %cst_12 = arith.constant 0.000000e+00 : f32
    %22 = vector.broadcast %cst_12 : f32 to vector<14x80xf32>
    %23 = arith.maximumf %21, %22 : vector<14x80xf32>
    %24 = arith.truncf %23 : vector<14x80xf32> to vector<14x80xbf16>
    %c0_13 = arith.constant 0 : index
    %c160 = arith.constant 160 : index
    %25 = vector.load %arg6[%c0_13, %c160] : memref<42x320xbf16, #tpu.memory_space<vmem>>, vector<14x80xbf16>
    tpu.vector_store %arg6[%c0_13, %c160], %24 {strides = array<i32>} : memref<42x320xbf16, #tpu.memory_space<vmem>>, vector<14x80xbf16>,
    %c2 = arith.constant 2 : index
    %c0_14 = arith.constant 0 : index
    %c0_15 = arith.constant 0 : index
    %26 = vector.load %arg1[%c2, %c0_14, %c0_15] : memref<4x14x80xbf16, #tpu.memory_space<vmem>>, vector<1x14x80xbf16>
    %27 = vector.shape_cast %26 : vector<1x14x80xbf16> to vector<14x80xbf16>
    %28 = arith.extf %27 : vector<14x80xbf16> to vector<14x80xf32>
    %29 = vector.broadcast %0 : vector<14x1xf32> to vector<14x80xf32>
    %30 = arith.mulf %28, %29 : vector<14x80xf32>
    %31 = vector.broadcast %1 : vector<14x1xf32> to vector<14x80xf32>
    %32 = arith.addf %30, %31 : vector<14x80xf32>
    %cst_16 = arith.constant 0.000000e+00 : f32
    %33 = vector.broadcast %cst_16 : f32 to vector<14x80xf32>
    %34 = arith.maximumf %32, %33 : vector<14x80xf32>
    %35 = arith.truncf %34 : vector<14x80xf32> to vector<14x80xbf16>
    %c0_17 = arith.constant 0 : index
    %c240 = arith.constant 240 : index
    %36 = vector.load %arg6[%c0_17, %c240] : memref<42x320xbf16, #tpu.memory_space<vmem>>, vector<14x80xbf16>
    tpu.vector_store %arg6[%c0_17, %c240], %35 {strides = array<i32>} : memref<42x320xbf16, #tpu.memory_space<vmem>>, vector<14x80xbf16>,
    %c0_18 = arith.constant 0 : index
    %c0_19 = arith.constant 0 : index
    %c0_20 = arith.constant 0 : index
    %37 = vector.load %arg1[%c0_18, %c0_19, %c0_20] : memref<4x14x80xbf16, #tpu.memory_space<vmem>>, vector<1x14x80xbf16>
    %38 = vector.shape_cast %37 : vector<1x14x80xbf16> to vector<14x80xbf16>
    %39 = arith.extf %38 : vector<14x80xbf16> to vector<14x80xf32>
    %40 = vector.broadcast %0 : vector<14x1xf32> to vector<14x80xf32>
    %41 = arith.mulf %39, %40 : vector<14x80xf32>
    %42 = vector.broadcast %1 : vector<14x1xf32> to vector<14x80xf32>
    %43 = arith.addf %41, %42 : vector<14x80xf32>
    %cst_21 = arith.constant 0.000000e+00 : f32
    %44 = vector.broadcast %cst_21 : f32 to vector<14x80xf32>
    %45 = arith.maximumf %43, %44 : vector<14x80xf32>
    %46 = arith.truncf %45 : vector<14x80xf32> to vector<14x80xbf16>
    %c14 = arith.constant 14 : index
    %c0_22 = arith.constant 0 : index
    %47 = vector.load %arg6[%c14, %c0_22] : memref<42x320xbf16, #tpu.memory_space<vmem>>, vector<14x80xbf16>
    tpu.vector_store %arg6[%c14, %c0_22], %46 {strides = array<i32>} : memref<42x320xbf16, #tpu.memory_space<vmem>>, vector<14x80xbf16>,
    %c1_23 = arith.constant 1 : index
    %c0_24 = arith.constant 0 : index
    %c0_25 = arith.constant 0 : index
    %48 = vector.load %arg1[%c1_23, %c0_24, %c0_25] : memref<4x14x80xbf16, #tpu.memory_space<vmem>>, vector<1x14x80xbf16>
    %49 = vector.shape_cast %48 : vector<1x14x80xbf16> to vector<14x80xbf16>
    %50 = arith.extf %49 : vector<14x80xbf16> to vector<14x80xf32>
    %51 = vector.broadcast %0 : vector<14x1xf32> to vector<14x80xf32>
    %52 = arith.mulf %50, %51 : vector<14x80xf32>
    %53 = vector.broadcast %1 : vector<14x1xf32> to vector<14x80xf32>
    %54 = arith.addf %52, %53 : vector<14x80xf32>
    %cst_26 = arith.constant 0.000000e+00 : f32
    %55 = vector.broadcast %cst_26 : f32 to vector<14x80xf32>
    %56 = arith.maximumf %54, %55 : vector<14x80xf32>
    %57 = arith.truncf %56 : vector<14x80xf32> to vector<14x80xbf16>
    %c14_27 = arith.constant 14 : index
    %c80_28 = arith.constant 80 : index
    %58 = vector.load %arg6[%c14_27, %c80_28] : memref<42x320xbf16, #tpu.memory_space<vmem>>, vector<14x80xbf16>
    tpu.vector_store %arg6[%c14_27, %c80_28], %57 {strides = array<i32>} : memref<42x320xbf16, #tpu.memory_space<vmem>>, vector<14x80xbf16>,
    %c2_29 = arith.constant 2 : index
    %c0_30 = arith.constant 0 : index
    %c0_31 = arith.constant 0 : index
    %59 = vector.load %arg1[%c2_29, %c0_30, %c0_31] : memref<4x14x80xbf16, #tpu.memory_space<vmem>>, vector<1x14x80xbf16>
    %60 = vector.shape_cast %59 : vector<1x14x80xbf16> to vector<14x80xbf16>
    %61 = arith.extf %60 : vector<14x80xbf16> to vector<14x80xf32>
    %62 = vector.broadcast %0 : vector<14x1xf32> to vector<14x80xf32>
    %63 = arith.mulf %61, %62 : vector<14x80xf32>
    %64 = vector.broadcast %1 : vector<14x1xf32> to vector<14x80xf32>
    %65 = arith.addf %63, %64 : vector<14x80xf32>
    %cst_32 = arith.constant 0.000000e+00 : f32
    %66 = vector.broadcast %cst_32 : f32 to vector<14x80xf32>
    %67 = arith.maximumf %65, %66 : vector<14x80xf32>
    %68 = arith.truncf %67 : vector<14x80xf32> to vector<14x80xbf16>
    %c14_33 = arith.constant 14 : index
    %c160_34 = arith.constant 160 : index
    %69 = vector.load %arg6[%c14_33, %c160_34] : memref<42x320xbf16, #tpu.memory_space<vmem>>, vector<14x80xbf16>
    tpu.vector_store %arg6[%c14_33, %c160_34], %68 {strides = array<i32>} : memref<42x320xbf16, #tpu.memory_space<vmem>>, vector<14x80xbf16>,
    %c3 = arith.constant 3 : index
    %c0_35 = arith.constant 0 : index
    %c0_36 = arith.constant 0 : index
    %70 = vector.load %arg1[%c3, %c0_35, %c0_36] : memref<4x14x80xbf16, #tpu.memory_space<vmem>>, vector<1x14x80xbf16>
    %71 = vector.shape_cast %70 : vector<1x14x80xbf16> to vector<14x80xbf16>
    %72 = arith.extf %71 : vector<14x80xbf16> to vector<14x80xf32>
    %73 = vector.broadcast %0 : vector<14x1xf32> to vector<14x80xf32>
    %74 = arith.mulf %72, %73 : vector<14x80xf32>
    %75 = vector.broadcast %1 : vector<14x1xf32> to vector<14x80xf32>
    %76 = arith.addf %74, %75 : vector<14x80xf32>
    %cst_37 = arith.constant 0.000000e+00 : f32
    %77 = vector.broadcast %cst_37 : f32 to vector<14x80xf32>
    %78 = arith.maximumf %76, %77 : vector<14x80xf32>
    %79 = arith.truncf %78 : vector<14x80xf32> to vector<14x80xbf16>
    %c14_38 = arith.constant 14 : index
    %c240_39 = arith.constant 240 : index
    %80 = vector.load %arg6[%c14_38, %c240_39] : memref<42x320xbf16, #tpu.memory_space<vmem>>, vector<14x80xbf16>
    tpu.vector_store %arg6[%c14_38, %c240_39], %79 {strides = array<i32>} : memref<42x320xbf16, #tpu.memory_space<vmem>>, vector<14x80xbf16>,
    %c1_40 = arith.constant 1 : index
    %c0_41 = arith.constant 0 : index
    %c0_42 = arith.constant 0 : index
    %81 = vector.load %arg1[%c1_40, %c0_41, %c0_42] : memref<4x14x80xbf16, #tpu.memory_space<vmem>>, vector<1x14x80xbf16>
    %82 = vector.shape_cast %81 : vector<1x14x80xbf16> to vector<14x80xbf16>
    %83 = arith.extf %82 : vector<14x80xbf16> to vector<14x80xf32>
    %84 = vector.broadcast %0 : vector<14x1xf32> to vector<14x80xf32>
    %85 = arith.mulf %83, %84 : vector<14x80xf32>
    %86 = vector.broadcast %1 : vector<14x1xf32> to vector<14x80xf32>
    %87 = arith.addf %85, %86 : vector<14x80xf32>
    %cst_43 = arith.constant 0.000000e+00 : f32
    %88 = vector.broadcast %cst_43 : f32 to vector<14x80xf32>
    %89 = arith.maximumf %87, %88 : vector<14x80xf32>
    %90 = arith.truncf %89 : vector<14x80xf32> to vector<14x80xbf16>
    %c28 = arith.constant 28 : index
    %c0_44 = arith.constant 0 : index
    %91 = vector.load %arg6[%c28, %c0_44] : memref<42x320xbf16, #tpu.memory_space<vmem>>, vector<14x80xbf16>
    tpu.vector_store %arg6[%c28, %c0_44], %90 {strides = array<i32>} : memref<42x320xbf16, #tpu.memory_space<vmem>>, vector<14x80xbf16>,
    %c2_45 = arith.constant 2 : index
    %c0_46 = arith.constant 0 : index
    %c0_47 = arith.constant 0 : index
    %92 = vector.load %arg1[%c2_45, %c0_46, %c0_47] : memref<4x14x80xbf16, #tpu.memory_space<vmem>>, vector<1x14x80xbf16>
    %93 = vector.shape_cast %92 : vector<1x14x80xbf16> to vector<14x80xbf16>
    %94 = arith.extf %93 : vector<14x80xbf16> to vector<14x80xf32>
    %95 = vector.broadcast %0 : vector<14x1xf32> to vector<14x80xf32>
    %96 = arith.mulf %94, %95 : vector<14x80xf32>
    %97 = vector.broadcast %1 : vector<14x1xf32> to vector<14x80xf32>
    %98 = arith.addf %96, %97 : vector<14x80xf32>
    %cst_48 = arith.constant 0.000000e+00 : f32
    %99 = vector.broadcast %cst_48 : f32 to vector<14x80xf32>
    %100 = arith.maximumf %98, %99 : vector<14x80xf32>
    %101 = arith.truncf %100 : vector<14x80xf32> to vector<14x80xbf16>
    %c28_49 = arith.constant 28 : index
    %c80_50 = arith.constant 80 : index
    %102 = vector.load %arg6[%c28_49, %c80_50] : memref<42x320xbf16, #tpu.memory_space<vmem>>, vector<14x80xbf16>
    tpu.vector_store %arg6[%c28_49, %c80_50], %101 {strides = array<i32>} : memref<42x320xbf16, #tpu.memory_space<vmem>>, vector<14x80xbf16>,
    %c3_51 = arith.constant 3 : index
    %c0_52 = arith.constant 0 : index
    %c0_53 = arith.constant 0 : index
    %103 = vector.load %arg1[%c3_51, %c0_52, %c0_53] : memref<4x14x80xbf16, #tpu.memory_space<vmem>>, vector<1x14x80xbf16>
    %104 = vector.shape_cast %103 : vector<1x14x80xbf16> to vector<14x80xbf16>
    %105 = arith.extf %104 : vector<14x80xbf16> to vector<14x80xf32>
    %106 = vector.broadcast %0 : vector<14x1xf32> to vector<14x80xf32>
    %107 = arith.mulf %105, %106 : vector<14x80xf32>
    %108 = vector.broadcast %1 : vector<14x1xf32> to vector<14x80xf32>
    %109 = arith.addf %107, %108 : vector<14x80xf32>
    %cst_54 = arith.constant 0.000000e+00 : f32
    %110 = vector.broadcast %cst_54 : f32 to vector<14x80xf32>
    %111 = arith.maximumf %109, %110 : vector<14x80xf32>
    %112 = arith.truncf %111 : vector<14x80xf32> to vector<14x80xbf16>
    %c28_55 = arith.constant 28 : index
    %c160_56 = arith.constant 160 : index
    %113 = vector.load %arg6[%c28_55, %c160_56] : memref<42x320xbf16, #tpu.memory_space<vmem>>, vector<14x80xbf16>
    tpu.vector_store %arg6[%c28_55, %c160_56], %112 {strides = array<i32>} : memref<42x320xbf16, #tpu.memory_space<vmem>>, vector<14x80xbf16>,
    %cst_57 = arith.constant 0.000000e+00 : bf16
    %114 = vector.broadcast %cst_57 : bf16 to vector<14x80xbf16>
    %c28_58 = arith.constant 28 : index
    %c240_59 = arith.constant 240 : index
    %115 = vector.load %arg6[%c28_58, %c240_59] : memref<42x320xbf16, #tpu.memory_space<vmem>>, vector<14x80xbf16>
    tpu.vector_store %arg6[%c28_58, %c240_59], %114 {strides = array<i32>} : memref<42x320xbf16, #tpu.memory_space<vmem>>, vector<14x80xbf16>,
    %c0_60 = arith.constant 0 : index
    %c0_61 = arith.constant 0 : index
    %116 = vector.load %arg3[%c0_60, %c0_61] : memref<8x42xbf16, #tpu.memory_space<vmem>>, vector<8x42xbf16>
    %c0_62 = arith.constant 0 : index
    %c0_63 = arith.constant 0 : index
    %117 = vector.load %arg6[%c0_62, %c0_63] : memref<42x320xbf16, #tpu.memory_space<vmem>>, vector<42x320xbf16>
    %cst_64 = arith.constant dense<0.000000e+00> : vector<8x320xf32>
    %118 = tpu.matmul %116, %117, %cst_64 {dimension_numbers = #tpu.dot_dimension_numbers<[1], [0], [0], [1], [0, 0, 1, 1], [], []>} : vector<8x42xbf16>, vector<42x320xbf16>, vector<8x320xf32> -> vector<8x320xf32>
    %119 = tpu.iota {dimensions = array<i32: 1>} : vector<1x320xi32>
    %c10_i32 = arith.constant 10 : i32
    %c0_i32 = arith.constant 0 : i32
    %120 = arith.cmpi eq, %c10_i32, %c0_i32 : i32
    %c1_i32 = arith.constant 1 : i32
    %121 = arith.select %120, %c1_i32, %c10_i32 : i32
    %122 = vector.broadcast %121 : i32 to vector<1x320xi32>
    %123 = arith.remsi %119, %122 : vector<1x320xi32>
    %c0_i32_65 = arith.constant 0 : i32
    %124 = vector.broadcast %c0_i32_65 : i32 to vector<1x320xi32>
    %125 = arith.cmpi ne, %123, %124 : vector<1x320xi32>
    %c0_i32_66 = arith.constant 0 : i32
    %126 = vector.broadcast %c0_i32_66 : i32 to vector<1x320xi32>
    %127 = arith.cmpi slt, %123, %126 : vector<1x320xi32>
    %c0_i32_67 = arith.constant 0 : i32
    %128 = arith.cmpi slt, %121, %c0_i32_67 : i32
    %129 = vector.broadcast %128 : i1 to vector<1x320xi1>
    %130 = vector.broadcast %129 : vector<1x320xi1> to vector<1x320xi1>
    %131 = arith.xori %127, %130 : vector<1x320xi1>
    %132 = arith.andi %131, %125 : vector<1x320xi1>
    %133 = vector.broadcast %121 : i32 to vector<1x320xi32>
    %134 = arith.addi %123, %133 : vector<1x320xi32>
    %135 = arith.select %132, %134, %123 : vector<1x320xi1>, vector<1x320xi32>
    %c8_i32 = arith.constant 8 : i32
    %136 = vector.broadcast %c8_i32 : i32 to vector<1x320xi32>
    %137 = arith.cmpi slt, %135, %136 : vector<1x320xi32>
    %cst_68 = arith.constant 0.000000e+00 : f32
    %138 = vector.shape_cast %137 : vector<1x320xi1> to vector<1x320xi1>
    %139 = vector.broadcast %138 : vector<1x320xi1> to vector<8x320xi1>
    %140 = vector.broadcast %cst_68 : f32 to vector<8x320xf32>
    %141 = arith.select %139, %118, %140 : vector<8x320xi1>, vector<8x320xf32>
    %cst_69 = arith.constant dense<0.000000e+00> : vector<8xf32>
    %142 = vector.multi_reduction <add>, %141, %cst_69 [1] : vector<8x320xf32> to vector<8xf32>
    %143 = vector.shape_cast %142 : vector<8xf32> to vector<8x1xf32>
    %c0_70 = arith.constant 0 : index
    %c0_71 = arith.constant 0 : index
    %c0_72 = arith.constant 0 : index
    %144 = vector.load %arg5[%c0_70, %c0_71, %c0_72] : memref<1x8x2xf32, #tpu.memory_space<vmem>>, vector<1x8x1xf32>
    %145 = vector.shape_cast %144 : vector<1x8x1xf32> to vector<8x1xf32>
    %146 = vector.shape_cast %143 : vector<8x1xf32> to vector<1x8x1xf32>
    tpu.vector_store %arg5[%c0_70, %c0_71, %c0_72], %146 {strides = array<i32>} : memref<1x8x2xf32, #tpu.memory_space<vmem>>, vector<1x8x1xf32>,
    %147 = arith.mulf %141, %141 : vector<8x320xf32>
    %cst_73 = arith.constant dense<0.000000e+00> : vector<8xf32>
    %148 = vector.multi_reduction <add>, %147, %cst_73 [1] : vector<8x320xf32> to vector<8xf32>
    %149 = vector.shape_cast %148 : vector<8xf32> to vector<8x1xf32>
    %c0_74 = arith.constant 0 : index
    %c0_75 = arith.constant 0 : index
    %c1_76 = arith.constant 1 : index
    %150 = vector.load %arg5[%c0_74, %c0_75, %c1_76] : memref<1x8x2xf32, #tpu.memory_space<vmem>>, vector<1x8x1xf32>
    %151 = vector.shape_cast %150 : vector<1x8x1xf32> to vector<8x1xf32>
    %152 = vector.shape_cast %149 : vector<8x1xf32> to vector<1x8x1xf32>
    tpu.vector_store %arg5[%c0_74, %c0_75, %c1_76], %152 {strides = array<i32>} : memref<1x8x2xf32, #tpu.memory_space<vmem>>, vector<1x8x1xf32>,
    %153 = vector.extract_strided_slice %118 {offsets = [0, 0], sizes = [8, 80], strides = [1, 1]} : vector<8x320xf32> to vector<8x80xf32>
    %154 = arith.truncf %153 : vector<8x80xf32> to vector<8x80xbf16>
    %c0_77 = arith.constant 0 : index
    %c0_78 = arith.constant 0 : index
    %c0_79 = arith.constant 0 : index
    %155 = vector.load %arg4[%c0_77, %c0_78, %c0_79] : memref<4x8x80xbf16, #tpu.memory_space<vmem>>, vector<1x8x80xbf16>
    %156 = vector.shape_cast %155 : vector<1x8x80xbf16> to vector<8x80xbf16>
    %157 = vector.shape_cast %154 : vector<8x80xbf16> to vector<1x8x80xbf16>
    tpu.vector_store %arg4[%c0_77, %c0_78, %c0_79], %157 {strides = array<i32>} : memref<4x8x80xbf16, #tpu.memory_space<vmem>>, vector<1x8x80xbf16>,
    %158 = vector.extract_strided_slice %118 {offsets = [0, 80], sizes = [8, 80], strides = [1, 1]} : vector<8x320xf32> to vector<8x80xf32>
    %159 = arith.truncf %158 : vector<8x80xf32> to vector<8x80xbf16>
    %c1_80 = arith.constant 1 : index
    %c0_81 = arith.constant 0 : index
    %c0_82 = arith.constant 0 : index
    %160 = vector.load %arg4[%c1_80, %c0_81, %c0_82] : memref<4x8x80xbf16, #tpu.memory_space<vmem>>, vector<1x8x80xbf16>
    %161 = vector.shape_cast %160 : vector<1x8x80xbf16> to vector<8x80xbf16>
    %162 = vector.shape_cast %159 : vector<8x80xbf16> to vector<1x8x80xbf16>
    tpu.vector_store %arg4[%c1_80, %c0_81, %c0_82], %162 {strides = array<i32>} : memref<4x8x80xbf16, #tpu.memory_space<vmem>>, vector<1x8x80xbf16>,
    %163 = vector.extract_strided_slice %118 {offsets = [0, 160], sizes = [8, 80], strides = [1, 1]} : vector<8x320xf32> to vector<8x80xf32>
    %164 = arith.truncf %163 : vector<8x80xf32> to vector<8x80xbf16>
    %c2_83 = arith.constant 2 : index
    %c0_84 = arith.constant 0 : index
    %c0_85 = arith.constant 0 : index
    %165 = vector.load %arg4[%c2_83, %c0_84, %c0_85] : memref<4x8x80xbf16, #tpu.memory_space<vmem>>, vector<1x8x80xbf16>
    %166 = vector.shape_cast %165 : vector<1x8x80xbf16> to vector<8x80xbf16>
    %167 = vector.shape_cast %164 : vector<8x80xbf16> to vector<1x8x80xbf16>
    tpu.vector_store %arg4[%c2_83, %c0_84, %c0_85], %167 {strides = array<i32>} : memref<4x8x80xbf16, #tpu.memory_space<vmem>>, vector<1x8x80xbf16>,
    %168 = vector.extract_strided_slice %118 {offsets = [0, 240], sizes = [8, 80], strides = [1, 1]} : vector<8x320xf32> to vector<8x80xf32>
    %169 = arith.truncf %168 : vector<8x80xf32> to vector<8x80xbf16>
    %c3_86 = arith.constant 3 : index
    %c0_87 = arith.constant 0 : index
    %c0_88 = arith.constant 0 : index
    %170 = vector.load %arg4[%c3_86, %c0_87, %c0_88] : memref<4x8x80xbf16, #tpu.memory_space<vmem>>, vector<1x8x80xbf16>
    %171 = vector.shape_cast %170 : vector<1x8x80xbf16> to vector<8x80xbf16>
    %172 = vector.shape_cast %169 : vector<8x80xbf16> to vector<1x8x80xbf16>
    tpu.vector_store %arg4[%c3_86, %c0_87, %c0_88], %172 {strides = array<i32>} : memref<4x8x80xbf16, #tpu.memory_space<vmem>>, vector<1x8x80xbf16>,
    return
  }
  func.func @transform_0(%arg0: i32) -> (i32, i32, i32) {
    %c0_i32 = arith.constant 0 : i32
    %c0_i32_0 = arith.constant 0 : i32
    %c0_i32_1 = arith.constant 0 : i32
    return %arg0, %c0_i32, %c0_i32_0 : i32, i32, i32
  }
  func.func @transform_1(%arg0: i32) -> (i32, i32) {
    %c0_i32 = arith.constant 0 : i32
    %c0_i32_0 = arith.constant 0 : i32
    %c0_i32_1 = arith.constant 0 : i32
    return %c0_i32, %c0_i32_0 : i32, i32
  }
  func.func @transform_2(%arg0: i32) -> (i32, i32) {
    %c0_i32 = arith.constant 0 : i32
    %c0_i32_0 = arith.constant 0 : i32
    %c0_i32_1 = arith.constant 0 : i32
    return %c0_i32, %c0_i32_0 : i32, i32
  }
  func.func @transform_3(%arg0: i32) -> (i32, i32, i32) {
    %c0_i32 = arith.constant 0 : i32
    %c0_i32_0 = arith.constant 0 : i32
    %c0_i32_1 = arith.constant 0 : i32
    return %arg0, %c0_i32, %c0_i32_0 : i32, i32, i32
  }
  func.func @transform_4(%arg0: i32) -> (i32, i32, i32) {
    %c0_i32 = arith.constant 0 : i32
    %c0_i32_0 = arith.constant 0 : i32
    %c0_i32_1 = arith.constant 0 : i32
    return %arg0, %c0_i32, %c0_i32_0 : i32, i32, i32
  }
}

module attributes {stable_mosaic.version = 11 : i64} {
  func.func @_bn_dual_kernel(%arg0: i32, %arg1: memref<4x8x80xbf16, #tpu.memory_space<vmem>>, %arg2: memref<8x2xf32, #tpu.memory_space<vmem>>, %arg3: memref<4x8x80xbf16, #tpu.memory_space<vmem>>, %arg4: memref<4x8x80xbf16, #tpu.memory_space<vmem>>) attributes {dimension_semantics = [#tpu.dimension_semantics<parallel>], iteration_bounds = array<i64: 2>, scalar_prefetch = 0 : i64, scratch_operands = 0 : i64, tpu.core_type = #tpu.core_type<tc>, window_params = [{transform_indices = @transform_0, window_bounds = array<i64: 4, 8, 80>}, {pipeline_mode = #tpu.pipeline_mode<synchronous>, transform_indices = @transform_1, window_bounds = array<i64: 8, 2>}, {transform_indices = @transform_2, window_bounds = array<i64: 4, 8, 80>}, {transform_indices = @transform_3, window_bounds = array<i64: 4, 8, 80>}]} {
    %c0 = arith.constant 0 : index
    %c0_0 = arith.constant 0 : index
    %c0_1 = arith.constant 0 : index
    %0 = vector.load %arg1[%c0, %c0_0, %c0_1] : memref<4x8x80xbf16, #tpu.memory_space<vmem>>, vector<4x8x80xbf16>
    %1 = arith.extf %0 : vector<4x8x80xbf16> to vector<4x8x80xf32>
    %c0_2 = arith.constant 0 : index
    %c0_3 = arith.constant 0 : index
    %2 = vector.load %arg2[%c0_2, %c0_3] : memref<8x2xf32, #tpu.memory_space<vmem>>, vector<8x1xf32>
    %3 = vector.shape_cast %2 : vector<8x1xf32> to vector<1x8x1xf32>
    %4 = vector.broadcast %3 : vector<1x8x1xf32> to vector<4x8x80xf32>
    %5 = arith.mulf %1, %4 : vector<4x8x80xf32>
    %c0_4 = arith.constant 0 : index
    %c1 = arith.constant 1 : index
    %6 = vector.load %arg2[%c0_4, %c1] : memref<8x2xf32, #tpu.memory_space<vmem>>, vector<8x1xf32>
    %7 = vector.shape_cast %6 : vector<8x1xf32> to vector<1x8x1xf32>
    %8 = vector.broadcast %7 : vector<1x8x1xf32> to vector<4x8x80xf32>
    %9 = arith.addf %5, %8 : vector<4x8x80xf32>
    %10 = arith.truncf %9 : vector<4x8x80xf32> to vector<4x8x80xbf16>
    %c0_5 = arith.constant 0 : index
    %c0_6 = arith.constant 0 : index
    %c0_7 = arith.constant 0 : index
    %11 = vector.load %arg3[%c0_5, %c0_6, %c0_7] : memref<4x8x80xbf16, #tpu.memory_space<vmem>>, vector<4x8x80xbf16>
    tpu.vector_store %arg3[%c0_5, %c0_6, %c0_7], %10 {strides = array<i32>} : memref<4x8x80xbf16, #tpu.memory_space<vmem>>, vector<4x8x80xbf16>,
    %cst = arith.constant 0.000000e+00 : f32
    %12 = vector.broadcast %cst : f32 to vector<4x8x80xf32>
    %13 = arith.maximumf %9, %12 : vector<4x8x80xf32>
    %14 = arith.truncf %13 : vector<4x8x80xf32> to vector<4x8x80xbf16>
    %c0_8 = arith.constant 0 : index
    %c0_9 = arith.constant 0 : index
    %c0_10 = arith.constant 0 : index
    %15 = vector.load %arg4[%c0_8, %c0_9, %c0_10] : memref<4x8x80xbf16, #tpu.memory_space<vmem>>, vector<4x8x80xbf16>
    tpu.vector_store %arg4[%c0_8, %c0_9, %c0_10], %14 {strides = array<i32>} : memref<4x8x80xbf16, #tpu.memory_space<vmem>>, vector<4x8x80xbf16>,
    return
  }
  func.func @transform_0(%arg0: i32) -> (i32, i32, i32) {
    %c0_i32 = arith.constant 0 : i32
    %c0_i32_0 = arith.constant 0 : i32
    %c0_i32_1 = arith.constant 0 : i32
    return %arg0, %c0_i32, %c0_i32_0 : i32, i32, i32
  }
  func.func @transform_1(%arg0: i32) -> (i32, i32) {
    %c0_i32 = arith.constant 0 : i32
    %c0_i32_0 = arith.constant 0 : i32
    %c0_i32_1 = arith.constant 0 : i32
    return %c0_i32, %c0_i32_0 : i32, i32
  }
  func.func @transform_2(%arg0: i32) -> (i32, i32, i32) {
    %c0_i32 = arith.constant 0 : i32
    %c0_i32_0 = arith.constant 0 : i32
    %c0_i32_1 = arith.constant 0 : i32
    return %arg0, %c0_i32, %c0_i32_0 : i32, i32, i32
  }
  func.func @transform_3(%arg0: i32) -> (i32, i32, i32) {
    %c0_i32 = arith.constant 0 : i32
    %c0_i32_0 = arith.constant 0 : i32
    %c0_i32_1 = arith.constant 0 : i32
    return %arg0, %c0_i32, %c0_i32_0 : i32, i32, i32
  }
}

module attributes {stable_mosaic.version = 11 : i64} {
  func.func @_spatial_conv_kernel(%arg0: i32, %arg1: memref<4x8x110xbf16, #tpu.memory_space<vmem>>, %arg2: memref<18x72xbf16, #tpu.memory_space<vmem>>, %arg3: memref<4x18x80xbf16, #tpu.memory_space<vmem>>, %arg4: memref<1x18x2xf32, #tpu.memory_space<vmem>>, %arg5: memref<72x320xbf16, #tpu.memory_space<vmem>>) attributes {dimension_semantics = [#tpu.dimension_semantics<parallel>], iteration_bounds = array<i64: 2>, scalar_prefetch = 0 : i64, scratch_operands = 1 : i64, tpu.core_type = #tpu.core_type<tc>, window_params = [{transform_indices = @transform_0, window_bounds = array<i64: 4, 8, 110>}, {pipeline_mode = #tpu.pipeline_mode<synchronous>, transform_indices = @transform_1, window_bounds = array<i64: 18, 72>}, {transform_indices = @transform_2, window_bounds = array<i64: 4, 18, 80>}, {transform_indices = @transform_3, window_bounds = array<i64: 1, 18, 2>}]} {
    %c0 = arith.constant 0 : index
    %c0_0 = arith.constant 0 : index
    %c0_1 = arith.constant 0 : index
    %0 = vector.load %arg1[%c0, %c0_0, %c0_1] : memref<4x8x110xbf16, #tpu.memory_space<vmem>>, vector<1x8x80xbf16>
    %1 = vector.shape_cast %0 : vector<1x8x80xbf16> to vector<8x80xbf16>
    %c0_2 = arith.constant 0 : index
    %c0_3 = arith.constant 0 : index
    %2 = vector.load %arg5[%c0_2, %c0_3] : memref<72x320xbf16, #tpu.memory_space<vmem>>, vector<8x80xbf16>
    tpu.vector_store %arg5[%c0_2, %c0_3], %1 {strides = array<i32>} : memref<72x320xbf16, #tpu.memory_space<vmem>>, vector<8x80xbf16>,
    %c0_4 = arith.constant 0 : index
    %c0_5 = arith.constant 0 : index
    %c1 = arith.constant 1 : index
    %3 = vector.load %arg1[%c0_4, %c0_5, %c1] : memref<4x8x110xbf16, #tpu.memory_space<vmem>>, vector<1x8x80xbf16>
    %4 = vector.shape_cast %3 : vector<1x8x80xbf16> to vector<8x80xbf16>
    %c8 = arith.constant 8 : index
    %c0_6 = arith.constant 0 : index
    %5 = vector.load %arg5[%c8, %c0_6] : memref<72x320xbf16, #tpu.memory_space<vmem>>, vector<8x80xbf16>
    tpu.vector_store %arg5[%c8, %c0_6], %4 {strides = array<i32>} : memref<72x320xbf16, #tpu.memory_space<vmem>>, vector<8x80xbf16>,
    %c0_7 = arith.constant 0 : index
    %c0_8 = arith.constant 0 : index
    %c2 = arith.constant 2 : index
    %6 = vector.load %arg1[%c0_7, %c0_8, %c2] : memref<4x8x110xbf16, #tpu.memory_space<vmem>>, vector<1x8x80xbf16>
    %7 = vector.shape_cast %6 : vector<1x8x80xbf16> to vector<8x80xbf16>
    %c16 = arith.constant 16 : index
    %c0_9 = arith.constant 0 : index
    %8 = vector.load %arg5[%c16, %c0_9] : memref<72x320xbf16, #tpu.memory_space<vmem>>, vector<8x80xbf16>
    tpu.vector_store %arg5[%c16, %c0_9], %7 {strides = array<i32>} : memref<72x320xbf16, #tpu.memory_space<vmem>>, vector<8x80xbf16>,
    %c0_10 = arith.constant 0 : index
    %c0_11 = arith.constant 0 : index
    %c10 = arith.constant 10 : index
    %9 = vector.load %arg1[%c0_10, %c0_11, %c10] : memref<4x8x110xbf16, #tpu.memory_space<vmem>>, vector<1x8x80xbf16>
    %10 = vector.shape_cast %9 : vector<1x8x80xbf16> to vector<8x80xbf16>
    %c24 = arith.constant 24 : index
    %c0_12 = arith.constant 0 : index
    %11 = vector.load %arg5[%c24, %c0_12] : memref<72x320xbf16, #tpu.memory_space<vmem>>, vector<8x80xbf16>
    tpu.vector_store %arg5[%c24, %c0_12], %10 {strides = array<i32>} : memref<72x320xbf16, #tpu.memory_space<vmem>>, vector<8x80xbf16>,
    %c0_13 = arith.constant 0 : index
    %c0_14 = arith.constant 0 : index
    %c11 = arith.constant 11 : index
    %12 = vector.load %arg1[%c0_13, %c0_14, %c11] : memref<4x8x110xbf16, #tpu.memory_space<vmem>>, vector<1x8x80xbf16>
    %13 = vector.shape_cast %12 : vector<1x8x80xbf16> to vector<8x80xbf16>
    %c32 = arith.constant 32 : index
    %c0_15 = arith.constant 0 : index
    %14 = vector.load %arg5[%c32, %c0_15] : memref<72x320xbf16, #tpu.memory_space<vmem>>, vector<8x80xbf16>
    tpu.vector_store %arg5[%c32, %c0_15], %13 {strides = array<i32>} : memref<72x320xbf16, #tpu.memory_space<vmem>>, vector<8x80xbf16>,
    %c0_16 = arith.constant 0 : index
    %c0_17 = arith.constant 0 : index
    %c12 = arith.constant 12 : index
    %15 = vector.load %arg1[%c0_16, %c0_17, %c12] : memref<4x8x110xbf16, #tpu.memory_space<vmem>>, vector<1x8x80xbf16>
    %16 = vector.shape_cast %15 : vector<1x8x80xbf16> to vector<8x80xbf16>
    %c40 = arith.constant 40 : index
    %c0_18 = arith.constant 0 : index
    %17 = vector.load %arg5[%c40, %c0_18] : memref<72x320xbf16, #tpu.memory_space<vmem>>, vector<8x80xbf16>
    tpu.vector_store %arg5[%c40, %c0_18], %16 {strides = array<i32>} : memref<72x320xbf16, #tpu.memory_space<vmem>>, vector<8x80xbf16>,
    %c0_19 = arith.constant 0 : index
    %c0_20 = arith.constant 0 : index
    %c20 = arith.constant 20 : index
    %18 = vector.load %arg1[%c0_19, %c0_20, %c20] : memref<4x8x110xbf16, #tpu.memory_space<vmem>>, vector<1x8x80xbf16>
    %19 = vector.shape_cast %18 : vector<1x8x80xbf16> to vector<8x80xbf16>
    %c48 = arith.constant 48 : index
    %c0_21 = arith.constant 0 : index
    %20 = vector.load %arg5[%c48, %c0_21] : memref<72x320xbf16, #tpu.memory_space<vmem>>, vector<8x80xbf16>
    tpu.vector_store %arg5[%c48, %c0_21], %19 {strides = array<i32>} : memref<72x320xbf16, #tpu.memory_space<vmem>>, vector<8x80xbf16>,
    %c0_22 = arith.constant 0 : index
    %c0_23 = arith.constant 0 : index
    %c21 = arith.constant 21 : index
    %21 = vector.load %arg1[%c0_22, %c0_23, %c21] : memref<4x8x110xbf16, #tpu.memory_space<vmem>>, vector<1x8x80xbf16>
    %22 = vector.shape_cast %21 : vector<1x8x80xbf16> to vector<8x80xbf16>
    %c56 = arith.constant 56 : index
    %c0_24 = arith.constant 0 : index
    %23 = vector.load %arg5[%c56, %c0_24] : memref<72x320xbf16, #tpu.memory_space<vmem>>, vector<8x80xbf16>
    tpu.vector_store %arg5[%c56, %c0_24], %22 {strides = array<i32>} : memref<72x320xbf16, #tpu.memory_space<vmem>>, vector<8x80xbf16>,
    %c0_25 = arith.constant 0 : index
    %c0_26 = arith.constant 0 : index
    %c22 = arith.constant 22 : index
    %24 = vector.load %arg1[%c0_25, %c0_26, %c22] : memref<4x8x110xbf16, #tpu.memory_space<vmem>>, vector<1x8x80xbf16>
    %25 = vector.shape_cast %24 : vector<1x8x80xbf16> to vector<8x80xbf16>
    %c64 = arith.constant 64 : index
    %c0_27 = arith.constant 0 : index
    %26 = vector.load %arg5[%c64, %c0_27] : memref<72x320xbf16, #tpu.memory_space<vmem>>, vector<8x80xbf16>
    tpu.vector_store %arg5[%c64, %c0_27], %25 {strides = array<i32>} : memref<72x320xbf16, #tpu.memory_space<vmem>>, vector<8x80xbf16>,
    %c1_28 = arith.constant 1 : index
    %c0_29 = arith.constant 0 : index
    %c0_30 = arith.constant 0 : index
    %27 = vector.load %arg1[%c1_28, %c0_29, %c0_30] : memref<4x8x110xbf16, #tpu.memory_space<vmem>>, vector<1x8x80xbf16>
    %28 = vector.shape_cast %27 : vector<1x8x80xbf16> to vector<8x80xbf16>
    %c0_31 = arith.constant 0 : index
    %c80 = arith.constant 80 : index
    %29 = vector.load %arg5[%c0_31, %c80] : memref<72x320xbf16, #tpu.memory_space<vmem>>, vector<8x80xbf16>
    tpu.vector_store %arg5[%c0_31, %c80], %28 {strides = array<i32>} : memref<72x320xbf16, #tpu.memory_space<vmem>>, vector<8x80xbf16>,
    %c1_32 = arith.constant 1 : index
    %c0_33 = arith.constant 0 : index
    %c1_34 = arith.constant 1 : index
    %30 = vector.load %arg1[%c1_32, %c0_33, %c1_34] : memref<4x8x110xbf16, #tpu.memory_space<vmem>>, vector<1x8x80xbf16>
    %31 = vector.shape_cast %30 : vector<1x8x80xbf16> to vector<8x80xbf16>
    %c8_35 = arith.constant 8 : index
    %c80_36 = arith.constant 80 : index
    %32 = vector.load %arg5[%c8_35, %c80_36] : memref<72x320xbf16, #tpu.memory_space<vmem>>, vector<8x80xbf16>
    tpu.vector_store %arg5[%c8_35, %c80_36], %31 {strides = array<i32>} : memref<72x320xbf16, #tpu.memory_space<vmem>>, vector<8x80xbf16>,
    %c1_37 = arith.constant 1 : index
    %c0_38 = arith.constant 0 : index
    %c2_39 = arith.constant 2 : index
    %33 = vector.load %arg1[%c1_37, %c0_38, %c2_39] : memref<4x8x110xbf16, #tpu.memory_space<vmem>>, vector<1x8x80xbf16>
    %34 = vector.shape_cast %33 : vector<1x8x80xbf16> to vector<8x80xbf16>
    %c16_40 = arith.constant 16 : index
    %c80_41 = arith.constant 80 : index
    %35 = vector.load %arg5[%c16_40, %c80_41] : memref<72x320xbf16, #tpu.memory_space<vmem>>, vector<8x80xbf16>
    tpu.vector_store %arg5[%c16_40, %c80_41], %34 {strides = array<i32>} : memref<72x320xbf16, #tpu.memory_space<vmem>>, vector<8x80xbf16>,
    %c1_42 = arith.constant 1 : index
    %c0_43 = arith.constant 0 : index
    %c10_44 = arith.constant 10 : index
    %36 = vector.load %arg1[%c1_42, %c0_43, %c10_44] : memref<4x8x110xbf16, #tpu.memory_space<vmem>>, vector<1x8x80xbf16>
    %37 = vector.shape_cast %36 : vector<1x8x80xbf16> to vector<8x80xbf16>
    %c24_45 = arith.constant 24 : index
    %c80_46 = arith.constant 80 : index
    %38 = vector.load %arg5[%c24_45, %c80_46] : memref<72x320xbf16, #tpu.memory_space<vmem>>, vector<8x80xbf16>
    tpu.vector_store %arg5[%c24_45, %c80_46], %37 {strides = array<i32>} : memref<72x320xbf16, #tpu.memory_space<vmem>>, vector<8x80xbf16>,
    %c1_47 = arith.constant 1 : index
    %c0_48 = arith.constant 0 : index
    %c11_49 = arith.constant 11 : index
    %39 = vector.load %arg1[%c1_47, %c0_48, %c11_49] : memref<4x8x110xbf16, #tpu.memory_space<vmem>>, vector<1x8x80xbf16>
    %40 = vector.shape_cast %39 : vector<1x8x80xbf16> to vector<8x80xbf16>
    %c32_50 = arith.constant 32 : index
    %c80_51 = arith.constant 80 : index
    %41 = vector.load %arg5[%c32_50, %c80_51] : memref<72x320xbf16, #tpu.memory_space<vmem>>, vector<8x80xbf16>
    tpu.vector_store %arg5[%c32_50, %c80_51], %40 {strides = array<i32>} : memref<72x320xbf16, #tpu.memory_space<vmem>>, vector<8x80xbf16>,
    %c1_52 = arith.constant 1 : index
    %c0_53 = arith.constant 0 : index
    %c12_54 = arith.constant 12 : index
    %42 = vector.load %arg1[%c1_52, %c0_53, %c12_54] : memref<4x8x110xbf16, #tpu.memory_space<vmem>>, vector<1x8x80xbf16>
    %43 = vector.shape_cast %42 : vector<1x8x80xbf16> to vector<8x80xbf16>
    %c40_55 = arith.constant 40 : index
    %c80_56 = arith.constant 80 : index
    %44 = vector.load %arg5[%c40_55, %c80_56] : memref<72x320xbf16, #tpu.memory_space<vmem>>, vector<8x80xbf16>
    tpu.vector_store %arg5[%c40_55, %c80_56], %43 {strides = array<i32>} : memref<72x320xbf16, #tpu.memory_space<vmem>>, vector<8x80xbf16>,
    %c1_57 = arith.constant 1 : index
    %c0_58 = arith.constant 0 : index
    %c20_59 = arith.constant 20 : index
    %45 = vector.load %arg1[%c1_57, %c0_58, %c20_59] : memref<4x8x110xbf16, #tpu.memory_space<vmem>>, vector<1x8x80xbf16>
    %46 = vector.shape_cast %45 : vector<1x8x80xbf16> to vector<8x80xbf16>
    %c48_60 = arith.constant 48 : index
    %c80_61 = arith.constant 80 : index
    %47 = vector.load %arg5[%c48_60, %c80_61] : memref<72x320xbf16, #tpu.memory_space<vmem>>, vector<8x80xbf16>
    tpu.vector_store %arg5[%c48_60, %c80_61], %46 {strides = array<i32>} : memref<72x320xbf16, #tpu.memory_space<vmem>>, vector<8x80xbf16>,
    %c1_62 = arith.constant 1 : index
    %c0_63 = arith.constant 0 : index
    %c21_64 = arith.constant 21 : index
    %48 = vector.load %arg1[%c1_62, %c0_63, %c21_64] : memref<4x8x110xbf16, #tpu.memory_space<vmem>>, vector<1x8x80xbf16>
    %49 = vector.shape_cast %48 : vector<1x8x80xbf16> to vector<8x80xbf16>
    %c56_65 = arith.constant 56 : index
    %c80_66 = arith.constant 80 : index
    %50 = vector.load %arg5[%c56_65, %c80_66] : memref<72x320xbf16, #tpu.memory_space<vmem>>, vector<8x80xbf16>
    tpu.vector_store %arg5[%c56_65, %c80_66], %49 {strides = array<i32>} : memref<72x320xbf16, #tpu.memory_space<vmem>>, vector<8x80xbf16>,
    %c1_67 = arith.constant 1 : index
    %c0_68 = arith.constant 0 : index
    %c22_69 = arith.constant 22 : index
    %51 = vector.load %arg1[%c1_67, %c0_68, %c22_69] : memref<4x8x110xbf16, #tpu.memory_space<vmem>>, vector<1x8x80xbf16>
    %52 = vector.shape_cast %51 : vector<1x8x80xbf16> to vector<8x80xbf16>
    %c64_70 = arith.constant 64 : index
    %c80_71 = arith.constant 80 : index
    %53 = vector.load %arg5[%c64_70, %c80_71] : memref<72x320xbf16, #tpu.memory_space<vmem>>, vector<8x80xbf16>
    tpu.vector_store %arg5[%c64_70, %c80_71], %52 {strides = array<i32>} : memref<72x320xbf16, #tpu.memory_space<vmem>>, vector<8x80xbf16>,
    %c2_72 = arith.constant 2 : index
    %c0_73 = arith.constant 0 : index
    %c0_74 = arith.constant 0 : index
    %54 = vector.load %arg1[%c2_72, %c0_73, %c0_74] : memref<4x8x110xbf16, #tpu.memory_space<vmem>>, vector<1x8x80xbf16>
    %55 = vector.shape_cast %54 : vector<1x8x80xbf16> to vector<8x80xbf16>
    %c0_75 = arith.constant 0 : index
    %c160 = arith.constant 160 : index
    %56 = vector.load %arg5[%c0_75, %c160] : memref<72x320xbf16, #tpu.memory_space<vmem>>, vector<8x80xbf16>
    tpu.vector_store %arg5[%c0_75, %c160], %55 {strides = array<i32>} : memref<72x320xbf16, #tpu.memory_space<vmem>>, vector<8x80xbf16>,
    %c2_76 = arith.constant 2 : index
    %c0_77 = arith.constant 0 : index
    %c1_78 = arith.constant 1 : index
    %57 = vector.load %arg1[%c2_76, %c0_77, %c1_78] : memref<4x8x110xbf16, #tpu.memory_space<vmem>>, vector<1x8x80xbf16>
    %58 = vector.shape_cast %57 : vector<1x8x80xbf16> to vector<8x80xbf16>
    %c8_79 = arith.constant 8 : index
    %c160_80 = arith.constant 160 : index
    %59 = vector.load %arg5[%c8_79, %c160_80] : memref<72x320xbf16, #tpu.memory_space<vmem>>, vector<8x80xbf16>
    tpu.vector_store %arg5[%c8_79, %c160_80], %58 {strides = array<i32>} : memref<72x320xbf16, #tpu.memory_space<vmem>>, vector<8x80xbf16>,
    %c2_81 = arith.constant 2 : index
    %c0_82 = arith.constant 0 : index
    %c2_83 = arith.constant 2 : index
    %60 = vector.load %arg1[%c2_81, %c0_82, %c2_83] : memref<4x8x110xbf16, #tpu.memory_space<vmem>>, vector<1x8x80xbf16>
    %61 = vector.shape_cast %60 : vector<1x8x80xbf16> to vector<8x80xbf16>
    %c16_84 = arith.constant 16 : index
    %c160_85 = arith.constant 160 : index
    %62 = vector.load %arg5[%c16_84, %c160_85] : memref<72x320xbf16, #tpu.memory_space<vmem>>, vector<8x80xbf16>
    tpu.vector_store %arg5[%c16_84, %c160_85], %61 {strides = array<i32>} : memref<72x320xbf16, #tpu.memory_space<vmem>>, vector<8x80xbf16>,
    %c2_86 = arith.constant 2 : index
    %c0_87 = arith.constant 0 : index
    %c10_88 = arith.constant 10 : index
    %63 = vector.load %arg1[%c2_86, %c0_87, %c10_88] : memref<4x8x110xbf16, #tpu.memory_space<vmem>>, vector<1x8x80xbf16>
    %64 = vector.shape_cast %63 : vector<1x8x80xbf16> to vector<8x80xbf16>
    %c24_89 = arith.constant 24 : index
    %c160_90 = arith.constant 160 : index
    %65 = vector.load %arg5[%c24_89, %c160_90] : memref<72x320xbf16, #tpu.memory_space<vmem>>, vector<8x80xbf16>
    tpu.vector_store %arg5[%c24_89, %c160_90], %64 {strides = array<i32>} : memref<72x320xbf16, #tpu.memory_space<vmem>>, vector<8x80xbf16>,
    %c2_91 = arith.constant 2 : index
    %c0_92 = arith.constant 0 : index
    %c11_93 = arith.constant 11 : index
    %66 = vector.load %arg1[%c2_91, %c0_92, %c11_93] : memref<4x8x110xbf16, #tpu.memory_space<vmem>>, vector<1x8x80xbf16>
    %67 = vector.shape_cast %66 : vector<1x8x80xbf16> to vector<8x80xbf16>
    %c32_94 = arith.constant 32 : index
    %c160_95 = arith.constant 160 : index
    %68 = vector.load %arg5[%c32_94, %c160_95] : memref<72x320xbf16, #tpu.memory_space<vmem>>, vector<8x80xbf16>
    tpu.vector_store %arg5[%c32_94, %c160_95], %67 {strides = array<i32>} : memref<72x320xbf16, #tpu.memory_space<vmem>>, vector<8x80xbf16>,
    %c2_96 = arith.constant 2 : index
    %c0_97 = arith.constant 0 : index
    %c12_98 = arith.constant 12 : index
    %69 = vector.load %arg1[%c2_96, %c0_97, %c12_98] : memref<4x8x110xbf16, #tpu.memory_space<vmem>>, vector<1x8x80xbf16>
    %70 = vector.shape_cast %69 : vector<1x8x80xbf16> to vector<8x80xbf16>
    %c40_99 = arith.constant 40 : index
    %c160_100 = arith.constant 160 : index
    %71 = vector.load %arg5[%c40_99, %c160_100] : memref<72x320xbf16, #tpu.memory_space<vmem>>, vector<8x80xbf16>
    tpu.vector_store %arg5[%c40_99, %c160_100], %70 {strides = array<i32>} : memref<72x320xbf16, #tpu.memory_space<vmem>>, vector<8x80xbf16>,
    %c2_101 = arith.constant 2 : index
    %c0_102 = arith.constant 0 : index
    %c20_103 = arith.constant 20 : index
    %72 = vector.load %arg1[%c2_101, %c0_102, %c20_103] : memref<4x8x110xbf16, #tpu.memory_space<vmem>>, vector<1x8x80xbf16>
    %73 = vector.shape_cast %72 : vector<1x8x80xbf16> to vector<8x80xbf16>
    %c48_104 = arith.constant 48 : index
    %c160_105 = arith.constant 160 : index
    %74 = vector.load %arg5[%c48_104, %c160_105] : memref<72x320xbf16, #tpu.memory_space<vmem>>, vector<8x80xbf16>
    tpu.vector_store %arg5[%c48_104, %c160_105], %73 {strides = array<i32>} : memref<72x320xbf16, #tpu.memory_space<vmem>>, vector<8x80xbf16>,
    %c2_106 = arith.constant 2 : index
    %c0_107 = arith.constant 0 : index
    %c21_108 = arith.constant 21 : index
    %75 = vector.load %arg1[%c2_106, %c0_107, %c21_108] : memref<4x8x110xbf16, #tpu.memory_space<vmem>>, vector<1x8x80xbf16>
    %76 = vector.shape_cast %75 : vector<1x8x80xbf16> to vector<8x80xbf16>
    %c56_109 = arith.constant 56 : index
    %c160_110 = arith.constant 160 : index
    %77 = vector.load %arg5[%c56_109, %c160_110] : memref<72x320xbf16, #tpu.memory_space<vmem>>, vector<8x80xbf16>
    tpu.vector_store %arg5[%c56_109, %c160_110], %76 {strides = array<i32>} : memref<72x320xbf16, #tpu.memory_space<vmem>>, vector<8x80xbf16>,
    %c2_111 = arith.constant 2 : index
    %c0_112 = arith.constant 0 : index
    %c22_113 = arith.constant 22 : index
    %78 = vector.load %arg1[%c2_111, %c0_112, %c22_113] : memref<4x8x110xbf16, #tpu.memory_space<vmem>>, vector<1x8x80xbf16>
    %79 = vector.shape_cast %78 : vector<1x8x80xbf16> to vector<8x80xbf16>
    %c64_114 = arith.constant 64 : index
    %c160_115 = arith.constant 160 : index
    %80 = vector.load %arg5[%c64_114, %c160_115] : memref<72x320xbf16, #tpu.memory_space<vmem>>, vector<8x80xbf16>
    tpu.vector_store %arg5[%c64_114, %c160_115], %79 {strides = array<i32>} : memref<72x320xbf16, #tpu.memory_space<vmem>>, vector<8x80xbf16>,
    %c3 = arith.constant 3 : index
    %c0_116 = arith.constant 0 : index
    %c0_117 = arith.constant 0 : index
    %81 = vector.load %arg1[%c3, %c0_116, %c0_117] : memref<4x8x110xbf16, #tpu.memory_space<vmem>>, vector<1x8x80xbf16>
    %82 = vector.shape_cast %81 : vector<1x8x80xbf16> to vector<8x80xbf16>
    %c0_118 = arith.constant 0 : index
    %c240 = arith.constant 240 : index
    %83 = vector.load %arg5[%c0_118, %c240] : memref<72x320xbf16, #tpu.memory_space<vmem>>, vector<8x80xbf16>
    tpu.vector_store %arg5[%c0_118, %c240], %82 {strides = array<i32>} : memref<72x320xbf16, #tpu.memory_space<vmem>>, vector<8x80xbf16>,
    %c3_119 = arith.constant 3 : index
    %c0_120 = arith.constant 0 : index
    %c1_121 = arith.constant 1 : index
    %84 = vector.load %arg1[%c3_119, %c0_120, %c1_121] : memref<4x8x110xbf16, #tpu.memory_space<vmem>>, vector<1x8x80xbf16>
    %85 = vector.shape_cast %84 : vector<1x8x80xbf16> to vector<8x80xbf16>
    %c8_122 = arith.constant 8 : index
    %c240_123 = arith.constant 240 : index
    %86 = vector.load %arg5[%c8_122, %c240_123] : memref<72x320xbf16, #tpu.memory_space<vmem>>, vector<8x80xbf16>
    tpu.vector_store %arg5[%c8_122, %c240_123], %85 {strides = array<i32>} : memref<72x320xbf16, #tpu.memory_space<vmem>>, vector<8x80xbf16>,
    %c3_124 = arith.constant 3 : index
    %c0_125 = arith.constant 0 : index
    %c2_126 = arith.constant 2 : index
    %87 = vector.load %arg1[%c3_124, %c0_125, %c2_126] : memref<4x8x110xbf16, #tpu.memory_space<vmem>>, vector<1x8x80xbf16>
    %88 = vector.shape_cast %87 : vector<1x8x80xbf16> to vector<8x80xbf16>
    %c16_127 = arith.constant 16 : index
    %c240_128 = arith.constant 240 : index
    %89 = vector.load %arg5[%c16_127, %c240_128] : memref<72x320xbf16, #tpu.memory_space<vmem>>, vector<8x80xbf16>
    tpu.vector_store %arg5[%c16_127, %c240_128], %88 {strides = array<i32>} : memref<72x320xbf16, #tpu.memory_space<vmem>>, vector<8x80xbf16>,
    %c3_129 = arith.constant 3 : index
    %c0_130 = arith.constant 0 : index
    %c10_131 = arith.constant 10 : index
    %90 = vector.load %arg1[%c3_129, %c0_130, %c10_131] : memref<4x8x110xbf16, #tpu.memory_space<vmem>>, vector<1x8x80xbf16>
    %91 = vector.shape_cast %90 : vector<1x8x80xbf16> to vector<8x80xbf16>
    %c24_132 = arith.constant 24 : index
    %c240_133 = arith.constant 240 : index
    %92 = vector.load %arg5[%c24_132, %c240_133] : memref<72x320xbf16, #tpu.memory_space<vmem>>, vector<8x80xbf16>
    tpu.vector_store %arg5[%c24_132, %c240_133], %91 {strides = array<i32>} : memref<72x320xbf16, #tpu.memory_space<vmem>>, vector<8x80xbf16>,
    %c3_134 = arith.constant 3 : index
    %c0_135 = arith.constant 0 : index
    %c11_136 = arith.constant 11 : index
    %93 = vector.load %arg1[%c3_134, %c0_135, %c11_136] : memref<4x8x110xbf16, #tpu.memory_space<vmem>>, vector<1x8x80xbf16>
    %94 = vector.shape_cast %93 : vector<1x8x80xbf16> to vector<8x80xbf16>
    %c32_137 = arith.constant 32 : index
    %c240_138 = arith.constant 240 : index
    %95 = vector.load %arg5[%c32_137, %c240_138] : memref<72x320xbf16, #tpu.memory_space<vmem>>, vector<8x80xbf16>
    tpu.vector_store %arg5[%c32_137, %c240_138], %94 {strides = array<i32>} : memref<72x320xbf16, #tpu.memory_space<vmem>>, vector<8x80xbf16>,
    %c3_139 = arith.constant 3 : index
    %c0_140 = arith.constant 0 : index
    %c12_141 = arith.constant 12 : index
    %96 = vector.load %arg1[%c3_139, %c0_140, %c12_141] : memref<4x8x110xbf16, #tpu.memory_space<vmem>>, vector<1x8x80xbf16>
    %97 = vector.shape_cast %96 : vector<1x8x80xbf16> to vector<8x80xbf16>
    %c40_142 = arith.constant 40 : index
    %c240_143 = arith.constant 240 : index
    %98 = vector.load %arg5[%c40_142, %c240_143] : memref<72x320xbf16, #tpu.memory_space<vmem>>, vector<8x80xbf16>
    tpu.vector_store %arg5[%c40_142, %c240_143], %97 {strides = array<i32>} : memref<72x320xbf16, #tpu.memory_space<vmem>>, vector<8x80xbf16>,
    %c3_144 = arith.constant 3 : index
    %c0_145 = arith.constant 0 : index
    %c20_146 = arith.constant 20 : index
    %99 = vector.load %arg1[%c3_144, %c0_145, %c20_146] : memref<4x8x110xbf16, #tpu.memory_space<vmem>>, vector<1x8x80xbf16>
    %100 = vector.shape_cast %99 : vector<1x8x80xbf16> to vector<8x80xbf16>
    %c48_147 = arith.constant 48 : index
    %c240_148 = arith.constant 240 : index
    %101 = vector.load %arg5[%c48_147, %c240_148] : memref<72x320xbf16, #tpu.memory_space<vmem>>, vector<8x80xbf16>
    tpu.vector_store %arg5[%c48_147, %c240_148], %100 {strides = array<i32>} : memref<72x320xbf16, #tpu.memory_space<vmem>>, vector<8x80xbf16>,
    %c3_149 = arith.constant 3 : index
    %c0_150 = arith.constant 0 : index
    %c21_151 = arith.constant 21 : index
    %102 = vector.load %arg1[%c3_149, %c0_150, %c21_151] : memref<4x8x110xbf16, #tpu.memory_space<vmem>>, vector<1x8x80xbf16>
    %103 = vector.shape_cast %102 : vector<1x8x80xbf16> to vector<8x80xbf16>
    %c56_152 = arith.constant 56 : index
    %c240_153 = arith.constant 240 : index
    %104 = vector.load %arg5[%c56_152, %c240_153] : memref<72x320xbf16, #tpu.memory_space<vmem>>, vector<8x80xbf16>
    tpu.vector_store %arg5[%c56_152, %c240_153], %103 {strides = array<i32>} : memref<72x320xbf16, #tpu.memory_space<vmem>>, vector<8x80xbf16>,
    %c3_154 = arith.constant 3 : index
    %c0_155 = arith.constant 0 : index
    %c22_156 = arith.constant 22 : index
    %105 = vector.load %arg1[%c3_154, %c0_155, %c22_156] : memref<4x8x110xbf16, #tpu.memory_space<vmem>>, vector<1x8x80xbf16>
    %106 = vector.shape_cast %105 : vector<1x8x80xbf16> to vector<8x80xbf16>
    %c64_157 = arith.constant 64 : index
    %c240_158 = arith.constant 240 : index
    %107 = vector.load %arg5[%c64_157, %c240_158] : memref<72x320xbf16, #tpu.memory_space<vmem>>, vector<8x80xbf16>
    tpu.vector_store %arg5[%c64_157, %c240_158], %106 {strides = array<i32>} : memref<72x320xbf16, #tpu.memory_space<vmem>>, vector<8x80xbf16>,
    %c0_159 = arith.constant 0 : index
    %c0_160 = arith.constant 0 : index
    %108 = vector.load %arg2[%c0_159, %c0_160] : memref<18x72xbf16, #tpu.memory_space<vmem>>, vector<18x72xbf16>
    %c0_161 = arith.constant 0 : index
    %c0_162 = arith.constant 0 : index
    %109 = vector.load %arg5[%c0_161, %c0_162] : memref<72x320xbf16, #tpu.memory_space<vmem>>, vector<72x320xbf16>
    %cst = arith.constant dense<0.000000e+00> : vector<18x320xf32>
    %110 = tpu.matmul %108, %109, %cst {dimension_numbers = #tpu.dot_dimension_numbers<[1], [0], [0], [1], [0, 0, 1, 1], [], []>} : vector<18x72xbf16>, vector<72x320xbf16>, vector<18x320xf32> -> vector<18x320xf32>
    %111 = tpu.iota {dimensions = array<i32: 1>} : vector<1x320xi32>
    %c10_i32 = arith.constant 10 : i32
    %c0_i32 = arith.constant 0 : i32
    %112 = arith.cmpi eq, %c10_i32, %c0_i32 : i32
    %c1_i32 = arith.constant 1 : i32
    %113 = arith.select %112, %c1_i32, %c10_i32 : i32
    %114 = vector.broadcast %113 : i32 to vector<1x320xi32>
    %115 = arith.remsi %111, %114 : vector<1x320xi32>
    %c0_i32_163 = arith.constant 0 : i32
    %116 = vector.broadcast %c0_i32_163 : i32 to vector<1x320xi32>
    %117 = arith.cmpi ne, %115, %116 : vector<1x320xi32>
    %c0_i32_164 = arith.constant 0 : i32
    %118 = vector.broadcast %c0_i32_164 : i32 to vector<1x320xi32>
    %119 = arith.cmpi slt, %115, %118 : vector<1x320xi32>
    %c0_i32_165 = arith.constant 0 : i32
    %120 = arith.cmpi slt, %113, %c0_i32_165 : i32
    %121 = vector.broadcast %120 : i1 to vector<1x320xi1>
    %122 = vector.broadcast %121 : vector<1x320xi1> to vector<1x320xi1>
    %123 = arith.xori %119, %122 : vector<1x320xi1>
    %124 = arith.andi %123, %117 : vector<1x320xi1>
    %125 = vector.broadcast %113 : i32 to vector<1x320xi32>
    %126 = arith.addi %115, %125 : vector<1x320xi32>
    %127 = arith.select %124, %126, %115 : vector<1x320xi1>, vector<1x320xi32>
    %c8_i32 = arith.constant 8 : i32
    %128 = vector.broadcast %c8_i32 : i32 to vector<1x320xi32>
    %129 = arith.cmpi slt, %127, %128 : vector<1x320xi32>
    %cst_166 = arith.constant 0.000000e+00 : f32
    %130 = vector.shape_cast %129 : vector<1x320xi1> to vector<1x320xi1>
    %131 = vector.broadcast %130 : vector<1x320xi1> to vector<18x320xi1>
    %132 = vector.broadcast %cst_166 : f32 to vector<18x320xf32>
    %133 = arith.select %131, %110, %132 : vector<18x320xi1>, vector<18x320xf32>
    %cst_167 = arith.constant dense<0.000000e+00> : vector<18xf32>
    %134 = vector.multi_reduction <add>, %133, %cst_167 [1] : vector<18x320xf32> to vector<18xf32>
    %135 = vector.shape_cast %134 : vector<18xf32> to vector<18x1xf32>
    %c0_168 = arith.constant 0 : index
    %c0_169 = arith.constant 0 : index
    %c0_170 = arith.constant 0 : index
    %136 = vector.load %arg4[%c0_168, %c0_169, %c0_170] : memref<1x18x2xf32, #tpu.memory_space<vmem>>, vector<1x18x1xf32>
    %137 = vector.shape_cast %136 : vector<1x18x1xf32> to vector<18x1xf32>
    %138 = vector.shape_cast %135 : vector<18x1xf32> to vector<1x18x1xf32>
    tpu.vector_store %arg4[%c0_168, %c0_169, %c0_170], %138 {strides = array<i32>} : memref<1x18x2xf32, #tpu.memory_space<vmem>>, vector<1x18x1xf32>,
    %139 = arith.mulf %133, %133 : vector<18x320xf32>
    %cst_171 = arith.constant dense<0.000000e+00> : vector<18xf32>
    %140 = vector.multi_reduction <add>, %139, %cst_171 [1] : vector<18x320xf32> to vector<18xf32>
    %141 = vector.shape_cast %140 : vector<18xf32> to vector<18x1xf32>
    %c0_172 = arith.constant 0 : index
    %c0_173 = arith.constant 0 : index
    %c1_174 = arith.constant 1 : index
    %142 = vector.load %arg4[%c0_172, %c0_173, %c1_174] : memref<1x18x2xf32, #tpu.memory_space<vmem>>, vector<1x18x1xf32>
    %143 = vector.shape_cast %142 : vector<1x18x1xf32> to vector<18x1xf32>
    %144 = vector.shape_cast %141 : vector<18x1xf32> to vector<1x18x1xf32>
    tpu.vector_store %arg4[%c0_172, %c0_173, %c1_174], %144 {strides = array<i32>} : memref<1x18x2xf32, #tpu.memory_space<vmem>>, vector<1x18x1xf32>,
    %145 = vector.extract_strided_slice %110 {offsets = [0, 0], sizes = [18, 80], strides = [1, 1]} : vector<18x320xf32> to vector<18x80xf32>
    %146 = arith.truncf %145 : vector<18x80xf32> to vector<18x80xbf16>
    %c0_175 = arith.constant 0 : index
    %c0_176 = arith.constant 0 : index
    %c0_177 = arith.constant 0 : index
    %147 = vector.load %arg3[%c0_175, %c0_176, %c0_177] : memref<4x18x80xbf16, #tpu.memory_space<vmem>>, vector<1x18x80xbf16>
    %148 = vector.shape_cast %147 : vector<1x18x80xbf16> to vector<18x80xbf16>
    %149 = vector.shape_cast %146 : vector<18x80xbf16> to vector<1x18x80xbf16>
    tpu.vector_store %arg3[%c0_175, %c0_176, %c0_177], %149 {strides = array<i32>} : memref<4x18x80xbf16, #tpu.memory_space<vmem>>, vector<1x18x80xbf16>,
    %150 = vector.extract_strided_slice %110 {offsets = [0, 80], sizes = [18, 80], strides = [1, 1]} : vector<18x320xf32> to vector<18x80xf32>
    %151 = arith.truncf %150 : vector<18x80xf32> to vector<18x80xbf16>
    %c1_178 = arith.constant 1 : index
    %c0_179 = arith.constant 0 : index
    %c0_180 = arith.constant 0 : index
    %152 = vector.load %arg3[%c1_178, %c0_179, %c0_180] : memref<4x18x80xbf16, #tpu.memory_space<vmem>>, vector<1x18x80xbf16>
    %153 = vector.shape_cast %152 : vector<1x18x80xbf16> to vector<18x80xbf16>
    %154 = vector.shape_cast %151 : vector<18x80xbf16> to vector<1x18x80xbf16>
    tpu.vector_store %arg3[%c1_178, %c0_179, %c0_180], %154 {strides = array<i32>} : memref<4x18x80xbf16, #tpu.memory_space<vmem>>, vector<1x18x80xbf16>,
    %155 = vector.extract_strided_slice %110 {offsets = [0, 160], sizes = [18, 80], strides = [1, 1]} : vector<18x320xf32> to vector<18x80xf32>
    %156 = arith.truncf %155 : vector<18x80xf32> to vector<18x80xbf16>
    %c2_181 = arith.constant 2 : index
    %c0_182 = arith.constant 0 : index
    %c0_183 = arith.constant 0 : index
    %157 = vector.load %arg3[%c2_181, %c0_182, %c0_183] : memref<4x18x80xbf16, #tpu.memory_space<vmem>>, vector<1x18x80xbf16>
    %158 = vector.shape_cast %157 : vector<1x18x80xbf16> to vector<18x80xbf16>
    %159 = vector.shape_cast %156 : vector<18x80xbf16> to vector<1x18x80xbf16>
    tpu.vector_store %arg3[%c2_181, %c0_182, %c0_183], %159 {strides = array<i32>} : memref<4x18x80xbf16, #tpu.memory_space<vmem>>, vector<1x18x80xbf16>,
    %160 = vector.extract_strided_slice %110 {offsets = [0, 240], sizes = [18, 80], strides = [1, 1]} : vector<18x320xf32> to vector<18x80xf32>
    %161 = arith.truncf %160 : vector<18x80xf32> to vector<18x80xbf16>
    %c3_184 = arith.constant 3 : index
    %c0_185 = arith.constant 0 : index
    %c0_186 = arith.constant 0 : index
    %162 = vector.load %arg3[%c3_184, %c0_185, %c0_186] : memref<4x18x80xbf16, #tpu.memory_space<vmem>>, vector<1x18x80xbf16>
    %163 = vector.shape_cast %162 : vector<1x18x80xbf16> to vector<18x80xbf16>
    %164 = vector.shape_cast %161 : vector<18x80xbf16> to vector<1x18x80xbf16>
    tpu.vector_store %arg3[%c3_184, %c0_185, %c0_186], %164 {strides = array<i32>} : memref<4x18x80xbf16, #tpu.memory_space<vmem>>, vector<1x18x80xbf16>,
    return
  }
  func.func @transform_0(%arg0: i32) -> (i32, i32, i32) {
    %c0_i32 = arith.constant 0 : i32
    %c0_i32_0 = arith.constant 0 : i32
    %c0_i32_1 = arith.constant 0 : i32
    return %arg0, %c0_i32, %c0_i32_0 : i32, i32, i32
  }
  func.func @transform_1(%arg0: i32) -> (i32, i32) {
    %c0_i32 = arith.constant 0 : i32
    %c0_i32_0 = arith.constant 0 : i32
    %c0_i32_1 = arith.constant 0 : i32
    return %c0_i32, %c0_i32_0 : i32, i32
  }
  func.func @transform_2(%arg0: i32) -> (i32, i32, i32) {
    %c0_i32 = arith.constant 0 : i32
    %c0_i32_0 = arith.constant 0 : i32
    %c0_i32_1 = arith.constant 0 : i32
    return %arg0, %c0_i32, %c0_i32_0 : i32, i32, i32
  }
  func.func @transform_3(%arg0: i32) -> (i32, i32, i32) {
    %c0_i32 = arith.constant 0 : i32
    %c0_i32_0 = arith.constant 0 : i32
    %c0_i32_1 = arith.constant 0 : i32
    return %arg0, %c0_i32, %c0_i32_0 : i32, i32, i32
  }
}

module attributes {stable_mosaic.version = 11 : i64} {
  func.func @_temporal_conv_kernel(%arg0: i32, %arg1: memref<4x18x80xbf16, #tpu.memory_space<vmem>>, %arg2: memref<18x2xf32, #tpu.memory_space<vmem>>, %arg3: memref<8x54xbf16, #tpu.memory_space<vmem>>, %arg4: memref<4x8x80xbf16, #tpu.memory_space<vmem>>, %arg5: memref<1x8x2xf32, #tpu.memory_space<vmem>>, %arg6: memref<54x320xbf16, #tpu.memory_space<vmem>>) attributes {dimension_semantics = [#tpu.dimension_semantics<parallel>], iteration_bounds = array<i64: 2>, scalar_prefetch = 0 : i64, scratch_operands = 1 : i64, tpu.core_type = #tpu.core_type<tc>, window_params = [{transform_indices = @transform_0, window_bounds = array<i64: 4, 18, 80>}, {pipeline_mode = #tpu.pipeline_mode<synchronous>, transform_indices = @transform_1, window_bounds = array<i64: 18, 2>}, {pipeline_mode = #tpu.pipeline_mode<synchronous>, transform_indices = @transform_2, window_bounds = array<i64: 8, 54>}, {transform_indices = @transform_3, window_bounds = array<i64: 4, 8, 80>}, {transform_indices = @transform_4, window_bounds = array<i64: 1, 8, 2>}]} {
    %c0 = arith.constant 0 : index
    %c0_0 = arith.constant 0 : index
    %0 = vector.load %arg2[%c0, %c0_0] : memref<18x2xf32, #tpu.memory_space<vmem>>, vector<18x1xf32>
    %c0_1 = arith.constant 0 : index
    %c1 = arith.constant 1 : index
    %1 = vector.load %arg2[%c0_1, %c1] : memref<18x2xf32, #tpu.memory_space<vmem>>, vector<18x1xf32>
    %cst = arith.constant 0.000000e+00 : bf16
    %2 = vector.broadcast %cst : bf16 to vector<18x80xbf16>
    %c0_2 = arith.constant 0 : index
    %c0_3 = arith.constant 0 : index
    %3 = vector.load %arg6[%c0_2, %c0_3] : memref<54x320xbf16, #tpu.memory_space<vmem>>, vector<18x80xbf16>
    tpu.vector_store %arg6[%c0_2, %c0_3], %2 {strides = array<i32>} : memref<54x320xbf16, #tpu.memory_space<vmem>>, vector<18x80xbf16>,
    %c0_4 = arith.constant 0 : index
    %c0_5 = arith.constant 0 : index
    %c0_6 = arith.constant 0 : index
    %4 = vector.load %arg1[%c0_4, %c0_5, %c0_6] : memref<4x18x80xbf16, #tpu.memory_space<vmem>>, vector<1x18x80xbf16>
    %5 = vector.shape_cast %4 : vector<1x18x80xbf16> to vector<18x80xbf16>
    %6 = arith.extf %5 : vector<18x80xbf16> to vector<18x80xf32>
    %7 = vector.broadcast %0 : vector<18x1xf32> to vector<18x80xf32>
    %8 = arith.mulf %6, %7 : vector<18x80xf32>
    %9 = vector.broadcast %1 : vector<18x1xf32> to vector<18x80xf32>
    %10 = arith.addf %8, %9 : vector<18x80xf32>
    %cst_7 = arith.constant 0.000000e+00 : f32
    %11 = vector.broadcast %cst_7 : f32 to vector<18x80xf32>
    %12 = arith.maximumf %10, %11 : vector<18x80xf32>
    %13 = arith.truncf %12 : vector<18x80xf32> to vector<18x80xbf16>
    %c0_8 = arith.constant 0 : index
    %c80 = arith.constant 80 : index
    %14 = vector.load %arg6[%c0_8, %c80] : memref<54x320xbf16, #tpu.memory_space<vmem>>, vector<18x80xbf16>
    tpu.vector_store %arg6[%c0_8, %c80], %13 {strides = array<i32>} : memref<54x320xbf16, #tpu.memory_space<vmem>>, vector<18x80xbf16>,
    %c1_9 = arith.constant 1 : index
    %c0_10 = arith.constant 0 : index
    %c0_11 = arith.constant 0 : index
    %15 = vector.load %arg1[%c1_9, %c0_10, %c0_11] : memref<4x18x80xbf16, #tpu.memory_space<vmem>>, vector<1x18x80xbf16>
    %16 = vector.shape_cast %15 : vector<1x18x80xbf16> to vector<18x80xbf16>
    %17 = arith.extf %16 : vector<18x80xbf16> to vector<18x80xf32>
    %18 = vector.broadcast %0 : vector<18x1xf32> to vector<18x80xf32>
    %19 = arith.mulf %17, %18 : vector<18x80xf32>
    %20 = vector.broadcast %1 : vector<18x1xf32> to vector<18x80xf32>
    %21 = arith.addf %19, %20 : vector<18x80xf32>
    %cst_12 = arith.constant 0.000000e+00 : f32
    %22 = vector.broadcast %cst_12 : f32 to vector<18x80xf32>
    %23 = arith.maximumf %21, %22 : vector<18x80xf32>
    %24 = arith.truncf %23 : vector<18x80xf32> to vector<18x80xbf16>
    %c0_13 = arith.constant 0 : index
    %c160 = arith.constant 160 : index
    %25 = vector.load %arg6[%c0_13, %c160] : memref<54x320xbf16, #tpu.memory_space<vmem>>, vector<18x80xbf16>
    tpu.vector_store %arg6[%c0_13, %c160], %24 {strides = array<i32>} : memref<54x320xbf16, #tpu.memory_space<vmem>>, vector<18x80xbf16>,
    %c2 = arith.constant 2 : index
    %c0_14 = arith.constant 0 : index
    %c0_15 = arith.constant 0 : index
    %26 = vector.load %arg1[%c2, %c0_14, %c0_15] : memref<4x18x80xbf16, #tpu.memory_space<vmem>>, vector<1x18x80xbf16>
    %27 = vector.shape_cast %26 : vector<1x18x80xbf16> to vector<18x80xbf16>
    %28 = arith.extf %27 : vector<18x80xbf16> to vector<18x80xf32>
    %29 = vector.broadcast %0 : vector<18x1xf32> to vector<18x80xf32>
    %30 = arith.mulf %28, %29 : vector<18x80xf32>
    %31 = vector.broadcast %1 : vector<18x1xf32> to vector<18x80xf32>
    %32 = arith.addf %30, %31 : vector<18x80xf32>
    %cst_16 = arith.constant 0.000000e+00 : f32
    %33 = vector.broadcast %cst_16 : f32 to vector<18x80xf32>
    %34 = arith.maximumf %32, %33 : vector<18x80xf32>
    %35 = arith.truncf %34 : vector<18x80xf32> to vector<18x80xbf16>
    %c0_17 = arith.constant 0 : index
    %c240 = arith.constant 240 : index
    %36 = vector.load %arg6[%c0_17, %c240] : memref<54x320xbf16, #tpu.memory_space<vmem>>, vector<18x80xbf16>
    tpu.vector_store %arg6[%c0_17, %c240], %35 {strides = array<i32>} : memref<54x320xbf16, #tpu.memory_space<vmem>>, vector<18x80xbf16>,
    %c0_18 = arith.constant 0 : index
    %c0_19 = arith.constant 0 : index
    %c0_20 = arith.constant 0 : index
    %37 = vector.load %arg1[%c0_18, %c0_19, %c0_20] : memref<4x18x80xbf16, #tpu.memory_space<vmem>>, vector<1x18x80xbf16>
    %38 = vector.shape_cast %37 : vector<1x18x80xbf16> to vector<18x80xbf16>
    %39 = arith.extf %38 : vector<18x80xbf16> to vector<18x80xf32>
    %40 = vector.broadcast %0 : vector<18x1xf32> to vector<18x80xf32>
    %41 = arith.mulf %39, %40 : vector<18x80xf32>
    %42 = vector.broadcast %1 : vector<18x1xf32> to vector<18x80xf32>
    %43 = arith.addf %41, %42 : vector<18x80xf32>
    %cst_21 = arith.constant 0.000000e+00 : f32
    %44 = vector.broadcast %cst_21 : f32 to vector<18x80xf32>
    %45 = arith.maximumf %43, %44 : vector<18x80xf32>
    %46 = arith.truncf %45 : vector<18x80xf32> to vector<18x80xbf16>
    %c18 = arith.constant 18 : index
    %c0_22 = arith.constant 0 : index
    %47 = vector.load %arg6[%c18, %c0_22] : memref<54x320xbf16, #tpu.memory_space<vmem>>, vector<18x80xbf16>
    tpu.vector_store %arg6[%c18, %c0_22], %46 {strides = array<i32>} : memref<54x320xbf16, #tpu.memory_space<vmem>>, vector<18x80xbf16>,
    %c1_23 = arith.constant 1 : index
    %c0_24 = arith.constant 0 : index
    %c0_25 = arith.constant 0 : index
    %48 = vector.load %arg1[%c1_23, %c0_24, %c0_25] : memref<4x18x80xbf16, #tpu.memory_space<vmem>>, vector<1x18x80xbf16>
    %49 = vector.shape_cast %48 : vector<1x18x80xbf16> to vector<18x80xbf16>
    %50 = arith.extf %49 : vector<18x80xbf16> to vector<18x80xf32>
    %51 = vector.broadcast %0 : vector<18x1xf32> to vector<18x80xf32>
    %52 = arith.mulf %50, %51 : vector<18x80xf32>
    %53 = vector.broadcast %1 : vector<18x1xf32> to vector<18x80xf32>
    %54 = arith.addf %52, %53 : vector<18x80xf32>
    %cst_26 = arith.constant 0.000000e+00 : f32
    %55 = vector.broadcast %cst_26 : f32 to vector<18x80xf32>
    %56 = arith.maximumf %54, %55 : vector<18x80xf32>
    %57 = arith.truncf %56 : vector<18x80xf32> to vector<18x80xbf16>
    %c18_27 = arith.constant 18 : index
    %c80_28 = arith.constant 80 : index
    %58 = vector.load %arg6[%c18_27, %c80_28] : memref<54x320xbf16, #tpu.memory_space<vmem>>, vector<18x80xbf16>
    tpu.vector_store %arg6[%c18_27, %c80_28], %57 {strides = array<i32>} : memref<54x320xbf16, #tpu.memory_space<vmem>>, vector<18x80xbf16>,
    %c2_29 = arith.constant 2 : index
    %c0_30 = arith.constant 0 : index
    %c0_31 = arith.constant 0 : index
    %59 = vector.load %arg1[%c2_29, %c0_30, %c0_31] : memref<4x18x80xbf16, #tpu.memory_space<vmem>>, vector<1x18x80xbf16>
    %60 = vector.shape_cast %59 : vector<1x18x80xbf16> to vector<18x80xbf16>
    %61 = arith.extf %60 : vector<18x80xbf16> to vector<18x80xf32>
    %62 = vector.broadcast %0 : vector<18x1xf32> to vector<18x80xf32>
    %63 = arith.mulf %61, %62 : vector<18x80xf32>
    %64 = vector.broadcast %1 : vector<18x1xf32> to vector<18x80xf32>
    %65 = arith.addf %63, %64 : vector<18x80xf32>
    %cst_32 = arith.constant 0.000000e+00 : f32
    %66 = vector.broadcast %cst_32 : f32 to vector<18x80xf32>
    %67 = arith.maximumf %65, %66 : vector<18x80xf32>
    %68 = arith.truncf %67 : vector<18x80xf32> to vector<18x80xbf16>
    %c18_33 = arith.constant 18 : index
    %c160_34 = arith.constant 160 : index
    %69 = vector.load %arg6[%c18_33, %c160_34] : memref<54x320xbf16, #tpu.memory_space<vmem>>, vector<18x80xbf16>
    tpu.vector_store %arg6[%c18_33, %c160_34], %68 {strides = array<i32>} : memref<54x320xbf16, #tpu.memory_space<vmem>>, vector<18x80xbf16>,
    %c3 = arith.constant 3 : index
    %c0_35 = arith.constant 0 : index
    %c0_36 = arith.constant 0 : index
    %70 = vector.load %arg1[%c3, %c0_35, %c0_36] : memref<4x18x80xbf16, #tpu.memory_space<vmem>>, vector<1x18x80xbf16>
    %71 = vector.shape_cast %70 : vector<1x18x80xbf16> to vector<18x80xbf16>
    %72 = arith.extf %71 : vector<18x80xbf16> to vector<18x80xf32>
    %73 = vector.broadcast %0 : vector<18x1xf32> to vector<18x80xf32>
    %74 = arith.mulf %72, %73 : vector<18x80xf32>
    %75 = vector.broadcast %1 : vector<18x1xf32> to vector<18x80xf32>
    %76 = arith.addf %74, %75 : vector<18x80xf32>
    %cst_37 = arith.constant 0.000000e+00 : f32
    %77 = vector.broadcast %cst_37 : f32 to vector<18x80xf32>
    %78 = arith.maximumf %76, %77 : vector<18x80xf32>
    %79 = arith.truncf %78 : vector<18x80xf32> to vector<18x80xbf16>
    %c18_38 = arith.constant 18 : index
    %c240_39 = arith.constant 240 : index
    %80 = vector.load %arg6[%c18_38, %c240_39] : memref<54x320xbf16, #tpu.memory_space<vmem>>, vector<18x80xbf16>
    tpu.vector_store %arg6[%c18_38, %c240_39], %79 {strides = array<i32>} : memref<54x320xbf16, #tpu.memory_space<vmem>>, vector<18x80xbf16>,
    %c1_40 = arith.constant 1 : index
    %c0_41 = arith.constant 0 : index
    %c0_42 = arith.constant 0 : index
    %81 = vector.load %arg1[%c1_40, %c0_41, %c0_42] : memref<4x18x80xbf16, #tpu.memory_space<vmem>>, vector<1x18x80xbf16>
    %82 = vector.shape_cast %81 : vector<1x18x80xbf16> to vector<18x80xbf16>
    %83 = arith.extf %82 : vector<18x80xbf16> to vector<18x80xf32>
    %84 = vector.broadcast %0 : vector<18x1xf32> to vector<18x80xf32>
    %85 = arith.mulf %83, %84 : vector<18x80xf32>
    %86 = vector.broadcast %1 : vector<18x1xf32> to vector<18x80xf32>
    %87 = arith.addf %85, %86 : vector<18x80xf32>
    %cst_43 = arith.constant 0.000000e+00 : f32
    %88 = vector.broadcast %cst_43 : f32 to vector<18x80xf32>
    %89 = arith.maximumf %87, %88 : vector<18x80xf32>
    %90 = arith.truncf %89 : vector<18x80xf32> to vector<18x80xbf16>
    %c36 = arith.constant 36 : index
    %c0_44 = arith.constant 0 : index
    %91 = vector.load %arg6[%c36, %c0_44] : memref<54x320xbf16, #tpu.memory_space<vmem>>, vector<18x80xbf16>
    tpu.vector_store %arg6[%c36, %c0_44], %90 {strides = array<i32>} : memref<54x320xbf16, #tpu.memory_space<vmem>>, vector<18x80xbf16>,
    %c2_45 = arith.constant 2 : index
    %c0_46 = arith.constant 0 : index
    %c0_47 = arith.constant 0 : index
    %92 = vector.load %arg1[%c2_45, %c0_46, %c0_47] : memref<4x18x80xbf16, #tpu.memory_space<vmem>>, vector<1x18x80xbf16>
    %93 = vector.shape_cast %92 : vector<1x18x80xbf16> to vector<18x80xbf16>
    %94 = arith.extf %93 : vector<18x80xbf16> to vector<18x80xf32>
    %95 = vector.broadcast %0 : vector<18x1xf32> to vector<18x80xf32>
    %96 = arith.mulf %94, %95 : vector<18x80xf32>
    %97 = vector.broadcast %1 : vector<18x1xf32> to vector<18x80xf32>
    %98 = arith.addf %96, %97 : vector<18x80xf32>
    %cst_48 = arith.constant 0.000000e+00 : f32
    %99 = vector.broadcast %cst_48 : f32 to vector<18x80xf32>
    %100 = arith.maximumf %98, %99 : vector<18x80xf32>
    %101 = arith.truncf %100 : vector<18x80xf32> to vector<18x80xbf16>
    %c36_49 = arith.constant 36 : index
    %c80_50 = arith.constant 80 : index
    %102 = vector.load %arg6[%c36_49, %c80_50] : memref<54x320xbf16, #tpu.memory_space<vmem>>, vector<18x80xbf16>
    tpu.vector_store %arg6[%c36_49, %c80_50], %101 {strides = array<i32>} : memref<54x320xbf16, #tpu.memory_space<vmem>>, vector<18x80xbf16>,
    %c3_51 = arith.constant 3 : index
    %c0_52 = arith.constant 0 : index
    %c0_53 = arith.constant 0 : index
    %103 = vector.load %arg1[%c3_51, %c0_52, %c0_53] : memref<4x18x80xbf16, #tpu.memory_space<vmem>>, vector<1x18x80xbf16>
    %104 = vector.shape_cast %103 : vector<1x18x80xbf16> to vector<18x80xbf16>
    %105 = arith.extf %104 : vector<18x80xbf16> to vector<18x80xf32>
    %106 = vector.broadcast %0 : vector<18x1xf32> to vector<18x80xf32>
    %107 = arith.mulf %105, %106 : vector<18x80xf32>
    %108 = vector.broadcast %1 : vector<18x1xf32> to vector<18x80xf32>
    %109 = arith.addf %107, %108 : vector<18x80xf32>
    %cst_54 = arith.constant 0.000000e+00 : f32
    %110 = vector.broadcast %cst_54 : f32 to vector<18x80xf32>
    %111 = arith.maximumf %109, %110 : vector<18x80xf32>
    %112 = arith.truncf %111 : vector<18x80xf32> to vector<18x80xbf16>
    %c36_55 = arith.constant 36 : index
    %c160_56 = arith.constant 160 : index
    %113 = vector.load %arg6[%c36_55, %c160_56] : memref<54x320xbf16, #tpu.memory_space<vmem>>, vector<18x80xbf16>
    tpu.vector_store %arg6[%c36_55, %c160_56], %112 {strides = array<i32>} : memref<54x320xbf16, #tpu.memory_space<vmem>>, vector<18x80xbf16>,
    %cst_57 = arith.constant 0.000000e+00 : bf16
    %114 = vector.broadcast %cst_57 : bf16 to vector<18x80xbf16>
    %c36_58 = arith.constant 36 : index
    %c240_59 = arith.constant 240 : index
    %115 = vector.load %arg6[%c36_58, %c240_59] : memref<54x320xbf16, #tpu.memory_space<vmem>>, vector<18x80xbf16>
    tpu.vector_store %arg6[%c36_58, %c240_59], %114 {strides = array<i32>} : memref<54x320xbf16, #tpu.memory_space<vmem>>, vector<18x80xbf16>,
    %c0_60 = arith.constant 0 : index
    %c0_61 = arith.constant 0 : index
    %116 = vector.load %arg3[%c0_60, %c0_61] : memref<8x54xbf16, #tpu.memory_space<vmem>>, vector<8x54xbf16>
    %c0_62 = arith.constant 0 : index
    %c0_63 = arith.constant 0 : index
    %117 = vector.load %arg6[%c0_62, %c0_63] : memref<54x320xbf16, #tpu.memory_space<vmem>>, vector<54x320xbf16>
    %cst_64 = arith.constant dense<0.000000e+00> : vector<8x320xf32>
    %118 = tpu.matmul %116, %117, %cst_64 {dimension_numbers = #tpu.dot_dimension_numbers<[1], [0], [0], [1], [0, 0, 1, 1], [], []>} : vector<8x54xbf16>, vector<54x320xbf16>, vector<8x320xf32> -> vector<8x320xf32>
    %119 = tpu.iota {dimensions = array<i32: 1>} : vector<1x320xi32>
    %c10_i32 = arith.constant 10 : i32
    %c0_i32 = arith.constant 0 : i32
    %120 = arith.cmpi eq, %c10_i32, %c0_i32 : i32
    %c1_i32 = arith.constant 1 : i32
    %121 = arith.select %120, %c1_i32, %c10_i32 : i32
    %122 = vector.broadcast %121 : i32 to vector<1x320xi32>
    %123 = arith.remsi %119, %122 : vector<1x320xi32>
    %c0_i32_65 = arith.constant 0 : i32
    %124 = vector.broadcast %c0_i32_65 : i32 to vector<1x320xi32>
    %125 = arith.cmpi ne, %123, %124 : vector<1x320xi32>
    %c0_i32_66 = arith.constant 0 : i32
    %126 = vector.broadcast %c0_i32_66 : i32 to vector<1x320xi32>
    %127 = arith.cmpi slt, %123, %126 : vector<1x320xi32>
    %c0_i32_67 = arith.constant 0 : i32
    %128 = arith.cmpi slt, %121, %c0_i32_67 : i32
    %129 = vector.broadcast %128 : i1 to vector<1x320xi1>
    %130 = vector.broadcast %129 : vector<1x320xi1> to vector<1x320xi1>
    %131 = arith.xori %127, %130 : vector<1x320xi1>
    %132 = arith.andi %131, %125 : vector<1x320xi1>
    %133 = vector.broadcast %121 : i32 to vector<1x320xi32>
    %134 = arith.addi %123, %133 : vector<1x320xi32>
    %135 = arith.select %132, %134, %123 : vector<1x320xi1>, vector<1x320xi32>
    %c8_i32 = arith.constant 8 : i32
    %136 = vector.broadcast %c8_i32 : i32 to vector<1x320xi32>
    %137 = arith.cmpi slt, %135, %136 : vector<1x320xi32>
    %cst_68 = arith.constant 0.000000e+00 : f32
    %138 = vector.shape_cast %137 : vector<1x320xi1> to vector<1x320xi1>
    %139 = vector.broadcast %138 : vector<1x320xi1> to vector<8x320xi1>
    %140 = vector.broadcast %cst_68 : f32 to vector<8x320xf32>
    %141 = arith.select %139, %118, %140 : vector<8x320xi1>, vector<8x320xf32>
    %cst_69 = arith.constant dense<0.000000e+00> : vector<8xf32>
    %142 = vector.multi_reduction <add>, %141, %cst_69 [1] : vector<8x320xf32> to vector<8xf32>
    %143 = vector.shape_cast %142 : vector<8xf32> to vector<8x1xf32>
    %c0_70 = arith.constant 0 : index
    %c0_71 = arith.constant 0 : index
    %c0_72 = arith.constant 0 : index
    %144 = vector.load %arg5[%c0_70, %c0_71, %c0_72] : memref<1x8x2xf32, #tpu.memory_space<vmem>>, vector<1x8x1xf32>
    %145 = vector.shape_cast %144 : vector<1x8x1xf32> to vector<8x1xf32>
    %146 = vector.shape_cast %143 : vector<8x1xf32> to vector<1x8x1xf32>
    tpu.vector_store %arg5[%c0_70, %c0_71, %c0_72], %146 {strides = array<i32>} : memref<1x8x2xf32, #tpu.memory_space<vmem>>, vector<1x8x1xf32>,
    %147 = arith.mulf %141, %141 : vector<8x320xf32>
    %cst_73 = arith.constant dense<0.000000e+00> : vector<8xf32>
    %148 = vector.multi_reduction <add>, %147, %cst_73 [1] : vector<8x320xf32> to vector<8xf32>
    %149 = vector.shape_cast %148 : vector<8xf32> to vector<8x1xf32>
    %c0_74 = arith.constant 0 : index
    %c0_75 = arith.constant 0 : index
    %c1_76 = arith.constant 1 : index
    %150 = vector.load %arg5[%c0_74, %c0_75, %c1_76] : memref<1x8x2xf32, #tpu.memory_space<vmem>>, vector<1x8x1xf32>
    %151 = vector.shape_cast %150 : vector<1x8x1xf32> to vector<8x1xf32>
    %152 = vector.shape_cast %149 : vector<8x1xf32> to vector<1x8x1xf32>
    tpu.vector_store %arg5[%c0_74, %c0_75, %c1_76], %152 {strides = array<i32>} : memref<1x8x2xf32, #tpu.memory_space<vmem>>, vector<1x8x1xf32>,
    %153 = vector.extract_strided_slice %118 {offsets = [0, 0], sizes = [8, 80], strides = [1, 1]} : vector<8x320xf32> to vector<8x80xf32>
    %154 = arith.truncf %153 : vector<8x80xf32> to vector<8x80xbf16>
    %c0_77 = arith.constant 0 : index
    %c0_78 = arith.constant 0 : index
    %c0_79 = arith.constant 0 : index
    %155 = vector.load %arg4[%c0_77, %c0_78, %c0_79] : memref<4x8x80xbf16, #tpu.memory_space<vmem>>, vector<1x8x80xbf16>
    %156 = vector.shape_cast %155 : vector<1x8x80xbf16> to vector<8x80xbf16>
    %157 = vector.shape_cast %154 : vector<8x80xbf16> to vector<1x8x80xbf16>
    tpu.vector_store %arg4[%c0_77, %c0_78, %c0_79], %157 {strides = array<i32>} : memref<4x8x80xbf16, #tpu.memory_space<vmem>>, vector<1x8x80xbf16>,
    %158 = vector.extract_strided_slice %118 {offsets = [0, 80], sizes = [8, 80], strides = [1, 1]} : vector<8x320xf32> to vector<8x80xf32>
    %159 = arith.truncf %158 : vector<8x80xf32> to vector<8x80xbf16>
    %c1_80 = arith.constant 1 : index
    %c0_81 = arith.constant 0 : index
    %c0_82 = arith.constant 0 : index
    %160 = vector.load %arg4[%c1_80, %c0_81, %c0_82] : memref<4x8x80xbf16, #tpu.memory_space<vmem>>, vector<1x8x80xbf16>
    %161 = vector.shape_cast %160 : vector<1x8x80xbf16> to vector<8x80xbf16>
    %162 = vector.shape_cast %159 : vector<8x80xbf16> to vector<1x8x80xbf16>
    tpu.vector_store %arg4[%c1_80, %c0_81, %c0_82], %162 {strides = array<i32>} : memref<4x8x80xbf16, #tpu.memory_space<vmem>>, vector<1x8x80xbf16>,
    %163 = vector.extract_strided_slice %118 {offsets = [0, 160], sizes = [8, 80], strides = [1, 1]} : vector<8x320xf32> to vector<8x80xf32>
    %164 = arith.truncf %163 : vector<8x80xf32> to vector<8x80xbf16>
    %c2_83 = arith.constant 2 : index
    %c0_84 = arith.constant 0 : index
    %c0_85 = arith.constant 0 : index
    %165 = vector.load %arg4[%c2_83, %c0_84, %c0_85] : memref<4x8x80xbf16, #tpu.memory_space<vmem>>, vector<1x8x80xbf16>
    %166 = vector.shape_cast %165 : vector<1x8x80xbf16> to vector<8x80xbf16>
    %167 = vector.shape_cast %164 : vector<8x80xbf16> to vector<1x8x80xbf16>
    tpu.vector_store %arg4[%c2_83, %c0_84, %c0_85], %167 {strides = array<i32>} : memref<4x8x80xbf16, #tpu.memory_space<vmem>>, vector<1x8x80xbf16>,
    %168 = vector.extract_strided_slice %118 {offsets = [0, 240], sizes = [8, 80], strides = [1, 1]} : vector<8x320xf32> to vector<8x80xf32>
    %169 = arith.truncf %168 : vector<8x80xf32> to vector<8x80xbf16>
    %c3_86 = arith.constant 3 : index
    %c0_87 = arith.constant 0 : index
    %c0_88 = arith.constant 0 : index
    %170 = vector.load %arg4[%c3_86, %c0_87, %c0_88] : memref<4x8x80xbf16, #tpu.memory_space<vmem>>, vector<1x8x80xbf16>
    %171 = vector.shape_cast %170 : vector<1x8x80xbf16> to vector<8x80xbf16>
    %172 = vector.shape_cast %169 : vector<8x80xbf16> to vector<1x8x80xbf16>
    tpu.vector_store %arg4[%c3_86, %c0_87, %c0_88], %172 {strides = array<i32>} : memref<4x8x80xbf16, #tpu.memory_space<vmem>>, vector<1x8x80xbf16>,
    return
  }
  func.func @transform_0(%arg0: i32) -> (i32, i32, i32) {
    %c0_i32 = arith.constant 0 : i32
    %c0_i32_0 = arith.constant 0 : i32
    %c0_i32_1 = arith.constant 0 : i32
    return %arg0, %c0_i32, %c0_i32_0 : i32, i32, i32
  }
  func.func @transform_1(%arg0: i32) -> (i32, i32) {
    %c0_i32 = arith.constant 0 : i32
    %c0_i32_0 = arith.constant 0 : i32
    %c0_i32_1 = arith.constant 0 : i32
    return %c0_i32, %c0_i32_0 : i32, i32
  }
  func.func @transform_2(%arg0: i32) -> (i32, i32) {
    %c0_i32 = arith.constant 0 : i32
    %c0_i32_0 = arith.constant 0 : i32
    %c0_i32_1 = arith.constant 0 : i32
    return %c0_i32, %c0_i32_0 : i32, i32
  }
  func.func @transform_3(%arg0: i32) -> (i32, i32, i32) {
    %c0_i32 = arith.constant 0 : i32
    %c0_i32_0 = arith.constant 0 : i32
    %c0_i32_1 = arith.constant 0 : i32
    return %arg0, %c0_i32, %c0_i32_0 : i32, i32, i32
  }
  func.func @transform_4(%arg0: i32) -> (i32, i32, i32) {
    %c0_i32 = arith.constant 0 : i32
    %c0_i32_0 = arith.constant 0 : i32
    %c0_i32_1 = arith.constant 0 : i32
    return %arg0, %c0_i32, %c0_i32_0 : i32, i32, i32
  }
}

module attributes {stable_mosaic.version = 11 : i64} {
  func.func @_bn_add_relu_kernel(%arg0: i32, %arg1: memref<4x8x80xbf16, #tpu.memory_space<vmem>>, %arg2: memref<8x2xf32, #tpu.memory_space<vmem>>, %arg3: memref<4x8x80xbf16, #tpu.memory_space<vmem>>, %arg4: memref<4x8x80xbf16, #tpu.memory_space<vmem>>) attributes {dimension_semantics = [#tpu.dimension_semantics<parallel>], iteration_bounds = array<i64: 2>, scalar_prefetch = 0 : i64, scratch_operands = 0 : i64, tpu.core_type = #tpu.core_type<tc>, window_params = [{transform_indices = @transform_0, window_bounds = array<i64: 4, 8, 80>}, {pipeline_mode = #tpu.pipeline_mode<synchronous>, transform_indices = @transform_1, window_bounds = array<i64: 8, 2>}, {transform_indices = @transform_2, window_bounds = array<i64: 4, 8, 80>}, {transform_indices = @transform_3, window_bounds = array<i64: 4, 8, 80>}]} {
    %c0 = arith.constant 0 : index
    %c0_0 = arith.constant 0 : index
    %c0_1 = arith.constant 0 : index
    %0 = vector.load %arg1[%c0, %c0_0, %c0_1] : memref<4x8x80xbf16, #tpu.memory_space<vmem>>, vector<4x8x80xbf16>
    %1 = arith.extf %0 : vector<4x8x80xbf16> to vector<4x8x80xf32>
    %c0_2 = arith.constant 0 : index
    %c0_3 = arith.constant 0 : index
    %2 = vector.load %arg2[%c0_2, %c0_3] : memref<8x2xf32, #tpu.memory_space<vmem>>, vector<8x1xf32>
    %3 = vector.shape_cast %2 : vector<8x1xf32> to vector<1x8x1xf32>
    %4 = vector.broadcast %3 : vector<1x8x1xf32> to vector<4x8x80xf32>
    %5 = arith.mulf %1, %4 : vector<4x8x80xf32>
    %c0_4 = arith.constant 0 : index
    %c1 = arith.constant 1 : index
    %6 = vector.load %arg2[%c0_4, %c1] : memref<8x2xf32, #tpu.memory_space<vmem>>, vector<8x1xf32>
    %7 = vector.shape_cast %6 : vector<8x1xf32> to vector<1x8x1xf32>
    %8 = vector.broadcast %7 : vector<1x8x1xf32> to vector<4x8x80xf32>
    %9 = arith.addf %5, %8 : vector<4x8x80xf32>
    %c0_5 = arith.constant 0 : index
    %c0_6 = arith.constant 0 : index
    %c0_7 = arith.constant 0 : index
    %10 = vector.load %arg3[%c0_5, %c0_6, %c0_7] : memref<4x8x80xbf16, #tpu.memory_space<vmem>>, vector<4x8x80xbf16>
    %11 = arith.extf %10 : vector<4x8x80xbf16> to vector<4x8x80xf32>
    %12 = arith.addf %9, %11 : vector<4x8x80xf32>
    %cst = arith.constant 0.000000e+00 : f32
    %13 = vector.broadcast %cst : f32 to vector<4x8x80xf32>
    %14 = arith.maximumf %12, %13 : vector<4x8x80xf32>
    %15 = arith.truncf %14 : vector<4x8x80xf32> to vector<4x8x80xbf16>
    %c0_8 = arith.constant 0 : index
    %c0_9 = arith.constant 0 : index
    %c0_10 = arith.constant 0 : index
    %16 = vector.load %arg4[%c0_8, %c0_9, %c0_10] : memref<4x8x80xbf16, #tpu.memory_space<vmem>>, vector<4x8x80xbf16>
    tpu.vector_store %arg4[%c0_8, %c0_9, %c0_10], %15 {strides = array<i32>} : memref<4x8x80xbf16, #tpu.memory_space<vmem>>, vector<4x8x80xbf16>,
    return
  }
  func.func @transform_0(%arg0: i32) -> (i32, i32, i32) {
    %c0_i32 = arith.constant 0 : i32
    %c0_i32_0 = arith.constant 0 : i32
    %c0_i32_1 = arith.constant 0 : i32
    return %arg0, %c0_i32, %c0_i32_0 : i32, i32, i32
  }
  func.func @transform_1(%arg0: i32) -> (i32, i32) {
    %c0_i32 = arith.constant 0 : i32
    %c0_i32_0 = arith.constant 0 : i32
    %c0_i32_1 = arith.constant 0 : i32
    return %c0_i32, %c0_i32_0 : i32, i32
  }
  func.func @transform_2(%arg0: i32) -> (i32, i32, i32) {
    %c0_i32 = arith.constant 0 : i32
    %c0_i32_0 = arith.constant 0 : i32
    %c0_i32_1 = arith.constant 0 : i32
    return %arg0, %c0_i32, %c0_i32_0 : i32, i32, i32
  }
  func.func @transform_3(%arg0: i32) -> (i32, i32, i32) {
    %c0_i32 = arith.constant 0 : i32
    %c0_i32_0 = arith.constant 0 : i32
    %c0_i32_1 = arith.constant 0 : i32
    return %arg0, %c0_i32, %c0_i32_0 : i32, i32, i32
  }
}

</mosaic_0001>

<bundles_post_ra>
// kernel: r2plus1d_forward.14
= control target key start
LH: loop header
LB: loop body
LE: loop exit
PB: predicated region body
PF: predicated region fallthrough
CT: control target
= control target key end

     0   :  { %s389_s12 = smov 0   ;;  %s420_s0 = inlined_call_operand.vmem [shape: bf16[8,8,80], index: 0, kind: input, shape index: {}]   ;;  %s421_s1 = inlined_call_operand.vmem [shape: f32[8,2], index: 1, kind: input, shape index: {}]   ;;  %s422_s2 = inlined_call_operand.vmem [shape: bf16[8,8,80], index: 2, kind: output, shape index: {0}]   ;;  %s423_s3 = inlined_call_operand.vmem [shape: bf16[8,8,80], index: 3, kind: output, shape index: {1}]  }
   0x1 LB: > { %s325_s13 = sadd.s32 4294967295, %s365_s12   ;;  %p329_p0 = scmp.ge.s32.totalorder %s365_s12, 1  ;;  %s365_s12 = sphi %s389_s12, %s14_s12  }
   0x2   : > { %p141_p1 = scmp.lt.s32.totalorder %s365_s12, 3 }
   0x4   : > { %p142_p2 = pnand %p329_p0, %p141_p1 }
   0x5   : > { %s330_s16 = sshll.u32 (!%p142_p2), %s325_s13, 2 }
   0x6   : > { %145 = sbr.rel (%p142_p2) target bundleno = 150 (0x96), region = 28  ;;  %p171_p3 = scmp.lt.s32.totalorder (!%p142_p2), %s330_s16, 7 }
   0xb   : > { %v196_v0 = vld [vmem:[%s421_s1] sm:$0xff]  ;;  %v367_v1 = vmov 0   ;;  %v368_v2 = vmov 1   ;;  %s425_s16 = smov (!%p171_p3, %s330_s16), 7  ;;  %vm218_vm0 = vcmask 650240  }
   0xc   : > { %357 = vset.pattern.permute.xlu0 %v367_v1  ;;  %s331_s17 = sshll.u32 %s425_s16, 2 }
   0xd   : > { %199 = vperm.xlu0 %357, %v196_v0   ;;  %s174_s20 = scalar_lea.vmem %s420_s0, %s331_s17  ;;  %s180_s23 = scalar_lea.vmem %s422_s2, %s331_s17 }
   0xe   : > { %v339_v3 = vld [vmem:[%s174_s20] sm:$0xff]   ;;  %v346_v4 = vld [vmem:[%s174_s20 + $0x8] sm:$0xff]   ;;  %s186_s26 = scalar_lea.vmem %s423_s3, %s331_s17 }
   0xf   : > { %v340_v6 = vunpack.c.l.bf16 %v339_v3  ;;  %v341_v7 = vunpack.c.h.bf16 %v339_v3  ;;  %v344_v8 = vunpack.c.l.bf16 %v346_v4  ;;  %v345_v9 = vunpack.c.h.bf16 %v346_v4 }
  0x11   : > { %358 = vset.pattern.permute.xlu0 %v368_v2 }
  0x12   : > { %207 = vperm.xlu0 %358, %v196_v0  }
  0x88   : > { %v200_v5 = vpop.permute.xlu0 %199 }
  0x89   : > { %v202_v10 = vmul.f32 %v340_v6, %v200_v5  ;;  %v203_v11 = vmul.f32 %v341_v7, %v200_v5  ;;  %v204_v12 = vmul.f32 %v344_v8, %v200_v5  ;;  %v205_v13 = vmul.f32 %v345_v9, %v200_v5 }
  0x8d   : > { %v208_v14 = vpop.permute.xlu0 %207 }
  0x8e   : > { %v210_v15 = vadd.f32 %v208_v14, %v202_v10  ;;  %v211_v16 = vadd.f32 %v208_v14, %v203_v11  ;;  %v212_v17 = vadd.f32 %v208_v14, %v204_v12  ;;  %v213_v18 = vadd.f32 %v208_v14, %v205_v13 }
  0x90   : > { %v214_v19 = vpack.c.bf16 %v210_v15, %v210_v15  ;;  %v215_v20 = vpack.c.bf16 %v211_v16, %v211_v16  ;;  %v223_v21 = vmax.f32 %v210_v15, 0.0  ;;  %v224_v22 = vmax.f32 %v211_v16, 0.0 }
  0x91   : > { %v225_v23 = vmax.f32 %v212_v17, 0.0  ;;  %v216_v24 = vpack.c.bf16 %v212_v17, %v212_v17  ;;  %v226_v25 = vmax.f32 %v213_v18, 0.0  ;;  %v217_v26 = vpack.c.bf16 %v213_v18, %v213_v18 }
  0x92   : > { %219 = vst.msk [vmem:[%s180_s23] sm:$0xf] %vm218_vm0, %v214_v19  ;;  %220 = vst.msk [vmem:[%s180_s23 + $0x4] sm:$0xf] %vm218_vm0, %v215_v20  ;;  %v227_v27 = vpack.c.bf16 %v223_v21, %v223_v21  ;;  %v228_v28 = vpack.c.bf16 %v224_v22, %v224_v22 }
  0x93   : > { %221 = vst.msk [vmem:[%s180_s23 + $0x8] sm:$0xf] %vm218_vm0, %v216_v24  ;;  %222 = vst.msk [vmem:[%s180_s23 + $0xc] sm:$0xf] %vm218_vm0, %v217_v26  ;;  %v229_v29 = vpack.c.bf16 %v225_v23, %v225_v23  ;;  %v230_v30 = vpack.c.bf16 %v226_v25, %v226_v25 }
  0x94   : > { %231 = vst.msk [vmem:[%s186_s26] sm:$0xf] %vm218_vm0, %v227_v27  ;;  %232 = vst.msk [vmem:[%s186_s26 + $0x4] sm:$0xf] %vm218_vm0, %v228_v28 }
  0x95   : > { %233 = vst.msk [vmem:[%s186_s26 + $0x8] sm:$0xf] %vm218_vm0, %v229_v29  ;;  %234 = vst.msk [vmem:[%s186_s26 + $0xc] sm:$0xf] %vm218_vm0, %v230_v30 }
  0x96 PF: > { %s14_s12 = sadd.s32 1, %s365_s12  }
  0x97   : > { %p11_p4 = scmp.ge.s32.totalorder %s14_s12, 4  }
  0x99   :  { %13 = sbr.rel (!%p11_p4) target bundleno = 1 (0x1), region = 70 }

// kernel: r2plus1d_forward.12
= control target key start
LH: loop header
LB: loop body
LE: loop exit
PB: predicated region body
PF: predicated region fallthrough
CT: control target
= control target key end

     0   :  { %s1418_s12 = smov 0   ;;  %s1655_s0 = inlined_call_operand.vmem [shape: bf16[8,4,110], index: 0, kind: input, shape index: {}]   ;;  %s1656_s1 = inlined_call_operand.vmem [shape: bf16[14,36], index: 1, kind: input, shape index: {}]   ;;  %s1657_s2 = inlined_call_operand.vmem [shape: bf16[8,14,80], index: 2, kind: output, shape index: {0}]   ;;  %s1658_s3 = inlined_call_operand.vmem [shape: f32[2,14,2], index: 3, kind: output, shape index: {1}]  }
   0x1 LB: > { %s1424_s13 = sadd.s32 4294967295, %s1354_s12   ;;  %p1157_p0 = scmp.ge.s32.totalorder %s1354_s12, 1  ;;  %s1354_s12 = sphi %s1418_s12, %s14_s12  }
   0x2   : > { %p141_p1 = scmp.lt.s32.totalorder %s1354_s12, 3 }
   0x4   : > { %p142_p2 = pnand %p1157_p0, %p141_p1 }
   0x5   : > { %s1158_s14 = sshll.u32 (!%p142_p2), %s1424_s13, 2  ;;  %s1357_s19 = smov (!%p142_p2), 90  }
   0x6   : > { %145 = sbr.rel (%p142_p2) target bundleno = 641 (0x281), region = 28  ;;  %p172_p3 = scmp.lt.s32.totalorder (!%p142_p2), %s1158_s14, 7 }
   0x7   : > { %s1358_s20 = smov (!%p142_p2), 58   ;;  %s1359_s21 = smov (!%p142_p2), 69  }
   0x8   : > { %s1360_s22 = smov (!%p142_p2), 106   ;;  %s1361_s23 = smov (!%p142_p2), 60  }
   0x9   : > { %s1362_s24 = smov (!%p142_p2), 68   ;;  %s1363_s25 = smov (!%p142_p2), 10  }
   0xa   : > { %s1364_s26 = smov (!%p142_p2), 59   ;;  %s1365_s27 = smov (!%p142_p2), 116  }
   0xb   : > { %v1356_v0 = vmov 1983009808   ;;  %v199_v2 = vlaneseq  ;;  %s1670_s14 = smov (!%p172_p3, %s1158_s14), 7  ;;  %s1366_s28 = smov 117   ;;  %v1368_v21 = vmov 0.0   ;;  %vm191_vm0 = vcmask 648192  }
   0xc   : > { %v197_v1 = vunpack.c.l.s4 %v1356_v0  ;;  %s1159_s15 = sshll.u32 %s1670_s14, 1  ;;  %s1367_s29 = smov 107   ;;  %1254 = vmatprep.subr.bf16.mxu1 %v1368_v21  ;;  %vm1392_vm1 = vmmov 0   ;;  %v1393_v44 = vmov 0   ;;  %vm318_vm2 = vcmask 1042048  }
   0xd   : > { %v200_v4 = vshrl.u32 %v199_v2, 7  ;;  %s1436_s18 = scalar_lea.vmem %s1655_s0, %s1159_s15  ;;  %s1369_s30 = smov 108   ;;  %1260 = vmatprep.mubr.msk.bf16.mxu1 %vm1392_vm1, %v1368_v21  ;;  %839 = vmatprep.mubr.bf16.mxu0 %v1393_v44  ;;  %vm319_vm3 = vcmask 259076   ;;  %vm453_vm4 = vcmask 474112   ;;  %vm597_vm6 = vcmask 1042304  }
   0xe   : > { %v198_v3 = vunpack.c.0.s8 %v197_v1  ;;  %v1439_v5 = vld.sshfl [vmem:[%s1436_s18 + $0x6] sm:$0x3 pattern:$0x76325410]  ;;  %v190_v22 = vld [vmem:[%s1436_s18] sm:$0x3]  ;;  %vm1507_vm5 = vmor %vm319_vm3, %vm318_vm2 }
   0xf   : > { %729 = vrot.lane.b32.xlu1 %v1439_v5, %s1357_s19  ;;  %v1443_v6 = vld.sshfl [vmem:[%s1436_s18 + $0x2] sm:$0x3 pattern:$0x76325410]  ;;  %192 = vst.msk [vmem:[#allocation2] sm:$0x3] %vm191_vm0, %v190_v22 }
  0x10   : > { %450 = vrot.lane.b32.xlu0 %v1443_v6, %s1358_s20  ;;  %v1447_v7 = vld.sshfl [vmem:[%s1436_s18] sm:$0x3 pattern:$0x76325410]  ;;  %v1449_v8 = vsub.s32 %v198_v3, %v200_v4  ;;  %s1370_s4 = smov 100   ;;  %s1371_s5 = smov 101  }
  0x11   : > { %v1320_v9 = vld [vmem:[%s1436_s18 + $0x2] ss:$0 sps:$4 sm:$0x33]   ;;  %v1322_v13 = vld [vmem:[%s1436_s18] ss:$0 sps:$4 sm:$0x33]  }
  0x12   : > { %v400_v10 = vrot.slane %v1320_v9, %v1449_v8  ;;  %v1321_v11 = vld [vmem:[%s1436_s18 + $0x2] ss:$0 sps:$4 sm:$0x33]   ;;  %v257_v15 = vrot.slane %v1322_v13, %v1449_v8  ;;  %v1323_v16 = vld [vmem:[%s1436_s18] ss:$0 sps:$4 sm:$0x33]  }
  0x13   : > { %384 = vrot.lane.b32.xlu1 %v1443_v6, %s1359_s21  ;;  %v1457_v12 = vld.sshfl [vmem:[%s1436_s18 + $0x4] sm:$0x3 pattern:$0x76325410]  ;;  %v433_v14 = vrot.slane %v1321_v11, %v1449_v8  ;;  %v284_v17 = vrot.slane %v1323_v16, %v1449_v8  ;;  %s1372_s6 = smov 91   ;;  %s1373_s7 = smov 92  }
  0x14   : > { %298 = vrot.lane.b32.xlu0 %v1447_v7, %s1360_s22  ;;  %v1324_v18 = vld [vmem:[%s1436_s18 + $0x6] ss:$0 sps:$4 sm:$0x33]   ;;  %v1326_v24 = vld [vmem:[%s1436_s18 + $0x2] ss:$0 sps:$4 sm:$0x33]  }
  0x15   : > { %v679_v19 = vrot.slane %v1324_v18, %v1449_v8  ;;  %v1325_v20 = vld [vmem:[%s1436_s18 + $0x6] ss:$0 sps:$4 sm:$0x33]   ;;  %v331_v25 = vrot.slane %v1326_v24, %v1449_v8  ;;  %v1327_v26 = vld [vmem:[%s1436_s18 + $0x2] ss:$0 sps:$4 sm:$0x33]  }
  0x16   : > { %v712_v23 = vrot.slane %v1325_v20, %v1449_v8  ;;  %s1374_s8 = smov 79   ;;  %v367_v27 = vrot.slane %v1327_v26, %v1449_v8  ;;  %v1328_v28 = vld [vmem:[%s1436_s18 + $0x4] ss:$0 sps:$4 sm:$0x33]   ;;  %s1375_s9 = smov 80   ;;  %vm598_vm7 = vcmask 521220  }
  0x17   : > { %417 = vrot.lane.b32.xlu1 %v1443_v6, %s1361_s23  ;;  %s1376_s10 = smov 70   ;;  %v536_v29 = vrot.slane %v1328_v28, %v1449_v8  ;;  %v1329_v30 = vld [vmem:[%s1436_s18 + $0x4] ss:$0 sps:$4 sm:$0x33]   ;;  %s1377_s11 = smov 78   ;;  %vm732_vm8 = vcmask 736256   ;;  %vm1514_vm10 = vmor %vm598_vm7, %vm597_vm6 }
  0x18   : > { %401 = vrot.lane.b32.xlu0 %v400_v10, %s1362_s24  ;;  %s1378_s15 = smov 20   ;;  %v563_v31 = vrot.slane %v1329_v30, %v1449_v8  ;;  %s1379_s16 = smov 21   ;;  %v1330_v32 = vld [vmem:[%s1436_s18] ss:$0 sps:$4 sm:$0x33]   ;;  %vm470_vm9 = vcmask 910592  }
  0x19   : > { %s1380_s17 = smov 11   ;;  %s1381_s19 = smov 12   ;;  %v202_v33 = vrot.slane %v1330_v32, %v1449_v8  ;;  %v1331_v34 = vld [vmem:[%s1436_s18] ss:$0 sps:$4 sm:$0x33]   ;;  %vm338_vm11 = vcmask 1044098  }
  0x1a   : > { %s1382_s20 = smov 126   ;;  %s1383_s21 = smov 127   ;;  %v230_v35 = vrot.slane %v1331_v34, %v1449_v8  ;;  %v1332_v36 = vld [vmem:[%s1436_s18 + $0x6] ss:$0 sps:$4 sm:$0x33]   ;;  %vm339_vm12 = vcmask 261126  }
  0x1b   : > { %577 = vrot.lane.b32.xlu1 %v1457_v12, %s1363_s25  ;;  %s1384_s22 = smov 112   ;;  %s1385_s23 = smov 118   ;;  %v610_v37 = vrot.slane %v1332_v36, %v1449_v8  ;;  %v1333_v38 = vld [vmem:[%s1436_s18 + $0x6] ss:$0 sps:$4 sm:$0x33]   ;;  %vm404_vm13 = vcmask 556032   ;;  %vm1521_vm1 = vmor %vm339_vm12, %vm338_vm11 }
  0x1c   : > { %434 = vrot.lane.b32.xlu0 %v433_v14, %s1364_s26  ;;  %s1386_s24 = smov 110   ;;  %s1387_s25 = smov 111   ;;  %v646_v39 = vrot.slane %v1333_v38, %v1449_v8  ;;  %v1334_v40 = vld [vmem:[%s1436_s18 + $0x4] ss:$0 sps:$4 sm:$0x33]   ;;  %vm206_vm14 = vcmask 650242  }
  0x1d   : > { %s1388_s26 = smov 32   ;;  %v481_v41 = vrot.slane %v1334_v40, %v1449_v8  ;;  %v1335_v42 = vld [vmem:[%s1436_s18 + $0x4] ss:$0 sps:$4 sm:$0x33]   ;;  %vm387_vm15 = vcmask 564224   ;;  %vm437_vm2 = vcmask 482304  }
  0x1e   : > { %v509_v43 = vrot.slane %v1335_v42, %v1449_v8  ;;  %vm420_vm3 = vcmask 490496   ;;  %vm315_vm6 = vcmask 654336   ;;  %vm617_vm7 = vcmask 1044354   ;;  %v1347_v55 = vld [vmem:[%s1656_s1] sm:$0x7f]   ;;  %p184_p4 = scmp.lt.s32.totalorder %s1424_s13, 1 }
  0x1f   : > { %258 = vrot.lane.b32.xlu1 %v257_v15, %s1365_s27  ;;  %s1389_s27 = smov 102   ;;  %vm683_vm11 = vcmask 818176   ;;  %vm485_vm12 = vcmask 912642  }
  0x20   : > { %244 = vrot.lane.b32.xlu0 %v1447_v7, %s1366_s28  ;;  %s1390_s28 = smov 30   ;;  %s1672_s13 = smov (!%p184_p4, %s1424_s13), 1 }
  0x23   : > { %285 = vrot.lane.b32.xlu1 %v284_v17, %s1367_s29  ;;  %s1391_s29 = smov 31  }
  0x24   : > { %271 = vrot.lane.b32.xlu0 %v1447_v7, %s1369_s30  ;;  %s1394_s30 = smov 22  }
  0x27   : > { %680 = vrot.lane.b32.xlu1 %v679_v19, %s1370_s4 }
  0x28   : > { %663 = vrot.lane.b32.xlu0 %v1439_v5, %s1371_s5  ;;  %s1240_s5 = sshll.u32 %s1670_s14, 3  ;;  %s1395_s14 = smov 16  }
  0x2b   : > { %713 = vrot.lane.b32.xlu1 %v712_v23, %s1372_s6 }
  0x2c   : > { %696 = vrot.lane.b32.xlu0 %v1439_v5, %s1373_s7 }
  0x2f   : > { %332 = vrot.lane.b32.xlu1 %v331_v25, %s1374_s8  ;;  %s1595_s8 = scalar_lea.vmem %s1657_s2, %s1240_s5 }
  0x30   : > { %312 = vrot.lane.b32.xlu0 %v1443_v6, %s1375_s9  ;;  %s1396_s9 = smov 48  }
  0x33   : > { %368 = vrot.lane.b32.xlu1 %v367_v27, %s1376_s10  ;;  %s1397_s10 = smov 96  }
  0x34   : > { %351 = vrot.lane.b32.xlu0 %v1443_v6, %s1377_s11  ;;  %s1241_s11 = sshll.u32 %s1672_s13, 4 }
  0x37   : > { %537 = vrot.lane.b32.xlu1 %v536_v29, %s1378_s15 }
  0x38   : > { %523 = vrot.lane.b32.xlu0 %v1457_v12, %s1379_s16 }
  0x3b   : > { %564 = vrot.lane.b32.xlu1 %v563_v31, %s1380_s17  ;;  %s188_s17 = scalar_lea.vmem %s1658_s3, %s1241_s11 }
  0x3c   : > { %550 = vrot.lane.b32.xlu0 %v1457_v12, %s1381_s19 }
  0x3f   : > { %217 = vrot.lane.b32.xlu1 %v1447_v7, %s1382_s20 }
  0x40   : > { %203 = vrot.lane.b32.xlu0 %v202_v33, %s1383_s21 }
  0x43   : > { %591 = vrot.lane.b32.xlu1 %v1439_v5, %s1384_s22 }
  0x44   : > { %231 = vrot.lane.b32.xlu0 %v230_v35, %s1385_s23 }
  0x47   : > { %630 = vrot.lane.b32.xlu1 %v1439_v5, %s1386_s24 }
  0x48   : > { %611 = vrot.lane.b32.xlu0 %v610_v37, %s1387_s25 }
  0x4b   : > { %467 = vrot.lane.b32.xlu1 %v1457_v12, %s1388_s26 }
  0x4c   : > { %647 = vrot.lane.b32.xlu0 %v646_v39, %s1389_s27 }
  0x4f   : > { %496 = vrot.lane.b32.xlu1 %v1457_v12, %s1390_s28 }
  0x50   : > { %482 = vrot.lane.b32.xlu0 %v481_v41, %s1391_s29 }
  0x54   : > { %510 = vrot.lane.b32.xlu0 %v509_v43, %s1394_s30 }
  0x81   : > { %v730_v45 = vpop.permute.xlu1 %729 }
  0x82   : > { %v451_v46 = vpop.permute.xlu0 %450  ;;  %v731_v53 = vrot.slane %v730_v45, 4 }
  0x83   : > { %v452_v47 = vrot.slane %v451_v46, 4 }
  0x84   : > { %v733_v57 = vsel %vm732_vm8, %v731_v53, %v730_v45  ;;  %vm618_vm8 = vcmask 523270  }
  0x85   : > { %v385_v48 = vpop.permute.xlu1 %384  ;;  %v454_v51 = vsel %vm453_vm4, %v452_v47, %v451_v46  ;;  %vm797_vm4 = vcmask 1041408  }
  0x86   : > { %v299_v50 = vpop.permute.xlu0 %298  ;;  %v386_v60 = vrot.slane %v385_v48, 4 }
  0x87   : > { %301 = vst.msk [vmem:[#allocation2 + $0x30] sm:$0x3] %vm191_vm0, %v299_v50 }
  0x88   : > { %456 = vst.msk [vmem:[#allocation2 + $0x30] sm:$0x33] %vm1507_vm5, %v454_v51  ;;  %v388_v3 = vsel %vm387_vm15, %v386_v60, %v385_v48  ;;  %vm1540_vm15 = vmor %vm618_vm8, %vm617_vm7  ;;  %vm371_vm7 = vcmask 572416   ;;  %vm1009_vm8 = vcmask 649216  }
  0x89   : > { %v418_v52 = vpop.permute.xlu1 %417 }
  0x8a   : > { %v402_v54 = vpop.permute.xlu0 %401  ;;  %v419_v4 = vrot.slane %v418_v52, 4 }
  0x8b   : > { %v403_v58 = vrot.slane %v402_v54, 4 }
  0x8c   : > { %v421_v9 = vsel %vm420_vm3, %v419_v4, %v418_v52  ;;  %vm699_vm3 = vcmask 752640  }
  0x8d   : > { %v578_v56 = vpop.permute.xlu1 %577  ;;  %v405_v63 = vsel %vm404_vm13, %v403_v58, %v402_v54  ;;  %vm666_vm13 = vcmask 826368  }
  0x8e   : > { %580 = vst.msk [vmem:[#allocation2 + $0x34] sm:$0x3] %vm470_vm9, %v578_v56  ;;  %v435_v59 = vpop.permute.xlu0 %434 }
  0x8f   : > { %735 = vst.msk [vmem:[#allocation2 + $0x34] sm:$0x33] %vm1514_vm10, %v733_v57  ;;  %v436_v0 = vrot.slane %v435_v59, 4 }
  0x91   : > { %v259_v62 = vpop.permute.xlu1 %258  ;;  %v438_v6 = vsel %vm437_vm2, %v436_v0, %v435_v59  ;;  %vm716_vm2 = vcmask 744448  }
  0x92   : > { %261 = vst.msk [vmem:[#allocation2 + $0x18] sm:$0xc] %vm206_vm14, %v259_v62  ;;  %v245_v1 = vpop.permute.xlu0 %244 }
  0x93   : > { %407 = vst.msk [vmem:[#allocation2 + $0x18] sm:$0xcc] %vm1521_vm1, %v405_v63 }
  0x94   : > { %247 = vst.msk [vmem:[#allocation2 + $0x18] sm:$0x3] %vm191_vm0, %v245_v1 }
  0x95   : > { %390 = vst.msk [vmem:[#allocation2 + $0x18] sm:$0x33] %vm1507_vm5, %v388_v3  ;;  %v286_v5 = vpop.permute.xlu1 %285 }
  0x96   : > { %288 = vst.msk [vmem:[#allocation2 + $0x24] sm:$0xc] %vm206_vm14, %v286_v5  ;;  %v272_v7 = vpop.permute.xlu0 %271  ;;  %v746_v8 = vld [vmem:[#allocation2 + $0x30] sm:$0x33] }
  0x97   : > { %440 = vst.msk [vmem:[#allocation2 + $0x24] sm:$0xcc] %vm1521_vm1, %v438_v6  ;;  %v1219_v10 = vcombine.high %v746_v8, %v746_v8  ;;  %v1218_v11 = vcombine.low %v746_v8, %v746_v8  ;;  %v1338_v12 = vld [vmem:[#allocation2 + $0x38] ss:$0 sps:$4 sm:$0x33]  }
  0x98   : > { %274 = vst.msk [vmem:[#allocation2 + $0x24] sm:$0x3] %vm191_vm0, %v272_v7  ;;  %v805_v15 = vsel %vm797_vm4, %v1338_v12, 0  ;;  %v892_v7 = vand.u32 127, %v199_v2 }
  0x99   : > { %423 = vst.msk [vmem:[#allocation2 + $0x24] sm:$0x33] %vm1507_vm5, %v421_v9  ;;  %1221 = vmatprep.subr.msk.bf16.mxu0 %vm797_vm4, %v1219_v10  ;;  %v681_v13 = vpop.permute.xlu1 %680  ;;  %v799_v14 = vsel %vm797_vm4, %v1218_v11, 0  ;;  %1255 = vmatpush3.bf16.msra.mxu1 %v805_v15  ;;  %vm354_vm4 = vcmask 637952  }
  0x9a   : > { %v664_v16 = vpop.permute.xlu0 %663  ;;  %818 = vmatpush1.bf16.msra.mxu0 %v799_v14  ;;  %1256 = vmatprep.subr.bf16.mxu1 %v1368_v21  ;;  %v682_v25 = vrot.slane %v681_v13, 4  ;;  %v893_v8 = vadd.s32 128, %v892_v7  ;;  %v894_v9 = vadd.s32 256, %v892_v7 }
  0x9b   : > { %v665_v27 = vrot.slane %v664_v16, 4  ;;  %v1588_v14 = vmul.u32.u64.low 3435973837, %v892_v7  ;;  %v1589_v15 = vmul.u32.u64.high 3435973837, %v892_v7, %v1588_v14 }
  0x9c   : > { %v684_v30 = vsel %vm683_vm11, %v682_v25, %v681_v13  ;;  %v1582_v10 = vmul.u32.u64.low 3435973837, %v893_v8  ;;  %v1583_v11 = vmul.u32.u64.high 3435973837, %v893_v8, %v1582_v10 }
  0x9d   : > { %v714_v17 = vpop.permute.xlu1 %713  ;;  %v667_v33 = vsel %vm666_vm13, %v665_v27, %v664_v16  ;;  %v1585_v12 = vmul.u32.u64.low 3435973837, %v894_v9  ;;  %v1586_v13 = vmul.u32.u64.high 3435973837, %v894_v9, %v1585_v12  ;;  %v901_v27 = vshrl.u32 %v1589_v15, 3 }
  0x9e   : > { %v697_v18 = vpop.permute.xlu0 %696  ;;  %v715_v31 = vrot.slane %v714_v17, 4 }
  0x9f   : > { %v698_v34 = vrot.slane %v697_v18, 4 }
  0xa0   : > { %v717_v36 = vsel %vm716_vm2, %v715_v31, %v714_v17  ;;  %v1342_v52 = vld [vmem:[#allocation2 + $0x18] ss:$12 sps:$4 sm:$0xff]  }
  0xa1   : > { %v333_v19 = vpop.permute.xlu1 %332  ;;  %v700_v39 = vsel %vm699_vm3, %v698_v34, %v697_v18  ;;  %v902_v34 = vmul.u32 10, %v901_v27 }
  0xa2   : > { %v313_v20 = vpop.permute.xlu0 %312  ;;  %v334_v40 = vrot.slane %v333_v19, 4 }
  0xa3   : > { %v314_v22 = vrot.slane %v313_v20, 4 }
  0xa5   : > { %v316_v23 = vsel %vm315_vm6, %v314_v22, %v313_v20  ;;  %v369_v24 = vpop.permute.xlu1 %368  ;;  %vm335_vm6 = vcmask 646144  }
  0xa6   : > { %v352_v26 = vpop.permute.xlu0 %351  ;;  %321 = vst.msk [vmem:[#allocation2] sm:$0x33] %vm1507_vm5, %v316_v23  ;;  %v336_v44 = vsel %vm335_vm6, %v334_v40, %v333_v19  ;;  %v370_v45 = vrot.slane %v369_v24, 4  ;;  %v912_v23 = vshrl.u32 %v1583_v11, 3 }
  0xa7   : > { %v353_v37 = vrot.slane %v352_v26, 4 }
  0xa8   : > { %v372_v48 = vsel %vm371_vm7, %v370_v45, %v369_v24  ;;  %v923_v24 = vshrl.u32 %v1586_v13, 3  ;;  %v913_v31 = vmul.u32 10, %v912_v23 }
  0xa9   : > { %v538_v29 = vpop.permute.xlu1 %537  ;;  %v355_v42 = vsel %vm354_vm4, %v353_v37, %v352_v26  ;;  %v903_v37 = vsub.s32 %v892_v7, %v902_v34 }
  0xaa   : > { %540 = vst.msk [vmem:[#allocation2 + $0x1c] sm:$0xc] %vm485_vm12, %v538_v29  ;;  %v524_v32 = vpop.permute.xlu0 %523 }
  0xab   : > { %686 = vst.msk [vmem:[#allocation2 + $0x1c] sm:$0xcc] %vm1540_vm15, %v684_v30  ;;  %vm928_vm2 = vcmp.ne.s32.totalorder %v903_v37, 0  ;;  %vm931_vm3 = vcmp.lt.s32.totalorder %v903_v37, 0  ;;  %v937_v40 = vadd.s32 10, %v903_v37 }
  0xac   : > { %526 = vst.msk [vmem:[#allocation2 + $0x1c] sm:$0x3] %vm470_vm9, %v524_v32  ;;  %vm934_vm7 = vmand %vm931_vm3, %vm928_vm2  ;;  %vm975_vm2 = vcmask 5120   ;;  %vm1054_vm3 = vcmask 130048  }
  0xad   : > { %669 = vst.msk [vmem:[#allocation2 + $0x1c] sm:$0x33] %vm1514_vm10, %v667_v33  ;;  %v565_v35 = vpop.permute.xlu1 %564  ;;  %v924_v33 = vmul.u32 10, %v923_v24 }
  0xae   : > { %567 = vst.msk [vmem:[#allocation2 + $0x28] sm:$0xc] %vm485_vm12, %v565_v35  ;;  %v551_v38 = vpop.permute.xlu0 %550  ;;  %v914_v35 = vsub.s32 %v893_v8, %v913_v31 }
  0xaf   : > { %719 = vst.msk [vmem:[#allocation2 + $0x28] sm:$0xcc] %vm1540_vm15, %v717_v36  ;;  %v925_v36 = vsub.s32 %v894_v9, %v924_v33 }
  0xb0   : > { %553 = vst.msk [vmem:[#allocation2 + $0x28] sm:$0x3] %vm470_vm9, %v551_v38  ;;  %vm929_vm11 = vcmp.ne.s32.totalorder %v914_v35, 0  ;;  %v938_v38 = vadd.s32 10, %v914_v35 }
  0xb1   : > { %702 = vst.msk [vmem:[#allocation2 + $0x28] sm:$0x33] %vm1514_vm10, %v700_v39  ;;  %v218_v41 = vpop.permute.xlu1 %217  ;;  %vm930_vm13 = vcmp.ne.s32.totalorder %v925_v36, 0  ;;  %v939_v39 = vadd.s32 10, %v925_v36 }
  0xb2   : > { %220 = vst.msk [vmem:[#allocation2 + $0xc] sm:$0x3] %vm191_vm0, %v218_v41  ;;  %v204_v43 = vpop.permute.xlu0 %203  ;;  %vm594_vm0 = vcmask 916480  }
  0xb3   : > { %357 = vst.msk [vmem:[#allocation2 + $0xc] sm:$0x33] %vm1507_vm5, %v355_v42  ;;  %vm633_vm5 = vcmask 900096  }
  0xb4   : > { %207 = vst.msk [vmem:[#allocation2] sm:$0xc] %vm206_vm14, %v204_v43  ;;  %v940_v43 = vsel %vm934_vm7, %v937_v40, %v903_v37 }
  0xb5   : > { %341 = vst.msk [vmem:[#allocation2] sm:$0xcc] %vm1521_vm1, %v336_v44  ;;  %v592_v46 = vpop.permute.xlu1 %591 }
  0xb6   : > { %v232_v47 = vpop.permute.xlu0 %231  ;;  %v593_v53 = vrot.slane %v592_v46, 4 }
  0xb7   : > { %234 = vst.msk [vmem:[#allocation2 + $0xc] sm:$0xc] %vm206_vm14, %v232_v47  ;;  %vm614_vm14 = vcmask 908288  }
  0xb8   : > { %v1339_v50 = vld [vmem:[#allocation2 + $0x1c] ss:$12 sps:$4 sm:$0xff]   ;;  %374 = vst.msk [vmem:[#allocation2 + $0xc] sm:$0xcc] %vm1521_vm1, %v372_v48  ;;  %v1341_v51 = vld [vmem:[#allocation2 + $0x20] ss:$12 sps:$4 sm:$0xff]   ;;  %v595_v57 = vsel %vm594_vm0, %v593_v53, %v592_v46 }
  0xb9   : > { %819 = vmatprep.subr.bf16.mxu0 %v1339_v50  ;;  %v631_v49 = vpop.permute.xlu1 %630  ;;  %1257 = vmatpush3.bf16.msra.mxu1 %v1341_v51  ;;  %vm650_vm1 = vcmask 834560  }
  0xba   : > { %v612_v54 = vpop.permute.xlu0 %611  ;;  %820 = vmatpush1.bf16.msra.mxu0 %v1342_v52  ;;  %1258 = vmatprep.subr.bf16.mxu1 %v1368_v21  ;;  %v632_v58 = vrot.slane %v631_v49, 4 }
  0xbb   : > { %v613_v60 = vrot.slane %v612_v54, 4 }
  0xbc   : > { %v634_v62 = vsel %vm633_vm5, %v632_v58, %v631_v49 }
  0xbd   : > { %v468_v56 = vpop.permute.xlu1 %467  ;;  %v615_v0 = vsel %vm614_vm14, %v613_v60, %v612_v54  ;;  %vm943_vm14 = vcmp.lt.s32.totalorder %v940_v43, 8 }
  0xbe   : > { %471 = vst.msk [vmem:[#allocation2 + $0x4] sm:$0x3] %vm470_vm9, %v468_v56  ;;  %v648_v59 = vpop.permute.xlu0 %647 }
  0xbf   : > { %600 = vst.msk [vmem:[#allocation2 + $0x4] sm:$0x33] %vm1514_vm10, %v595_v57  ;;  %v649_v1 = vrot.slane %v648_v59, 4  ;;  %v1346_v6 = vld [vmem:[#allocation2] ss:$12 sps:$4 sm:$0xff]  }
  0xc1   : > { %v497_v61 = vpop.permute.xlu1 %496  ;;  %v651_v3 = vsel %vm650_vm1, %v649_v1, %v648_v59  ;;  %vm959_vm1 = vcmask 523264  }
  0xc2   : > { %499 = vst.msk [vmem:[#allocation2 + $0x10] sm:$0x3] %vm470_vm9, %v497_v61  ;;  %v483_v63 = vpop.permute.xlu0 %482  ;;  %vm793_vm9 = vcmask 293888  }
  0xc3   : > { %636 = vst.msk [vmem:[#allocation2 + $0x10] sm:$0x33] %vm1514_vm10, %v634_v62  ;;  %vm1007_vm10 = vcmask 650240  }
  0xc4   : > { %486 = vst.msk [vmem:[#allocation2 + $0x4] sm:$0xc] %vm485_vm12, %v483_v63 }
  0xc5   : > { %620 = vst.msk [vmem:[#allocation2 + $0x4] sm:$0xcc] %vm1540_vm15, %v615_v0 }
  0xc6   : > { %v511_v21 = vpop.permute.xlu0 %510 }
  0xc7   : > { %513 = vst.msk [vmem:[#allocation2 + $0x10] sm:$0xc] %vm485_vm12, %v511_v21  ;;  %vm932_vm12 = vcmp.lt.s32.totalorder %v914_v35, 0 }
  0xc8   : > { %653 = vst.msk [vmem:[#allocation2 + $0x10] sm:$0xcc] %vm1540_vm15, %v651_v3  ;;  %vm933_vm15 = vcmp.lt.s32.totalorder %v925_v36, 0  ;;  %vm935_vm4 = vmand %vm932_vm12, %vm929_vm11  ;;  %vm968_vm11 = vcmask 521216   ;;  %vm1023_vm12 = vcmask 392192  }
  0xc9   : > { %vm936_vm6 = vmand %vm933_vm15, %vm930_vm13  ;;  %v941_v41 = vsel %vm935_vm4, %v938_v38, %v914_v35  ;;  %vm973_vm13 = vcmask 7168   ;;  %vm995_vm15 = vcmask 15368   ;;  %vm997_vm4 = vcmask 13320  }
  0xca   : > { %v942_v42 = vsel %vm936_vm6, %v939_v39, %v925_v36  ;;  %vm944_vm0 = vcmp.lt.s32.totalorder %v941_v41, 8 }
  0xcb   : > { %vm1613_vm5 = vcmp.lt.s32.totalorder %v942_v42, 8 }
  0xcf   : > { %v1343_v4 = vld [vmem:[#allocation2 + $0x4] ss:$12 sps:$4 sm:$0xff]   ;;  %v1345_v5 = vld [vmem:[#allocation2 + $0x8] ss:$12 sps:$4 sm:$0xff]  }
  0xd0   : > { %821 = vmatprep.subr.bf16.mxu0 %v1343_v4  ;;  %1259 = vmatpush3.bf16.msra.mxu1 %v1345_v5 }
  0xd1   : > { %822 = vmatpush1.bf16.msra.mxu0 %v1346_v6 }
  0xd3   : > { %1261 = vmatmul.mubr.msk.bf16.vlgmr.msra.gmra.mxu1 %vm793_vm9, %v1347_v55 }
  0xd4   : > { %1222 = vmatmul.mubr.msk.bf16.vlgmr.msra.gmra.mxu0 %vm793_vm9, %v1347_v55  ;;  %vm964_vm9 = vcmask 1045504  }
 0x193   : > { %v884_v16 = vpop.f32.mrf.mxu1 }
 0x194   : > { %v841_v17 = vpop.f32.mrf.mxu0  ;;  %v954_v46 = vsel %vm1613_vm5, %v884_v16, 0.0 }
 0x195   : > { %v1242_v2 = vpack.c.bf16 %v841_v17, %v841_v17  ;;  %v1262_v18 = vpop.f32.mrf.mxu1  ;;  %v952_v47 = vsel %vm943_vm14, %v841_v17, 0.0  ;;  %v979_v50 = vmul.f32 %v954_v46, %v954_v46  ;;  %v960_v58 = vsel %vm959_vm1, %v954_v46, 0.0 }
 0x196   : > { %v1597_v19 = vpop.f32.mrf.mxu0  ;;  %v977_v51 = vmul.f32 %v952_v47, %v952_v47 }
 0x197   : > { %v1248_v20 = vpack.c.bf16 %v884_v16, %v1597_v19  ;;  %v1244_v22 = vpack.c.bf16 %v1597_v19, %v841_v17  ;;  %1008 = vst.msk [vmem:[%s1595_s8] sm:$0xf] %vm1007_vm10, %v1242_v2  ;;  %v887_v25 = vpop.f32.mrf.mxu1  ;;  %v953_v45 = vsel %vm944_vm0, %v1597_v19, 0.0  ;;  %v984_v54 = vsel %vm959_vm1, %v979_v50, 0.0 }
 0x198   : > { %v1605_v26 = vpop.f32.mrf.mxu0  ;;  %v978_v48 = vmul.f32 %v953_v45, %v953_v45  ;;  %v958_v56 = vadd.f32 %v953_v45, %v952_v47  ;;  %v957_v60 = vsel %vm1613_vm5, %v887_v25, 0.0  ;;  %v1246_v11 = vpack.c.bf16 %v1597_v19, %v1597_v19 }
 0x199   : > { %v1243_v28 = vpack.c.bf16 %v1605_v26, %v1605_v26  ;;  %1048 = vrot.lane.b32.xlu1 %v1248_v20, %s1395_s14  ;;  %1017 = vrot.lane.b32.xlu0 %v1244_v22, %s1396_s9  ;;  %v1263_v29 = vpop.f32.mrf.mxu1  ;;  %v955_v49 = vsel %vm943_vm14, %v1605_v26, 0.0  ;;  %v969_v0 = vsel %vm968_vm11, %v957_v60, 0.0  ;;  %v982_v55 = vmul.f32 %v957_v60, %v957_v60 }
 0x19a   : > { %v847_v30 = vpop.f32.mrf.mxu0  ;;  %v983_v53 = vadd.f32 %v978_v48, %v977_v51  ;;  %v965_v59 = vsel %vm964_vm9, %v955_v49, 0.0  ;;  %v961_v63 = vadd.f32 %v960_v58, %v958_v56  ;;  %v980_v5 = vmul.f32 %v955_v49, %v955_v49 }
 0x19b   : > { %v1249_v32 = vpack.c.bf16 %v887_v25, %v847_v30  ;;  %1010 = vst.msk [vmem:[%s1595_s8 + $0x4] sm:$0x7] %vm1009_vm8, %v1243_v28  ;;  %v956_v52 = vsel %vm944_vm0, %v847_v30, 0.0  ;;  %v1245_v21 = vpack.c.bf16 %v847_v30, %v1605_v26  ;;  %v1247_v3 = vpack.c.bf16 %v847_v30, %v847_v30 }
 0x19c   : > { %v966_v57 = vsel %vm964_vm9, %v956_v52, 0.0  ;;  %v985_v61 = vadd.f32 %v984_v54, %v983_v53  ;;  %v981_v4 = vmul.f32 %v956_v52, %v956_v52  ;;  %v988_v7 = vsel %vm964_vm9, %v980_v5, 0.0 }
 0x19d   : > { %1050 = vrot.lane.b32.xlu0 %v1249_v32, %s1395_s14  ;;  %v967_v62 = vadd.f32 %v966_v57, %v965_v59  ;;  %v991_v9 = vsel %vm968_vm11, %v982_v55, 0.0 }
 0x19e   : > { %v989_v6 = vsel %vm964_vm9, %v981_v4, 0.0 }
 0x19f   : > { %v970_v1 = vadd.f32 %v969_v0, %v967_v62  ;;  %v990_v8 = vadd.f32 %v989_v6, %v988_v7 }
 0x1a1   : > { %v992_v10 = vadd.f32 %v991_v9, %v990_v8 }
 0x1bc   : > { %986 = vadd.xlane.f32.xlu0 %v985_v61 }
 0x1bd   : > { %962 = vadd.xlane.f32.xlu1 %v961_v63 }
 0x1c0   : > { %971 = vadd.xlane.f32.xlu0 %v970_v1 }
 0x1ce   : > { %1019 = vrot.lane.b32.xlu1 %v1245_v21, %s1396_s9 }
 0x1d6   : > { %1035 = vrot.lane.b32.xlu0 %v1247_v3, %s1397_s10 }
 0x1f2   : > { %993 = vadd.xlane.f32.xlu1 %v992_v10 }
 0x203   : > { %1033 = vrot.lane.b32.xlu1 %v1246_v11, %s1397_s10 }
 0x20b   : > { %v1018_v12 = vpop.permute.xlu0 %1017  ;;  %v1049_v16 = vpop.permute.xlu1 %1048 }
 0x20c   : > { %v1021_v13 = vrot.slane %v1018_v12, 4  ;;  %v1052_v27 = vrot.slane %v1049_v16, 4 }
 0x20e   : > { %v1024_v14 = vsel %vm1023_vm12, %v1018_v12, %v1021_v13  ;;  %v1055_v29 = vsel %vm1054_vm3, %v1049_v16, %v1052_v27 }
 0x20f   : > { %1228 = vst.msk [vmem:[%s1595_s8 + $0x8] sm:$0xf] %vm1007_vm10, %v1024_v14  ;;  %v1051_v15 = vpop.permute.xlu0 %1050  ;;  %1236 = vst.msk [vmem:[%s1595_s8 + $0x18] sm:$0xf] %vm1007_vm10, %v1055_v29 }
 0x210   : > { %v1053_v20 = vrot.slane %v1051_v15, 4 }
 0x212   : > { %v1056_v25 = vsel %vm1054_vm3, %v1051_v15, %v1053_v20 }
 0x213   : > { %1237 = vst.msk [vmem:[%s1595_s8 + $0x1c] sm:$0x7] %vm1009_vm8, %v1056_v25 }
 0x245   : > { %v987_v17 = vpop.xlane.xlu0 %986 }
 0x246   : > { %v963_v2 = vpop.xlane.xlu1 %962 }
 0x247   : > { %974 = vst.msk [vmem:[%s188_s17] sm:$0xff] %vm973_vm13, %v963_v2 }
 0x248   : > { %996 = vst.msk [vmem:[%s188_s17] sm:$0xff] %vm995_vm15, %v987_v17 }
 0x249   : > { %v972_v18 = vpop.xlane.xlu0 %971 }
 0x24a   : > { %976 = vst.msk [vmem:[%s188_s17 + $0x8] sm:$0x3f] %vm975_vm2, %v972_v18  ;;  %v1020_v19 = vpop.permute.xlu1 %1019 }
 0x24b   : > { %v1022_v22 = vrot.slane %v1020_v19, 4 }
 0x24d   : > { %v1025_v23 = vsel %vm1023_vm12, %v1020_v19, %v1022_v22  ;;  %v1036_v24 = vpop.permute.xlu0 %1035 }
 0x24e   : > { %1229 = vst.msk [vmem:[%s1595_s8 + $0xc] sm:$0x7] %vm1009_vm8, %v1025_v23  ;;  %1233 = vst.msk [vmem:[%s1595_s8 + $0x14] sm:$0x7] %vm1009_vm8, %v1036_v24 }
 0x27b   : > { %v994_v26 = vpop.xlane.xlu1 %993 }
 0x27c   : > { %998 = vst.msk [vmem:[%s188_s17 + $0x8] sm:$0x3f] %vm997_vm4, %v994_v26 }
 0x27f   : > { %v1034_v28 = vpop.permute.xlu1 %1033 }
 0x280   : > { %1232 = vst.msk [vmem:[%s1595_s8 + $0x10] sm:$0xf] %vm1007_vm10, %v1034_v28 }
 0x281 PF: > { %s14_s12 = sadd.s32 1, %s1354_s12  }
 0x282   : > { %p11_p5 = scmp.ge.s32.totalorder %s14_s12, 4  }
 0x284   :  { %13 = sbr.rel (!%p11_p5) target bundleno = 1 (0x1), region = 76 }

// kernel: r2plus1d_forward.13
= control target key start
LH: loop header
LB: loop body
LE: loop exit
PB: predicated region body
PF: predicated region fallthrough
CT: control target
= control target key end

     0   :  { %s1160_s15 = smov 0   ;;  %s1428_s0 = inlined_call_operand.vmem [shape: bf16[8,14,80], index: 0, kind: input, shape index: {}]   ;;  %s1429_s1 = inlined_call_operand.vmem [shape: f32[14,2], index: 1, kind: input, shape index: {}]   ;;  %s1430_s2 = inlined_call_operand.vmem [shape: bf16[8,42], index: 2, kind: input, shape index: {}]   ;;  %s1431_s3 = inlined_call_operand.vmem [shape: bf16[8,8,80], index: 3, kind: output, shape index: {0}]   ;;  %s1432_s4 = inlined_call_operand.vmem [shape: f32[2,8,2], index: 4, kind: output, shape index: {1}]  }
   0x1 LB: > { %s1166_s16 = sadd.s32 4294967295, %s1123_s15   ;;  %p977_p0 = scmp.ge.s32.totalorder %s1123_s15, 1  ;;  %s1123_s15 = sphi %s1160_s15, %s15_s15  }
   0x2   : > { %p167_p1 = scmp.lt.s32.totalorder %s1123_s15, 3 }
   0x4   : > { %p168_p2 = pnand %p977_p0, %p167_p1 }
   0x5   : > { %s978_s21 = sshll.u32 (!%p168_p2), %s1166_s16, 2  ;;  %s1127_s26 = smov (!%p168_p2), 80  }
   0x6   : > { %171 = sbr.rel (%p168_p2) target bundleno = 665 (0x299), region = 32  ;;  %p199_p3 = scmp.lt.s32.totalorder (!%p168_p2), %s978_s21, 7 }
   0x7   : > { %s1128_s27 = smov (!%p168_p2), 112   ;;  %s1129_s28 = smov (!%p168_p2), 32  }
   0x8   : > { %s1132_s9 = smov (!%p168_p2), 16   ;;  %s1133_s10 = smov (!%p168_p2), 96  }
   0x9   : > { %s1134_s11 = smov (!%p168_p2), 48   ;;  %p211_p4 = scmp.lt.s32.totalorder (!%p168_p2), %s1166_s16, 1 }
   0xb   : > { %v216_v0 = vld [vmem:[%s1429_s1] sm:$0xff]  ;;  %v1125_v1 = vmov 1   ;;  %v1126_v2 = vmov 0   ;;  %v217_v3 = vld [vmem:[%s1429_s1 + $0x8] sm:$0x3f]  ;;  %vm1433_vm0 = vcmask 650240  }
   0xc   : > { %1103 = vset.pattern.permute.xlu1 %v1125_v1  ;;  %1102 = vset.pattern.permute.xlu0 %v1126_v2  ;;  %219 = vst.msk [vmem:[#allocation2] sm:$0xf] %vm1433_vm0, %v1126_v2  ;;  %s1450_s21 = smov (!%p199_p3, %s978_s21), 7  ;;  %vm512_vm1 = vcmask 1041408   ;;  %vm513_vm2 = vcmask 1045508   ;;  %vm523_vm3 = vcmask 650242  }
   0xd   : > { %239 = vperm.xlu1 %1103, %v216_v0   ;;  %228 = vperm.xlu0 %1102, %v216_v0   ;;  %s1040_s22 = sshll.u32 %s1450_s21, 3  ;;  %vm1270_vm4 = vmor %vm512_vm1, %vm513_vm2  ;;  %vm526_vm5 = vcmask 647168   ;;  %vm354_vm6 = vcmask 1042432   ;;  %vm355_vm7 = vcmask 1046532   ;;  %vm220_vm8 = vcmask 649216   ;;  %s982_s5 = sshll.u32 %s1450_s21, 2 }
   0xe   : > { %721 = vmatprep.mubr.bf16.mxu0 %v1126_v2  ;;  %s1187_s25 = scalar_lea.vmem %s1428_s0, %s1040_s22  ;;  %221 = vst.msk [vmem:[#allocation2 + $0xc] sm:$0x7] %vm220_vm8, %v1126_v2  ;;  %vm1302_vm9 = vmor %vm354_vm6, %vm355_vm7  ;;  %vm368_vm10 = vcmask 648192   ;;  %vm365_vm11 = vcmask 650243   ;;  %vm1131_vm12 = vmmov 0   ;;  %vm267_vm13 = vcmask 1044096   ;;  %s1408_s8 = scalar_lea.vmem %s1431_s3, %s982_s5 }
   0xf   : > { %v222_v4 = vld [vmem:[%s1187_s25] ss:$16 sps:$4 sm:$0xff]   ;;  %v223_v7 = vld [vmem:[%s1187_s25 + $0x4] sm:$0x7]  ;;  %v991_v9 = vld [vmem:[%s1187_s25 + $0x14] sm:$0x7] }
  0x10   : > { %v996_v5 = vld [vmem:[%s1187_s25 + $0x8] ss:$8 sps:$4 sm:$0xff]   ;;  %v224_v6 = vunpack.c.l.bf16 %v222_v4  ;;  %v305_v8 = vunpack.c.h.bf16 %v222_v4  ;;  %v1013_v13 = vld [vmem:[%s1187_s25 + $0x14] sm:$0x7]  ;;  %v225_v16 = vunpack.c.l.bf16 %v223_v7  ;;  %v306_v17 = vunpack.c.l.bf16 %v991_v9  ;;  %v997_v23 = vld [vmem:[%s1187_s25 + $0xc] sm:$0x7] }
  0x11   : > { %243 = vperm.xlu1 %1103, %v217_v3   ;;  %233 = vperm.xlu0 %1102, %v217_v3   ;;  %v372_v10 = vunpack.c.l.bf16 %v996_v5  ;;  %v530_v11 = vunpack.c.h.bf16 %v996_v5  ;;  %v1016_v12 = vld [vmem:[%s1187_s25 + $0x8] ss:$16 sps:$4 sm:$0xff]   ;;  %v1017_v24 = vld [vmem:[%s1187_s25 + $0x1c] sm:$0x7]  ;;  %v531_v25 = vunpack.c.l.bf16 %v1013_v13  ;;  %v1001_v26 = vld [vmem:[%s1187_s25 + $0x14] sm:$0x7]  ;;  %v373_v35 = vunpack.c.l.bf16 %v997_v23 }
  0x12   : > { %v575_v18 = vunpack.c.h.bf16 %v1016_v12  ;;  %v498_v27 = vunpack.c.l.bf16 %v1016_v12  ;;  %v1005_v31 = vld [vmem:[%s1187_s25 + $0x1c] sm:$0x7]  ;;  %v576_v36 = vunpack.c.l.bf16 %v1017_v24  ;;  %v418_v40 = vunpack.c.l.bf16 %v1001_v26  ;;  %v1217_v41 = vld [vmem:[%s1187_s25 + $0x8] ss:$16 sps:$4 sm:$0xff]   ;;  %v1009_v51 = vld [vmem:[%s1187_s25 + $0xc] sm:$0x7] }
  0x13   : > { %v454_v45 = vunpack.c.l.bf16 %v1005_v31  ;;  %v453_v55 = vunpack.c.h.bf16 %v1217_v41  ;;  %v499_v62 = vunpack.c.l.bf16 %v1009_v51  ;;  %vm268_vm14 = vcmask 261124   ;;  %s1452_s16 = smov (!%p211_p4, %s1166_s16), 1 }
  0x14   : > { %vm262_vm15 = vcmask 654336   ;;  %vm1339_vm1 = vmor %vm268_vm14, %vm267_vm13  ;;  %vm271_vm2 = vcmask 1043072   ;;  %vm407_vm6 = vcmask 261127   ;;  %vm564_vm7 = vcmask 1044098   ;;  %s983_s12 = sshll.u32 %s1452_s16, 3 }
  0x15   : > { %1104 = vset.pattern.permute.xlu0 %v1125_v1  ;;  %vm565_vm8 = vcmask 261126   ;;  %vm608_vm13 = vcmask 1044354   ;;  %vm609_vm14 = vcmask 523270   ;;  %s214_s17 = scalar_lea.vmem %s1432_s4, %s983_s12 }
  0x88   : > { %v1195_v14 = vpop.permute.xlu1 %239  ;;  %v1197_v15 = vpop.permute.xlu0 %228 }
  0x89   : > { %v236_v19 = vmul.f32 %v1197_v15, %v224_v6  ;;  %v307_v20 = vmul.f32 %v305_v8, %v1197_v15  ;;  %v374_v21 = vmul.f32 %v372_v10, %v1197_v15  ;;  %v532_v22 = vmul.f32 %v530_v11, %v1197_v15 }
  0x8a   : > { %v577_v34 = vmul.f32 %v575_v18, %v1197_v15  ;;  %v500_v46 = vmul.f32 %v498_v27, %v1197_v15  ;;  %v455_v8 = vmul.f32 %v453_v55, %v1197_v15 }
  0x8b   : > { %v246_v28 = vadd.f32 %v1195_v14, %v236_v19  ;;  %v309_v29 = vadd.f32 %v307_v20, %v1195_v14  ;;  %v376_v30 = vadd.f32 %v374_v21, %v1195_v14  ;;  %v534_v33 = vadd.f32 %v532_v22, %v1195_v14 }
  0x8c   : > { %v1210_v32 = vpop.permute.xlu0 %233  ;;  %v1219_v42 = vpop.permute.xlu1 %243  ;;  %v579_v54 = vadd.f32 %v577_v34, %v1195_v14  ;;  %v502_v63 = vadd.f32 %v500_v46, %v1195_v14  ;;  %v457_v27 = vadd.f32 %v455_v8, %v1195_v14 }
  0x8d   : > { %v248_v37 = vmax.f32 %v246_v28, 0.0  ;;  %v237_v38 = vmul.f32 %v1210_v32, %v225_v16  ;;  %v308_v39 = vmul.f32 %v306_v17, %v1210_v32  ;;  %v378_v43 = vmax.f32 %v376_v30, 0.0 }
  0x8e   : > { %v533_v44 = vmul.f32 %v531_v25, %v1210_v32  ;;  %v311_v49 = vmax.f32 %v309_v29, 0.0  ;;  %v536_v52 = vmax.f32 %v534_v33, 0.0  ;;  %v375_v58 = vmul.f32 %v373_v35, %v1210_v32  ;;  %v1000_v33 = vld [vmem:[%s1187_s25] ss:$16 sps:$4 sm:$0xff]  }
  0x8f   : > { %v1041_v47 = vpack.c.bf16 %v248_v37, %v248_v37  ;;  %v247_v48 = vadd.f32 %v1219_v42, %v237_v38  ;;  %v310_v50 = vadd.f32 %v308_v39, %v1219_v42  ;;  %v1230_v57 = vpack.c.bf16 %v378_v43, %v378_v43  ;;  %v339_v43 = vld [vmem:[%s1187_s25 + $0x4] sm:$0x7] }
  0x90   : > { %v535_v53 = vadd.f32 %v533_v44, %v1219_v42  ;;  %v578_v59 = vmul.f32 %v576_v36, %v1210_v32  ;;  %v1045_v1 = vpack.c.bf16 %v311_v49, %v311_v49  ;;  %v377_v3 = vadd.f32 %v375_v58, %v1219_v42 }
  0x91   : > { %256 = vrot.lane.b32.xlu1 %v1041_v47, %s1127_s26  ;;  %v249_v56 = vmax.f32 %v247_v48, 0.0  ;;  %v312_v60 = vmax.f32 %v310_v50, 0.0  ;;  %v1237_v5 = vpack.c.bf16 %v536_v52, %v536_v52  ;;  %v581_v7 = vmax.f32 %v579_v54, 0.0 }
  0x92   : > { %v537_v61 = vmax.f32 %v535_v53, 0.0  ;;  %v580_v4 = vadd.f32 %v578_v59, %v1219_v42  ;;  %v386_v9 = vrot.slane %v1230_v57, 5  ;;  %v379_v10 = vmax.f32 %v377_v3, 0.0  ;;  %v987_v53 = vld [vmem:[%s1187_s25 + $0xc] sm:$0x7] }
  0x93   : > { %v1042_v0 = vpack.c.bf16 %v249_v56, %v249_v56  ;;  %v420_v11 = vmul.f32 %v418_v40, %v1210_v32  ;;  %v456_v12 = vmul.f32 %v454_v45, %v1210_v32  ;;  %v1046_v13 = vpack.c.bf16 %v312_v60, %v312_v60 }
  0x94   : > { %v1239_v6 = vpack.c.bf16 %v537_v61, %v537_v61  ;;  %v582_v16 = vmax.f32 %v580_v4, 0.0  ;;  %v501_v17 = vmul.f32 %v499_v62, %v1210_v32  ;;  %v504_v18 = vmax.f32 %v502_v63, 0.0 }
  0x95   : > { %258 = vrot.lane.b32.xlu0 %v1042_v0, %s1127_s26  ;;  %319 = vrot.lane.b32.xlu1 %v1045_v1, %s1128_s27  ;;  %v1249_v20 = vpack.c.bf16 %v379_v10, %v379_v10  ;;  %v422_v21 = vadd.f32 %v420_v11, %v1219_v42  ;;  %v458_v22 = vadd.f32 %v456_v12, %v1219_v42  ;;  %v544_v28 = vrot.slane %v1237_v5, 6 }
  0x96   : > { %v546_v19 = vrot.slane %v1239_v6, 6  ;;  %v503_v23 = vadd.f32 %v501_v17, %v1219_v42  ;;  %v1055_v24 = vpack.c.bf16 %v504_v18, %v504_v18  ;;  %v1059_v25 = vpack.c.bf16 %v581_v7, %v581_v7 }
  0x97   : > { %v424_v26 = vmax.f32 %v422_v21, 0.0  ;;  %v1060_v29 = vpack.c.bf16 %v582_v16, %v582_v16  ;;  %v388_v35 = vrot.slane %v1249_v20, 5  ;;  %v460_v37 = vmax.f32 %v458_v22, 0.0 }
  0x98   : > { %v505_v30 = vmax.f32 %v503_v23, 0.0  ;;  %v515_v31 = vrot.slane %v1055_v24, 6  ;;  %v548_v34 = vrot.slane %v546_v19, 4  ;;  %v417_v40 = vunpack.c.h.bf16 %v1000_v33 }
  0x99   : > { %321 = vrot.lane.b32.xlu0 %v1046_v13, %s1128_s27  ;;  %391 = vrot.lane.b32.xlu1 %v386_v9, %s1127_s26  ;;  %v1264_v36 = vpack.c.bf16 %v424_v26, %v424_v26  ;;  %v589_v44 = vrot.slane %v1059_v25, 6  ;;  %v459_v47 = vmax.f32 %v457_v27, 0.0  ;;  %v390_v48 = vrot.slane %v388_v35, 4 }
  0x9a   : > { %v1056_v38 = vpack.c.bf16 %v505_v30, %v505_v30  ;;  %524 = vst.msk [vmem:[#allocation2 + $0x24] sm:$0xc] %vm523_vm3, %v515_v31  ;;  %v516_v45 = vrot.slane %v515_v31, 4  ;;  %v591_v49 = vrot.slane %v1060_v29, 6  ;;  %v1054_v51 = vpack.c.bf16 %v460_v37, %v460_v37 }
  0x9b   : > { %v433_v50 = vrot.slane %v1264_v36, 5  ;;  %v341_v54 = vunpack.c.l.bf16 %v339_v43  ;;  %v1053_v55 = vpack.c.bf16 %v459_v47, %v459_v47  ;;  %v278_v56 = vunpack.c.l.bf16 %v1217_v41 }
  0x9c   : > { %v517_v46 = vrot.slane %v1056_v38, 6  ;;  %v419_v58 = vmul.f32 %v417_v40, %v1197_v15  ;;  %v593_v60 = vrot.slane %v591_v49, 4  ;;  %v469_v62 = vrot.slane %v1054_v51, 5 }
  0x9d   : > { %549 = vrot.lane.b32.xlu0 %v544_v28, %s1127_s26  ;;  %553 = vrot.lane.b32.xlu1 %v548_v34, %s1127_s26  ;;  %v435_v61 = vrot.slane %v433_v50, 4  ;;  %v279_v63 = vunpack.c.l.bf16 %v987_v53  ;;  %v343_v0 = vmul.f32 %v341_v54, %v1210_v32  ;;  %v340_v1 = vunpack.c.l.bf16 %v1000_v33 }
  0x9e   : > { %v518_v52 = vsel %vm1270_vm4, %v516_v45, %v517_v46  ;;  %v519_v59 = vrot.slane %v517_v46, 4  ;;  %v590_v41 = vrot.slane %v589_v44, 4  ;;  %v467_v3 = vrot.slane %v1053_v55, 5 }
  0x9f   : > { %525 = vst.msk [vmem:[#allocation2 + $0x30] sm:$0xf] %vm1433_vm0, %v518_v52  ;;  %v421_v4 = vadd.f32 %v419_v58, %v1195_v14  ;;  %v345_v5 = vadd.f32 %v343_v0, %v1219_v42  ;;  %v471_v7 = vrot.slane %v469_v62, 4  ;;  %v280_v8 = vmul.f32 %v278_v56, %v1197_v15 }
  0xa0   : > { %527 = vst.msk [vmem:[#allocation2 + $0x3c] sm:$0x1] %vm526_vm5, %v519_v59  ;;  %v281_v10 = vmul.f32 %v279_v63, %v1210_v32  ;;  %v592_v11 = vsel %vm1270_vm4, %v590_v41, %v591_v49  ;;  %v342_v16 = vmul.f32 %v340_v1, %v1197_v15  ;;  %v545_v32 = vrot.slane %v544_v28, 4 }
  0xa1   : > { %594 = vrot.lane.b32.xlu0 %v589_v44, %s1129_s28  ;;  %395 = vrot.lane.b32.xlu1 %v390_v48, %s1127_s26  ;;  %v347_v12 = vmax.f32 %v345_v5, 0.0  ;;  %v468_v17 = vrot.slane %v467_v3, 4  ;;  %v423_v18 = vmax.f32 %v421_v4, 0.0  ;;  %v282_v22 = vadd.f32 %v280_v8, %v1195_v14 }
  0xa2   : > { %v283_v23 = vadd.f32 %v281_v10, %v1219_v42  ;;  %v344_v24 = vadd.f32 %v342_v16, %v1195_v14  ;;  %v547_v25 = vsel %vm1270_vm4, %v545_v32, %v546_v19  ;;  %v387_v42 = vrot.slane %v386_v9, 4 }
  0xa3   : > { %v1048_v21 = vpack.c.bf16 %v347_v12, %v347_v12  ;;  %v470_v26 = vsel %vm1302_vm9, %v468_v17, %v469_v62  ;;  %v1051_v28 = vpack.c.bf16 %v423_v18, %v423_v18  ;;  %v284_v29 = vmax.f32 %v282_v22, 0.0 }
  0xa4   : > { %v346_v15 = vmax.f32 %v344_v24, 0.0  ;;  %v285_v6 = vmax.f32 %v283_v23, 0.0  ;;  %v389_v19 = vsel %vm1302_vm9, %v387_v42, %v388_v35  ;;  %v1130_v57 = vmov 0.0  }
  0xa5   : > { %598 = vrot.lane.b32.xlu0 %v593_v60, %s1129_s28  ;;  %440 = vrot.lane.b32.xlu1 %v435_v61, %s1129_s28  ;;  %v359_v27 = vrot.slane %v1048_v21, 5  ;;  %v431_v33 = vrot.slane %v1051_v28, 5  ;;  %v1043_v9 = vpack.c.bf16 %v284_v29, %v284_v29  ;;  %v1440_v43 = vmov 0 }
  0xa6   : > { %v1047_v30 = vpack.c.bf16 %v346_v15, %v346_v15  ;;  %1068 = vmatprep.subr.bf16.mxu1 %v1130_v57  ;;  %v1044_v34 = vpack.c.bf16 %v285_v6, %v285_v6  ;;  %1074 = vmatprep.mubr.msk.bf16.mxu1 %vm1131_vm12, %v1130_v57  ;;  %v1441_v43 = vsel %vm1339_vm1, 4294967295, %v1440_v43  ;;  %vm272_vm3 = vcmask 260100   ;;  %vm566_vm12 = vmor %vm565_vm8, %vm564_vm7 }
  0xa7   : > { %v361_v14 = vrot.slane %v359_v27, 4  ;;  %v432_v35 = vrot.slane %v431_v33, 4  ;;  %vm273_vm4 = vmor %vm272_vm3, %vm271_vm2  ;;  %vm406_vm5 = vcmask 1044099   ;;  %vm603_vm3 = vcmask 912642  }
  0xa8   : > { %v357_v31 = vrot.slane %v1047_v30, 5  ;;  %vm606_vm8 = vcmask 909568  }
  0xa9   : > { %476 = vrot.lane.b32.xlu0 %v471_v7, %s1128_s27  ;;  %596 = vrot.lane.b32.xlu1 %v592_v11, %s1129_s28  ;;  %369 = vst.msk [vmem:[#allocation2 + $0x24] sm:$0x3] %vm368_vm10, %v361_v14  ;;  %v434_v38 = vsel %vm1302_vm9, %v432_v35, %v433_v50  ;;  %vm569_vm10 = vcmask 1041024   ;;  %v770_v35 = vlaneseq }
  0xaa   : > { %v358_v37 = vrot.slane %v357_v31, 4  ;;  %366 = vst.msk [vmem:[#allocation2 + $0xc] sm:$0x8] %vm365_vm11, %v357_v31  ;;  %vm570_vm11 = vcmask 258052  }
  0xab   : > { %vm571_vm2 = vmor %vm570_vm11, %vm569_vm10  ;;  %vm492_vm11 = vcmask 1042304  }
  0xac   : > { %v360_v20 = vsel %vm1302_vm9, %v358_v37, %v359_v27  ;;  %vm408_vm9 = vmor %vm407_vm6, %vm406_vm5  ;;  %vm613_vm6 = vcmask 1041280  }
  0xad   : > { %551 = vrot.lane.b32.xlu0 %v547_v25, %s1127_s26  ;;  %474 = vrot.lane.b32.xlu1 %v470_v26, %s1128_s27  ;;  %367 = vst.msk [vmem:[#allocation2 + $0x18] sm:$0xf] %vm1433_vm0, %v360_v20  ;;  %vm411_vm0 = vcmask 1042048   ;;  %vm610_vm5 = vmor %vm609_vm14, %vm608_vm13  ;;  %vm331_vm14 = vcmask 523268   ;;  %v617_v20 = vld [vmem:[%s1430_s2] sm:$0xf] }
  0xb1   : > { %393 = vrot.lane.b32.xlu0 %v389_v19, %s1127_s26  ;;  %472 = vrot.lane.b32.xlu1 %v467_v3, %s1128_s27 }
  0xb5   : > { %292 = vrot.lane.b32.xlu0 %v1043_v9, %s1129_s28  ;;  %294 = vrot.lane.b32.xlu1 %v1044_v34, %s1129_s28 }
  0xb9   : > { %438 = vrot.lane.b32.xlu0 %v434_v38, %s1129_s28  ;;  %v771_v38 = vand.u32 127, %v770_v35 }
  0xbd   : > { %436 = vrot.lane.b32.xlu0 %v431_v33, %s1129_s28 }
 0x103   : > { %v257_v39 = vpop.permute.xlu1 %256 }
 0x104   : > { %v260_v40 = vrot.slane %v257_v39, 4 }
 0x106   : > { %v263_v36 = vsel %vm262_vm15, %v260_v40, %v257_v39  ;;  %v773_v39 = vadd.s32 256, %v771_v38  ;;  %v772_v40 = vadd.s32 128, %v771_v38 }
 0x107   : > { %v259_v44 = vpop.permute.xlu0 %258  ;;  %v1344_v45 = vpop.permute.xlu1 %319  ;;  %270 = vst.msk [vmem:[#allocation2] sm:$0xff] %vm1339_vm1, %v263_v36  ;;  %vm614_vm1 = vcmask 520196  }
 0x108   : > { %v261_v46 = vrot.slane %v259_v44, 4  ;;  %vm615_vm10 = vmor %vm614_vm1, %vm613_vm6  ;;  %vm330_vm1 = vcmask 1044352   ;;  %vm335_vm6 = vcmask 522244   ;;  %v323_v16 = vrot.slane %v1344_v45, 4 }
 0x10a   : > { %v264_v47 = vsel %vm262_vm15, %v261_v46, %v259_v44 }
 0x10b   : > { %v1349_v48 = vpop.permute.xlu0 %321  ;;  %v392_v49 = vpop.permute.xlu1 %391  ;;  %274 = vst.msk [vmem:[#allocation2 + $0xc] sm:$0x77] %vm273_vm4, %v264_v47  ;;  %vm412_vm4 = vcmask 259076  }
 0x10c   : > { %v397_v50 = vrot.slane %v392_v49, 4  ;;  %vm413_vm7 = vmor %vm412_vm4, %vm411_vm0  ;;  %vm325_vm0 = vcmask 916480   ;;  %vm1444_vm4 = vnez %v1441_v43  ;;  %v324_v32 = vrot.slane %v1349_v48, 4 }
 0x10d   : > { %v326_v23 = vsel %vm325_vm0, %v323_v16, %v1344_v45  ;;  %v1392_v43 = vmul.u32.u64.low 3435973837, %v771_v38  ;;  %v1393_v36 = vmul.u32.u64.high 3435973837, %v771_v38, %v1392_v43 }
 0x10e   : > { %v400_v51 = vsel %vm262_vm15, %v397_v50, %v392_v49  ;;  %v327_v24 = vsel %vm325_vm0, %v324_v32, %v1349_v48  ;;  %v1398_v45 = vmul.u32.u64.low 3435973837, %v772_v40  ;;  %v1399_v46 = vmul.u32.u64.high 3435973837, %v772_v40, %v1398_v45 }
 0x10f   : > { %v550_v52 = vpop.permute.xlu0 %549  ;;  %v554_v53 = vpop.permute.xlu1 %553  ;;  %409 = vst.msk [vmem:[#allocation2 + $0xc] sm:$0x88] %vm408_vm9, %v400_v51  ;;  %vm448_vm9 = vcmask 910592   ;;  %v780_v47 = vshrl.u32 %v1393_v36, 3 }
 0x110   : > { %v555_v54 = vrot.slane %v550_v52, 4  ;;  %v557_v55 = vrot.slane %v554_v53, 4  ;;  %v791_v49 = vshrl.u32 %v1399_v46, 3 }
 0x111   : > { %v781_v50 = vmul.u32 10, %v780_v47 }
 0x112   : > { %v558_v56 = vsel %vm262_vm15, %v555_v54, %v550_v52  ;;  %v560_v58 = vsel %vm262_vm15, %v557_v55, %v554_v53  ;;  %v792_v52 = vmul.u32 10, %v791_v49 }
 0x113   : > { %567 = vst.msk [vmem:[#allocation2 + $0x24] sm:$0xcc] %vm566_vm12, %v558_v56  ;;  %v595_v59 = vpop.permute.xlu0 %594  ;;  %v396_v60 = vpop.permute.xlu1 %395  ;;  %vm493_vm12 = vcmask 521220   ;;  %v782_v53 = vsub.s32 %v771_v38, %v781_v50 }
 0x114   : > { %572 = vst.msk [vmem:[#allocation2 + $0x3c] sm:$0x11] %vm571_vm2, %v560_v58  ;;  %v399_v61 = vrot.slane %v396_v60, 4  ;;  %vm494_vm13 = vmor %vm493_vm12, %vm492_vm11  ;;  %vm298_vm2 = vcmask 912640   ;;  %vm679_vm11 = vcmask 1044480   ;;  %v793_v55 = vsub.s32 %v772_v40, %v792_v52 }
 0x115   : > { %604 = vst.msk [vmem:[#allocation2 + $0x28] sm:$0xc] %vm603_vm3, %v595_v59  ;;  %vm1359_vm3 = vmor %vm331_vm14, %vm330_vm1  ;;  %vm810_vm1 = vcmp.lt.s32.totalorder %v782_v53, 0  ;;  %v816_v58 = vadd.s32 10, %v782_v53 }
 0x116   : > { %611 = vst.msk [vmem:[#allocation2 + $0x28] sm:$0xcc] %vm610_vm5, %v1126_v2  ;;  %v402_v62 = vsel %vm262_vm15, %v399_v61, %v396_v60  ;;  %vm334_vm5 = vcmask 1043328   ;;  %v1116_v37 = vld [vmem:[#allocation2] ss:$12 sps:$4 sm:$0xff]   ;;  %v817_v59 = vadd.s32 10, %v793_v55 }
 0x117   : > { %v599_v63 = vpop.permute.xlu0 %598  ;;  %414 = vst.msk [vmem:[#allocation2 + $0x24] sm:$0x33] %vm413_vm7, %v402_v62  ;;  %v441_v0 = vpop.permute.xlu1 %440  ;;  %vm300_vm7 = vcmask 911616  }
 0x118   : > { %607 = vst.msk [vmem:[#allocation2 + $0x40] sm:$0x1] %vm606_vm8, %v599_v63  ;;  %vm336_vm8 = vmor %vm335_vm6, %vm334_vm5  ;;  %vm811_vm5 = vcmp.lt.s32.totalorder %v793_v55, 0 }
 0x119   : > { %449 = vst.msk [vmem:[#allocation2 + $0x28] sm:$0x3] %vm448_vm9, %v441_v0  ;;  %vm487_vm9 = vcmask 1044355  }
 0x11a   : > { %616 = vst.msk [vmem:[#allocation2 + $0x40] sm:$0x11] %vm615_vm10, %v1126_v2  ;;  %vm488_vm10 = vcmask 523271  }
 0x11b   : > { %v477_v1 = vpop.permute.xlu0 %476  ;;  %v597_v41 = vpop.permute.xlu1 %596  ;;  %vm489_vm12 = vmor %vm488_vm10, %vm487_vm9  ;;  %vm835_vm10 = vcmask 523264  }
 0x11c   : > { %v480_v3 = vrot.slane %v477_v1, 4 }
 0x11e   : > { %v483_v4 = vsel %vm325_vm0, %v480_v3, %v477_v1 }
 0x11f   : > { %495 = vst.msk [vmem:[#allocation2 + $0x28] sm:$0x33] %vm494_vm13, %v483_v4  ;;  %v552_v5 = vpop.permute.xlu0 %551  ;;  %v475_v7 = vpop.permute.xlu1 %474  ;;  %vm675_vm13 = vcmask 343040  }
 0x120   : > { %v556_v8 = vrot.slane %v552_v5, 4  ;;  %v479_v25 = vrot.slane %v475_v7, 4 }
 0x122   : > { %v559_v10 = vsel %vm262_vm15, %v556_v8, %v552_v5  ;;  %v482_v27 = vsel %vm325_vm0, %v479_v25, %v475_v7 }
 0x123   : > { %568 = vst.msk [vmem:[#allocation2 + $0x30] sm:$0xff] %vm1444_vm4, %v559_v10  ;;  %v394_v12 = vpop.permute.xlu0 %393  ;;  %v473_v13 = vpop.permute.xlu1 %472 }
 0x124   : > { %v398_v17 = vrot.slane %v394_v12, 4  ;;  %605 = vst.msk [vmem:[#allocation2 + $0x34] sm:$0xf] %vm298_vm2, %v597_v41 }
 0x125   : > { %612 = vst.msk [vmem:[#allocation2 + $0x34] sm:$0xff] %vm1359_vm3, %v1126_v2  ;;  %v478_v2 = vrot.slane %v473_v13, 4 }
 0x126   : > { %v401_v18 = vsel %vm262_vm15, %v398_v17, %v394_v12  ;;  %vm445_vm15 = vcmask 912643  }
 0x127   : > { %v293_v21 = vpop.permute.xlu0 %292  ;;  %v295_v22 = vpop.permute.xlu1 %294  ;;  %410 = vst.msk [vmem:[#allocation2 + $0x18] sm:$0xff] %vm1444_vm4, %v401_v18  ;;  %v481_v30 = vsel %vm325_vm0, %v478_v2, %v473_v13  ;;  %vm807_vm0 = vcmp.ne.s32.totalorder %v782_v53, 0  ;;  %vm808_vm4 = vcmp.ne.s32.totalorder %v793_v55, 0 }
 0x128   : > { %299 = vst.msk [vmem:[#allocation2 + $0x4] sm:$0xf] %vm298_vm2, %v293_v21 }
 0x129   : > { %301 = vst.msk [vmem:[#allocation2 + $0x10] sm:$0x7] %vm300_vm7, %v295_v22  ;;  %vm814_vm7 = vmand %vm811_vm5, %vm808_vm4 }
 0x12a   : > { %333 = vst.msk [vmem:[#allocation2 + $0x4] sm:$0xff] %vm1359_vm3, %v326_v23  ;;  %v1107_v42 = vld [vmem:[#allocation2 + $0x30] ss:$12 sps:$4 sm:$0x1f]   ;;  %v820_v62 = vsel %vm814_vm7, %v817_v59, %v793_v55 }
 0x12b   : > { %337 = vst.msk [vmem:[#allocation2 + $0x10] sm:$0x77] %vm336_vm8, %v327_v24  ;;  %v439_v26 = vpop.permute.xlu0 %438  ;;  %v681_v29 = vsel %vm679_vm11, %v1107_v42, 0  ;;  %vm823_vm9 = vcmp.lt.s32.totalorder %v820_v62, 8 }
 0x12c   : > { %447 = vst.msk [vmem:[#allocation2 + $0x1c] sm:$0xf] %vm298_vm2, %v439_v26  ;;  %v1105_v15 = vld [vmem:[#allocation2 + $0x34] ss:$12 sps:$4 sm:$0x1f]  }
 0x12d   : > { %491 = vst.msk [vmem:[#allocation2 + $0x1c] sm:$0xff] %vm1359_vm3, %v482_v27  ;;  %v1108_v28 = vld [vmem:[#allocation2 + $0x38] ss:$12 sps:$4 sm:$0x1f]   ;;  %1029 = vmatprep.subr.msk.bf16.mxu0 %vm679_vm11, %v1105_v15  ;;  %vm813_vm3 = vmand %vm810_vm1, %vm807_vm0  ;;  %vm863_vm0 = vcmask 392192   ;;  %vm881_vm1 = vcmask 130048  }
 0x12e   : > { %v687_v6 = vsel %vm679_vm11, %v1108_v28, 0  ;;  %700 = vmatpush1.bf16.msra.mxu0 %v681_v29  ;;  %v1112_v33 = vld [vmem:[#allocation2 + $0x18] ss:$12 sps:$4 sm:$0xff]   ;;  %v819_v61 = vsel %vm813_vm3, %v816_v58, %v782_v53  ;;  %vm1445_vm11 = vcmask 650240  }
 0x12f   : > { %v437_v14 = vpop.permute.xlu0 %436  ;;  %1069 = vmatpush3.bf16.msra.mxu1 %v687_v6 }
 0x130   : > { %446 = vst.msk [vmem:[#allocation2 + $0x10] sm:$0x8] %vm445_vm15, %v437_v14  ;;  %1070 = vmatprep.subr.bf16.mxu1 %v1130_v57  ;;  %vm822_vm15 = vcmp.lt.s32.totalorder %v819_v61, 8 }
 0x131   : > { %490 = vst.msk [vmem:[#allocation2 + $0x10] sm:$0x88] %vm489_vm12, %v481_v30  ;;  %vm840_vm12 = vcmask 7168  }
 0x134   : > { %v1109_v19 = vld [vmem:[#allocation2 + $0x1c] ss:$12 sps:$4 sm:$0xff]   ;;  %v1111_v31 = vld [vmem:[#allocation2 + $0x20] ss:$12 sps:$4 sm:$0xff]  }
 0x135   : > { %701 = vmatprep.subr.bf16.mxu0 %v1109_v19  ;;  %1071 = vmatpush3.bf16.msra.mxu1 %v1111_v31 }
 0x136   : > { %702 = vmatpush1.bf16.msra.mxu0 %v1112_v33  ;;  %1072 = vmatprep.subr.bf16.mxu1 %v1130_v57  ;;  %v1395_v57 = vmul.u32.u64.low 3435973837, %v773_v39  ;;  %v1396_v44 = vmul.u32.u64.high 3435973837, %v773_v39, %v1395_v57 }
 0x138   : > { %v1113_v9 = vld [vmem:[#allocation2 + $0x4] ss:$12 sps:$4 sm:$0xff]   ;;  %v1115_v34 = vld [vmem:[#allocation2 + $0x8] ss:$12 sps:$4 sm:$0xff]   ;;  %v802_v48 = vshrl.u32 %v1396_v44, 3 }
 0x139   : > { %703 = vmatprep.subr.bf16.mxu0 %v1113_v9  ;;  %1073 = vmatpush3.bf16.msra.mxu1 %v1115_v34 }
 0x13a   : > { %704 = vmatpush1.bf16.msra.mxu0 %v1116_v37  ;;  %v803_v51 = vmul.u32 10, %v802_v48 }
 0x13c   : > { %1075 = vmatmul.mubr.msk.bf16.vlgmr.msra.gmra.mxu1 %vm675_vm13, %v617_v20  ;;  %v804_v54 = vsub.s32 %v773_v39, %v803_v51 }
 0x13d   : > { %1030 = vmatmul.mubr.msk.bf16.vlgmr.msra.gmra.mxu0 %vm675_vm13, %v617_v20  ;;  %vm850_vm13 = vcmask 15368  }
 0x13e   : > { %vm809_vm14 = vcmp.ne.s32.totalorder %v804_v54, 0  ;;  %vm812_vm2 = vcmp.lt.s32.totalorder %v804_v54, 0  ;;  %v818_v56 = vadd.s32 10, %v804_v54 }
 0x13f   : > { %vm815_vm6 = vmand %vm812_vm2, %vm809_vm14 }
 0x140   : > { %v821_v60 = vsel %vm815_vm6, %v818_v56, %v804_v54  ;;  %vm1446_vm14 = vmmov %vm1445_vm11 }
 0x141   : > { %vm824_vm8 = vcmp.lt.s32.totalorder %v821_v60, 8  ;;  %vm1447_vm2 = vmmov %vm1445_vm11 }
 0x142   : > { %vm1448_vm3 = vmmov %vm1447_vm2 }
 0x1fc   : > { %v764_v63 = vpop.f32.mrf.mxu1 }
 0x1fd   : > { %v723_v0 = vpop.f32.mrf.mxu0  ;;  %v833_v1 = vsel %vm824_vm8, %v764_v63, 0.0 }
 0x1fe   : > { %v831_v41 = vsel %vm822_vm15, %v723_v0, 0.0  ;;  %v852_v3 = vpack.c.bf16 %v723_v0, %v723_v0  ;;  %v844_v4 = vmul.f32 %v833_v1, %v833_v1  ;;  %v1076_v5 = vpop.f32.mrf.mxu1  ;;  %v836_v10 = vsel %vm835_vm10, %v833_v1, 0.0 }
 0x1ff   : > { %v725_v7 = vpop.f32.mrf.mxu0  ;;  %v842_v11 = vmul.f32 %v831_v41, %v831_v41 }
 0x200   : > { %v832_v8 = vsel %vm823_vm9, %v725_v7, 0.0  ;;  %853 = vst.msk [vmem:[%s1408_s8] sm:$0xf] %vm1445_vm11, %v852_v3  ;;  %v767_v12 = vpop.f32.mrf.mxu1  ;;  %v846_v17 = vsel %vm835_vm10, %v844_v4, 0.0  ;;  %v1063_v25 = vpack.c.bf16 %v764_v63, %v725_v7  ;;  %v1062_v2 = vpack.c.bf16 %v725_v7, %v725_v7 }
 0x201   : > { %v727_v13 = vpop.f32.mrf.mxu0  ;;  %v834_v16 = vadd.f32 %v832_v8, %v831_v41  ;;  %v843_v32 = vmul.f32 %v832_v8, %v832_v8  ;;  %v1061_v26 = vpack.c.bf16 %v725_v7, %v723_v0 }
 0x202   : > { %v1077_v18 = vpop.f32.mrf.mxu1 }
 0x203   : > { %v728_v21 = vpop.f32.mrf.mxu0  ;;  %v837_v22 = vadd.f32 %v836_v10, %v834_v16  ;;  %v845_v23 = vadd.f32 %v843_v32, %v842_v11 }
 0x205   : > { %838 = vadd.xlane.f32.xlu1 %v837_v22  ;;  %v847_v24 = vadd.f32 %v846_v17, %v845_v23 }
 0x207   : > { %848 = vadd.xlane.f32.xlu0 %v847_v24 }
 0x216   : > { %878 = vrot.lane.b32.xlu1 %v1063_v25, %s1132_s9 }
 0x21a   : > { %869 = vrot.lane.b32.xlu1 %v1062_v2, %s1133_s10 }
 0x21d   : > { %860 = vrot.lane.b32.xlu0 %v1061_v26, %s1134_s11 }
 0x28e   : > { %v839_v27 = vpop.xlane.xlu1 %838 }
 0x28f   : > { %841 = vst.msk [vmem:[%s214_s17] sm:$0xff] %vm840_vm12, %v839_v27 }
 0x290   : > { %v849_v15 = vpop.xlane.xlu0 %848 }
 0x291   : > { %851 = vst.msk [vmem:[%s214_s17] sm:$0xff] %vm850_vm13, %v849_v15 }
 0x292   : > { %v879_v42 = vpop.permute.xlu1 %878 }
 0x293   : > { %v880_v14 = vrot.slane %v879_v42, 4 }
 0x294   : > { %v861_v28 = vpop.permute.xlu0 %860 }
 0x295   : > { %v862_v29 = vrot.slane %v861_v28, 4  ;;  %v882_v19 = vsel %vm881_vm1, %v879_v42, %v880_v14 }
 0x296   : > { %v870_v30 = vpop.permute.xlu1 %869  ;;  %1037 = vst.msk [vmem:[%s1408_s8 + $0xc] sm:$0xf] %vm1448_vm3, %v882_v19 }
 0x297   : > { %v864_v6 = vsel %vm863_vm0, %v861_v28, %v862_v29  ;;  %1035 = vst.msk [vmem:[%s1408_s8 + $0x8] sm:$0xf] %vm1447_vm2, %v870_v30 }
 0x298   : > { %1033 = vst.msk [vmem:[%s1408_s8 + $0x4] sm:$0xf] %vm1446_vm14, %v864_v6 }
 0x299 PF: > { %s15_s15 = sadd.s32 1, %s1123_s15  }
 0x29a   : > { %p12_p5 = scmp.ge.s32.totalorder %s15_s15, 4  }
 0x29c   :  { %14 = sbr.rel (!%p12_p5) target bundleno = 1 (0x1), region = 80 }

// kernel: r2plus1d_forward.17
= control target key start
LH: loop header
LB: loop body
LE: loop exit
PB: predicated region body
PF: predicated region fallthrough
CT: control target
= control target key end

     0   :  { %s388_s12 = smov 0   ;;  %s416_s0 = inlined_call_operand.vmem [shape: bf16[8,8,80], index: 0, kind: input, shape index: {}]   ;;  %s417_s1 = inlined_call_operand.vmem [shape: f32[8,2], index: 1, kind: input, shape index: {}]   ;;  %s418_s2 = inlined_call_operand.vmem [shape: bf16[8,8,80], index: 2, kind: input, shape index: {}]   ;;  %s419_s3 = inlined_call_operand.vmem [shape: bf16[8,8,80], index: 3, kind: output, shape index: {}]  }
   0x1 LB: > { %s315_s13 = sadd.s32 4294967295, %s364_s12   ;;  %p319_p0 = scmp.ge.s32.totalorder %s364_s12, 1  ;;  %s364_s12 = sphi %s388_s12, %s13_s12  }
   0x2   : > { %p149_p1 = scmp.lt.s32.totalorder %s364_s12, 3 }
   0x4   : > { %p150_p2 = pnand %p319_p0, %p149_p1 }
   0x5   : > { %s320_s16 = sshll.u32 (!%p150_p2), %s315_s13, 2 }
   0x6   : > { %153 = sbr.rel (%p150_p2) target bundleno = 152 (0x98), region = 32  ;;  %p179_p3 = scmp.lt.s32.totalorder (!%p150_p2), %s320_s16, 7 }
   0xb   : > { %v204_v0 = vld [vmem:[%s417_s1] sm:$0xff]  ;;  %v366_v1 = vmov 0   ;;  %v367_v2 = vmov 1   ;;  %s421_s16 = smov (!%p179_p3, %s320_s16), 7  ;;  %vm242_vm0 = vcmask 650240  }
   0xc   : > { %356 = vset.pattern.permute.xlu0 %v366_v1  ;;  %s399_s17 = sshll.u32 %s421_s16, 2 }
   0xd   : > { %207 = vperm.xlu0 %356, %v204_v0   ;;  %s182_s20 = scalar_lea.vmem %s416_s0, %s399_s17  ;;  %s188_s23 = scalar_lea.vmem %s418_s2, %s399_s17 }
   0xe   : > { %v329_v3 = vld [vmem:[%s182_s20] sm:$0xff]   ;;  %v344_v4 = vld [vmem:[%s182_s20 + $0x8] sm:$0xff]   ;;  %s194_s26 = scalar_lea.vmem %s419_s3, %s399_s17 }
   0xf   : > { %v330_v6 = vunpack.c.l.bf16 %v329_v3  ;;  %v331_v7 = vunpack.c.h.bf16 %v329_v3  ;;  %v334_v8 = vunpack.c.l.bf16 %v344_v4  ;;  %v335_v9 = vunpack.c.h.bf16 %v344_v4  ;;  %v337_v10 = vld [vmem:[%s188_s23] sm:$0xff]   ;;  %v345_v11 = vld [vmem:[%s188_s23 + $0x8] sm:$0xff]  }
  0x10   : > { %v338_v12 = vunpack.c.l.bf16 %v337_v10  ;;  %v339_v13 = vunpack.c.h.bf16 %v337_v10  ;;  %v342_v14 = vunpack.c.l.bf16 %v345_v11  ;;  %v343_v15 = vunpack.c.h.bf16 %v345_v11 }
  0x11   : > { %357 = vset.pattern.permute.xlu0 %v367_v2 }
  0x12   : > { %215 = vperm.xlu0 %357, %v204_v0  }
  0x88   : > { %v208_v5 = vpop.permute.xlu0 %207 }
  0x89   : > { %v210_v16 = vmul.f32 %v330_v6, %v208_v5  ;;  %v211_v17 = vmul.f32 %v331_v7, %v208_v5  ;;  %v212_v18 = vmul.f32 %v334_v8, %v208_v5  ;;  %v213_v19 = vmul.f32 %v335_v9, %v208_v5 }
  0x8d   : > { %v216_v20 = vpop.permute.xlu0 %215 }
  0x8e   : > { %v218_v21 = vadd.f32 %v216_v20, %v210_v16  ;;  %v219_v22 = vadd.f32 %v216_v20, %v211_v17  ;;  %v220_v23 = vadd.f32 %v216_v20, %v212_v18  ;;  %v221_v24 = vadd.f32 %v216_v20, %v213_v19 }
  0x90   : > { %v230_v25 = vadd.f32 %v338_v12, %v218_v21  ;;  %v231_v26 = vadd.f32 %v339_v13, %v219_v22  ;;  %v232_v27 = vadd.f32 %v342_v14, %v220_v23  ;;  %v233_v28 = vadd.f32 %v343_v15, %v221_v24 }
  0x92   : > { %v234_v29 = vmax.f32 %v230_v25, 0.0  ;;  %v235_v30 = vmax.f32 %v231_v26, 0.0  ;;  %v236_v31 = vmax.f32 %v232_v27, 0.0  ;;  %v237_v32 = vmax.f32 %v233_v28, 0.0 }
  0x94   : > { %v238_v33 = vpack.c.bf16 %v234_v29, %v234_v29  ;;  %v239_v34 = vpack.c.bf16 %v235_v30, %v235_v30  ;;  %v240_v35 = vpack.c.bf16 %v236_v31, %v236_v31  ;;  %v241_v36 = vpack.c.bf16 %v237_v32, %v237_v32 }
  0x96   : > { %243 = vst.msk [vmem:[%s194_s26] sm:$0xf] %vm242_vm0, %v238_v33  ;;  %244 = vst.msk [vmem:[%s194_s26 + $0x4] sm:$0xf] %vm242_vm0, %v239_v34 }
  0x97   : > { %245 = vst.msk [vmem:[%s194_s26 + $0x8] sm:$0xf] %vm242_vm0, %v240_v35  ;;  %246 = vst.msk [vmem:[%s194_s26 + $0xc] sm:$0xf] %vm242_vm0, %v241_v36 }
  0x98 PF: > { %s13_s12 = sadd.s32 1, %s364_s12  }
  0x99   : > { %p10_p4 = scmp.ge.s32.totalorder %s13_s12, 4  }
  0x9b   :  { %12 = sbr.rel (!%p10_p4) target bundleno = 1 (0x1), region = 65 }

// kernel: r2plus1d_forward.15
= control target key start
LH: loop header
LB: loop body
LE: loop exit
PB: predicated region body
PF: predicated region fallthrough
CT: control target
= control target key end

     0   :  { %s1252_s12 = smov 0   ;;  %s1546_s0 = inlined_call_operand.vmem [shape: bf16[8,8,110], index: 0, kind: input, shape index: {}]   ;;  %s1547_s1 = inlined_call_operand.vmem [shape: bf16[18,72], index: 1, kind: input, shape index: {}]   ;;  %s1548_s2 = inlined_call_operand.vmem [shape: bf16[8,18,80], index: 2, kind: output, shape index: {0}]   ;;  %s1549_s3 = inlined_call_operand.vmem [shape: f32[2,18,2], index: 3, kind: output, shape index: {1}]  }
   0x1 LB: > { %s1258_s13 = sadd.s32 4294967295, %s1191_s12   ;;  %p998_p0 = scmp.ge.s32.totalorder %s1191_s12, 1  ;;  %s1191_s12 = sphi %s1252_s12, %s14_s12  }
   0x2   : > { %p141_p1 = scmp.lt.s32.totalorder %s1191_s12, 3 }
   0x4   : > { %p142_p2 = pnand %p998_p0, %p141_p1 }
   0x5   : > { %s999_s14 = sshll.u32 (!%p142_p2), %s1258_s13, 2  ;;  %s1193_s19 = smov (!%p142_p2), 90  }
   0x6   : > { %145 = sbr.rel (%p142_p2) target bundleno = 697 (0x2b9), region = 28  ;;  %p172_p3 = scmp.lt.s32.totalorder (!%p142_p2), %s999_s14, 7 }
   0x7   : > { %s1194_s20 = smov (!%p142_p2), 58   ;;  %s1195_s21 = smov (!%p142_p2), 60  }
   0x8   : > { %s1196_s22 = smov (!%p142_p2), 106   ;;  %s1197_s23 = smov (!%p142_p2), 10  }
   0x9   : > { %s1198_s24 = smov (!%p142_p2), 59   ;;  %s1199_s25 = smov (!%p142_p2), 107  }
   0xa   : > { %s1200_s26 = smov (!%p142_p2), 108   ;;  %s1201_s27 = smov (!%p142_p2), 91  }
   0xb   : > { %s1567_s14 = smov (!%p172_p3, %s999_s14), 7  ;;  %s1202_s28 = smov 92   ;;  %vm191_vm0 = vcmask 650240   ;;  %v1311_v36 = vld [vmem:[%s1547_s1] sm:$0xff]   ;;  %vm568_vm1 = vcmask 588800   ;;  %v1228_v37 = vmov 0   ;;  %v684_v46 = vlaneseq }
   0xc   : > { %s1000_s15 = sshll.u32 %s1567_s14, 2  ;;  %s1203_s29 = smov 68   ;;  %617 = vmatprep.mubr.bf16.mxu0 %v1228_v37  ;;  %1105 = vmatprep.mubr.msk.bf16.mxu1 %vm568_vm1, %v1311_v36  ;;  %vm250_vm2 = vcmask 1044096   ;;  %vm251_vm3 = vcmask 261124   ;;  %vm322_vm4 = vcmask 474112   ;;  %vm391_vm6 = vcmask 1044352  }
   0xd   : > { %s1269_s18 = scalar_lea.vmem %s1546_s0, %s1000_s15  ;;  %s1204_s30 = smov 69   ;;  %vm1316_vm5 = vmor %vm251_vm3, %vm250_vm2  ;;  %vm392_vm7 = vcmask 523268   ;;  %vm463_vm8 = vcmask 736256   ;;  %vm332_vm9 = vcmask 912640   ;;  %vm304_vm11 = vcmask 490496  }
   0xe   : > { %v1030_v0 = vld [vmem:[%s1269_s18 + $0xc] sm:$0xf]  ;;  %v1012_v1 = vld [vmem:[%s1269_s18 + $0x4] sm:$0xf]  ;;  %v235_v3 = vld [vmem:[%s1269_s18] sm:$0xf] }
   0xf   : > { %460 = vrot.lane.b32.xlu1 %v1030_v0, %s1193_s19  ;;  %319 = vrot.lane.b32.xlu0 %v1012_v1, %s1194_s20  ;;  %v1010_v2 = vld [vmem:[%s1269_s18 + $0x4] sm:$0xf]  ;;  %v1021_v4 = vld [vmem:[%s1269_s18 + $0x8] sm:$0xf]  ;;  %s1205_s4 = smov 11   ;;  %s1206_s5 = smov 12   ;;  %vm1323_vm10 = vmor %vm392_vm7, %vm391_vm6 }
  0x10   : > { %v1011_v5 = vld [vmem:[%s1269_s18 + $0x4] sm:$0xf]  ;;  %v229_v6 = vld [vmem:[%s1269_s18] sm:$0xf]  ;;  %v1029_v8 = vld [vmem:[%s1269_s18 + $0xc] sm:$0xf] }
  0x11   : > { %v223_v7 = vld [vmem:[%s1269_s18] sm:$0xf]  ;;  %v1028_v9 = vld [vmem:[%s1269_s18 + $0xc] sm:$0xf]  ;;  %v1009_v10 = vld [vmem:[%s1269_s18 + $0x4] sm:$0xf] }
  0x12   : > { %v1008_v11 = vld [vmem:[%s1269_s18 + $0x4] sm:$0xf]  ;;  %v1020_v12 = vld [vmem:[%s1269_s18 + $0x8] sm:$0xf]  ;;  %v217_v14 = vld [vmem:[%s1269_s18] sm:$0xf] }
  0x13   : > { %301 = vrot.lane.b32.xlu1 %v1010_v2, %s1195_s21  ;;  %237 = vrot.lane.b32.xlu0 %v235_v3, %s1196_s22  ;;  %v1019_v13 = vld [vmem:[%s1269_s18 + $0x8] sm:$0xf]  ;;  %v211_v15 = vld [vmem:[%s1269_s18] sm:$0xf]  ;;  %s1207_s6 = smov 116   ;;  %s1208_s7 = smov 117  }
  0x14   : > { %v1027_v16 = vld [vmem:[%s1269_s18 + $0xc] sm:$0xf]  ;;  %s1209_s8 = smov 100   ;;  %s1210_s9 = smov 101   ;;  %v1007_v18 = vld [vmem:[%s1269_s18 + $0x4] sm:$0xf] }
  0x15   : > { %v1026_v17 = vld [vmem:[%s1269_s18 + $0xc] sm:$0xf]  ;;  %v1006_v19 = vld [vmem:[%s1269_s18 + $0x4] sm:$0xf]  ;;  %s1211_s10 = smov 70   ;;  %s1212_s11 = smov 78  }
  0x16   : > { %v1018_v20 = vld [vmem:[%s1269_s18 + $0x8] sm:$0xf]  ;;  %s1213_s15 = smov 20   ;;  %s1214_s16 = smov 21   ;;  %v205_v22 = vld [vmem:[%s1269_s18] sm:$0xf] }
  0x17   : > { %378 = vrot.lane.b32.xlu1 %v1021_v4, %s1197_s23  ;;  %310 = vrot.lane.b32.xlu0 %v1011_v5, %s1198_s24  ;;  %v1017_v21 = vld [vmem:[%s1269_s18 + $0x8] sm:$0xf]  ;;  %v199_v23 = vld [vmem:[%s1269_s18] sm:$0xf]  ;;  %s1215_s17 = smov 118   ;;  %s1216_s19 = smov 126  }
  0x18   : > { %v190_v24 = vld [vmem:[%s1269_s18] sm:$0xf]  ;;  %v1025_v25 = vld [vmem:[%s1269_s18 + $0xc] sm:$0xf]  ;;  %s1217_s20 = smov 102   ;;  %s1218_s21 = smov 110  }
  0x19   : > { %192 = vst.msk [vmem:[#allocation2] sm:$0xf] %vm191_vm0, %v190_v24  ;;  %v1024_v26 = vld [vmem:[%s1269_s18 + $0xc] sm:$0xf]  ;;  %v1005_v27 = vld [vmem:[%s1269_s18 + $0x4] sm:$0xf] }
  0x1a   : > { %v1004_v28 = vld [vmem:[%s1269_s18 + $0x4] sm:$0xf]  ;;  %s1219_s22 = smov 79   ;;  %s1220_s23 = smov 80   ;;  %v1016_v29 = vld [vmem:[%s1269_s18 + $0x8] sm:$0xf] }
  0x1b   : > { %231 = vrot.lane.b32.xlu1 %v229_v6, %s1199_s25  ;;  %225 = vrot.lane.b32.xlu0 %v223_v7, %s1200_s26  ;;  %v1015_v30 = vld [vmem:[%s1269_s18 + $0x8] sm:$0xf]  ;;  %s1221_s24 = smov 22   ;;  %s1222_s25 = smov 30   ;;  %v1022_v31 = vld [vmem:[%s1269_s18 + $0xc] sm:$0xf] }
  0x1c   : > { %v193_v32 = vld [vmem:[%s1269_s18] sm:$0xf]  ;;  %s1223_s26 = smov 112   ;;  %v1013_v33 = vld [vmem:[%s1269_s18 + $0x8] sm:$0xf]  ;;  %vm313_vm12 = vcmask 482304  }
  0x1d   : > { %v1023_v34 = vld [vmem:[%s1269_s18 + $0xc] sm:$0xf]  ;;  %v1014_v35 = vld [vmem:[%s1269_s18 + $0x8] sm:$0xf]  ;;  %vm575_vm13 = vcmask 1043456   ;;  %vm454_vm14 = vcmask 744448  }
  0x1e   : > { %vm445_vm15 = vcmask 752640   ;;  %vm295_vm2 = vcmask 556032   ;;  %vm286_vm3 = vcmask 564224   ;;  %vm427_vm6 = vcmask 826368   ;;  %p184_p4 = scmp.lt.s32.totalorder %s1258_s13, 1 }
  0x1f   : > { %451 = vrot.lane.b32.xlu1 %v1029_v8, %s1201_s27  ;;  %442 = vrot.lane.b32.xlu0 %v1028_v9, %s1202_s28  ;;  %s1224_s27 = smov 127   ;;  %s1225_s28 = smov 32   ;;  %vm277_vm7 = vcmask 572416  }
  0x20   : > { %s1569_s13 = smov (!%p184_p4, %s1258_s13), 1 }
  0x23   : > { %292 = vrot.lane.b32.xlu1 %v1009_v10, %s1203_s29  ;;  %283 = vrot.lane.b32.xlu0 %v1008_v11, %s1204_s30  ;;  %s1226_s29 = smov 111  }
  0x27   : > { %372 = vrot.lane.b32.xlu1 %v1020_v12, %s1205_s4  ;;  %366 = vrot.lane.b32.xlu0 %v1019_v13, %s1206_s5  ;;  %s1227_s5 = smov 31  }
  0x2b   : > { %219 = vrot.lane.b32.xlu1 %v217_v14, %s1207_s6  ;;  %213 = vrot.lane.b32.xlu0 %v211_v15, %s1208_s7  ;;  %s1110_s7 = smul.u32 12, %s1567_s14  ;;  %s1229_s14 = smov 96  }
  0x2f   : > { %433 = vrot.lane.b32.xlu1 %v1027_v16, %s1209_s8  ;;  %424 = vrot.lane.b32.xlu0 %v1026_v17, %s1210_s9 }
  0x33   : > { %274 = vrot.lane.b32.xlu1 %v1007_v18, %s1211_s10  ;;  %265 = vrot.lane.b32.xlu0 %v1006_v19, %s1212_s11  ;;  %s1401_s10 = scalar_lea.vmem %s1548_s2, %s1110_s7  ;;  %s1230_s11 = smov 48  }
  0x37   : > { %360 = vrot.lane.b32.xlu1 %v1018_v20, %s1213_s15  ;;  %354 = vrot.lane.b32.xlu0 %v1017_v21, %s1214_s16  ;;  %s1231_s15 = smov 16   ;;  %s1111_s16 = smul.u32 24, %s1569_s13 }
  0x3b   : > { %207 = vrot.lane.b32.xlu1 %v205_v22, %s1215_s17  ;;  %201 = vrot.lane.b32.xlu0 %v199_v23, %s1216_s19 }
  0x3f   : > { %415 = vrot.lane.b32.xlu1 %v1025_v25, %s1217_s20  ;;  %406 = vrot.lane.b32.xlu0 %v1024_v26, %s1218_s21  ;;  %s1519_s20 = scalar_lea.vmem %s1549_s3, %s1111_s16 }
  0x43   : > { %256 = vrot.lane.b32.xlu1 %v1005_v27, %s1219_s22  ;;  %244 = vrot.lane.b32.xlu0 %v1004_v28, %s1220_s23 }
  0x47   : > { %348 = vrot.lane.b32.xlu1 %v1016_v29, %s1221_s24  ;;  %342 = vrot.lane.b32.xlu0 %v1015_v30, %s1222_s25 }
  0x4b   : > { %385 = vrot.lane.b32.xlu1 %v1022_v31, %s1223_s26  ;;  %195 = vrot.lane.b32.xlu0 %v193_v32, %s1224_s27 }
  0x4f   : > { %329 = vrot.lane.b32.xlu1 %v1013_v33, %s1225_s28  ;;  %397 = vrot.lane.b32.xlu0 %v1023_v34, %s1226_s29 }
  0x53   : > { %336 = vrot.lane.b32.xlu0 %v1014_v35, %s1227_s5 }
  0x81   : > { %v461_v38 = vpop.permute.xlu1 %460  ;;  %v320_v39 = vpop.permute.xlu0 %319 }
  0x82   : > { %v321_v40 = vrot.slane %v320_v39, 4  ;;  %v462_v44 = vrot.slane %v461_v38, 4 }
  0x84   : > { %v323_v45 = vsel %vm322_vm4, %v321_v40, %v320_v39  ;;  %v464_v49 = vsel %vm463_vm8, %v462_v44, %v461_v38  ;;  %vm436_vm4 = vcmask 818176   ;;  %vm268_vm8 = vcmask 637952  }
  0x85   : > { %v302_v42 = vpop.permute.xlu1 %301  ;;  %v238_v43 = vpop.permute.xlu0 %237 }
  0x86   : > { %240 = vst.msk [vmem:[#allocation2 + $0x60] sm:$0xf] %vm191_vm0, %v238_v43  ;;  %v303_v50 = vrot.slane %v302_v42, 4 }
  0x87   : > { %325 = vst.msk [vmem:[#allocation2 + $0x60] sm:$0xff] %vm1316_vm5, %v323_v45 }
  0x88   : > { %v305_v54 = vsel %vm304_vm11, %v303_v50, %v302_v42  ;;  %vm247_vm11 = vcmask 654336  }
  0x89   : > { %v379_v47 = vpop.permute.xlu1 %378  ;;  %v311_v48 = vpop.permute.xlu0 %310 }
  0x8a   : > { %381 = vst.msk [vmem:[#allocation2 + $0x64] sm:$0xf] %vm332_vm9, %v379_v47  ;;  %v312_v51 = vrot.slane %v311_v48, 4 }
  0x8b   : > { %466 = vst.msk [vmem:[#allocation2 + $0x64] sm:$0xff] %vm1323_vm10, %v464_v49 }
  0x8c   : > { %v314_v55 = vsel %vm313_vm12, %v312_v51, %v311_v48  ;;  %vm418_vm12 = vcmask 834560  }
  0x8d   : > { %v232_v52 = vpop.permute.xlu1 %231  ;;  %v226_v53 = vpop.permute.xlu0 %225 }
  0x8e   : > { %234 = vst.msk [vmem:[#allocation2 + $0x54] sm:$0xf] %vm191_vm0, %v232_v52  ;;  %228 = vst.msk [vmem:[#allocation2 + $0x48] sm:$0xf] %vm191_vm0, %v226_v53 }
  0x8f   : > { %316 = vst.msk [vmem:[#allocation2 + $0x54] sm:$0xff] %vm1316_vm5, %v314_v55  ;;  %307 = vst.msk [vmem:[#allocation2 + $0x48] sm:$0xff] %vm1316_vm5, %v305_v54 }
  0x91   : > { %v452_v56 = vpop.permute.xlu1 %451  ;;  %v443_v57 = vpop.permute.xlu0 %442 }
  0x92   : > { %v486_v58 = vld [vmem:[#allocation2 + $0x60] sm:$0xff]  ;;  %v1166_v60 = vld [vmem:[#allocation2 + $0x68] ss:$0 sps:$4 sm:$0xff]   ;;  %v453_v2 = vrot.slane %v452_v56, 4  ;;  %v444_v3 = vrot.slane %v443_v57, 4 }
  0x93   : > { %v1046_v59 = vcombine.high %v486_v58, %v486_v58  ;;  %v1045_v61 = vcombine.low %v486_v58, %v486_v58  ;;  %1109 = vmatprep.subr.msk.bf16.mxu1 %vm575_vm13, %v1166_v60  ;;  %v583_v1 = vsel %vm575_vm13, %v1166_v60, 0 }
  0x94   : > { %1096 = vmatpush3.bf16.msra.mxu1 %v583_v1  ;;  %v455_v6 = vsel %vm454_vm14, %v453_v2, %v452_v56  ;;  %v446_v7 = vsel %vm445_vm15, %v444_v3, %v443_v57  ;;  %vm259_vm14 = vcmask 646144   ;;  %vm388_vm15 = vcmask 916480  }
  0x95   : > { %1048 = vmatprep.subr.msk.bf16.mxu0 %vm575_vm13, %v1046_v59  ;;  %v293_v62 = vpop.permute.xlu1 %292  ;;  %v284_v63 = vpop.permute.xlu0 %283  ;;  %v577_v0 = vsel %vm575_vm13, %v1045_v61, 0  ;;  %vm409_vm13 = vcmask 900096  }
  0x96   : > { %592 = vmatpush1.bf16.msra.mxu0 %v577_v0  ;;  %v294_v8 = vrot.slane %v293_v62, 4  ;;  %v285_v9 = vrot.slane %v284_v63, 4  ;;  %v1171_v18 = vld [vmem:[#allocation2 + $0x48] ss:$12 sps:$4 sm:$0xff]  }
  0x98   : > { %v296_v12 = vsel %vm295_vm2, %v294_v8, %v293_v62  ;;  %v287_v13 = vsel %vm286_vm3, %v285_v9, %v284_v63  ;;  %vm400_vm2 = vcmask 908288  }
  0x99   : > { %v373_v4 = vpop.permute.xlu1 %372  ;;  %v367_v5 = vpop.permute.xlu0 %366 }
  0x9a   : > { %375 = vst.msk [vmem:[#allocation2 + $0x58] sm:$0xf] %vm332_vm9, %v373_v4  ;;  %369 = vst.msk [vmem:[#allocation2 + $0x4c] sm:$0xf] %vm332_vm9, %v367_v5 }
  0x9b   : > { %457 = vst.msk [vmem:[#allocation2 + $0x58] sm:$0xff] %vm1323_vm10, %v455_v6  ;;  %448 = vst.msk [vmem:[#allocation2 + $0x4c] sm:$0xff] %vm1323_vm10, %v446_v7  ;;  %v1184_v6 = vld [vmem:[%s1547_s1 + $0x8] ss:$0 sps:$4 sm:$0x11]   ;;  %v685_v7 = vand.u32 127, %v684_v46 }
  0x9d   : > { %v220_v10 = vpop.permute.xlu1 %219  ;;  %v214_v11 = vpop.permute.xlu0 %213  ;;  %v687_v8 = vadd.s32 256, %v685_v7 }
  0x9e   : > { %222 = vst.msk [vmem:[#allocation2 + $0x3c] sm:$0xf] %vm191_vm0, %v220_v10  ;;  %216 = vst.msk [vmem:[#allocation2 + $0x30] sm:$0xf] %vm191_vm0, %v214_v11  ;;  %v686_v11 = vadd.s32 128, %v685_v7 }
  0x9f   : > { %298 = vst.msk [vmem:[#allocation2 + $0x3c] sm:$0xff] %vm1316_vm5, %v296_v12  ;;  %289 = vst.msk [vmem:[#allocation2 + $0x30] sm:$0xff] %vm1316_vm5, %v287_v13  ;;  %v1385_v9 = vmul.u32.u64.low 3435973837, %v687_v8  ;;  %v1386_v10 = vmul.u32.u64.high 3435973837, %v687_v8, %v1385_v9  ;;  %v1388_v12 = vmul.u32.u64.low 3435973837, %v685_v7  ;;  %v1389_v13 = vmul.u32.u64.high 3435973837, %v685_v7, %v1388_v12 }
  0xa1   : > { %v434_v14 = vpop.permute.xlu1 %433  ;;  %v425_v15 = vpop.permute.xlu0 %424 }
  0xa2   : > { %v1168_v16 = vld [vmem:[#allocation2 + $0x4c] ss:$12 sps:$4 sm:$0xff]   ;;  %v1170_v17 = vld [vmem:[#allocation2 + $0x50] ss:$12 sps:$4 sm:$0xff]   ;;  %v435_v21 = vrot.slane %v434_v14, 4  ;;  %v426_v22 = vrot.slane %v425_v15, 4 }
  0xa3   : > { %593 = vmatprep.subr.bf16.mxu0 %v1168_v16  ;;  %1097 = vmatprep.subr.bf16.mxu1 %v1170_v17 }
  0xa4   : > { %594 = vmatpush1.bf16.msra.mxu0 %v1171_v18  ;;  %1098 = vmatpush3.bf16.msra.mxu1 %v1170_v17  ;;  %v437_v25 = vsel %vm436_vm4, %v435_v21, %v434_v14  ;;  %v428_v26 = vsel %vm427_vm6, %v426_v22, %v425_v15  ;;  %v1391_v14 = vmul.u32.u64.low 3435973837, %v686_v11  ;;  %v1392_v15 = vmul.u32.u64.high 3435973837, %v686_v11, %v1391_v14 }
  0xa5   : > { %v275_v19 = vpop.permute.xlu1 %274  ;;  %v266_v20 = vpop.permute.xlu0 %265 }
  0xa6   : > { %v276_v27 = vrot.slane %v275_v19, 4  ;;  %v267_v28 = vrot.slane %v266_v20, 4  ;;  %v1175_v39 = vld [vmem:[#allocation2 + $0x30] ss:$12 sps:$4 sm:$0xff]   ;;  %v705_v17 = vshrl.u32 %v1392_v15, 3 }
  0xa8   : > { %v278_v31 = vsel %vm277_vm7, %v276_v27, %v275_v19  ;;  %v269_v32 = vsel %vm268_vm8, %v267_v28, %v266_v20  ;;  %v706_v20 = vmul.u32 10, %v705_v17 }
  0xa9   : > { %v361_v23 = vpop.permute.xlu1 %360  ;;  %v355_v24 = vpop.permute.xlu0 %354 }
  0xaa   : > { %363 = vst.msk [vmem:[#allocation2 + $0x40] sm:$0xf] %vm332_vm9, %v361_v23  ;;  %357 = vst.msk [vmem:[#allocation2 + $0x34] sm:$0xf] %vm332_vm9, %v355_v24  ;;  %v707_v22 = vsub.s32 %v686_v11, %v706_v20 }
  0xab   : > { %439 = vst.msk [vmem:[#allocation2 + $0x40] sm:$0xff] %vm1323_vm10, %v437_v25  ;;  %430 = vst.msk [vmem:[#allocation2 + $0x34] sm:$0xff] %vm1323_vm10, %v428_v26 }
  0xac   : > { %vm722_vm4 = vcmp.ne.s32.totalorder %v707_v22, 0  ;;  %vm725_vm6 = vcmp.lt.s32.totalorder %v707_v22, 0 }
  0xad   : > { %v208_v29 = vpop.permute.xlu1 %207  ;;  %v202_v30 = vpop.permute.xlu0 %201  ;;  %vm1422_vm8 = vmand %vm725_vm6, %vm722_vm4  ;;  %vm777_vm4 = vcmask 1024   ;;  %vm808_vm6 = vcmask 9224  }
  0xae   : > { %210 = vst.msk [vmem:[#allocation2 + $0x24] sm:$0xf] %vm191_vm0, %v208_v29  ;;  %204 = vst.msk [vmem:[#allocation2 + $0x18] sm:$0xf] %vm191_vm0, %v202_v30 }
  0xaf   : > { %280 = vst.msk [vmem:[#allocation2 + $0x24] sm:$0xff] %vm1316_vm5, %v278_v31  ;;  %271 = vst.msk [vmem:[#allocation2 + $0x18] sm:$0xff] %vm1316_vm5, %v269_v32 }
  0xb1   : > { %v416_v33 = vpop.permute.xlu1 %415  ;;  %v407_v34 = vpop.permute.xlu0 %406 }
  0xb2   : > { %v1172_v35 = vld [vmem:[#allocation2 + $0x34] ss:$12 sps:$4 sm:$0xff]   ;;  %v1174_v38 = vld [vmem:[#allocation2 + $0x38] ss:$12 sps:$4 sm:$0xff]   ;;  %v417_v43 = vrot.slane %v416_v33, 4  ;;  %v408_v44 = vrot.slane %v407_v34, 4 }
  0xb3   : > { %595 = vmatprep.subr.bf16.mxu0 %v1172_v35  ;;  %1099 = vmatprep.subr.bf16.mxu1 %v1174_v38  ;;  %v731_v35 = vadd.s32 10, %v707_v22 }
  0xb4   : > { %596 = vmatpush1.bf16.msra.mxu0 %v1175_v39  ;;  %1100 = vmatpush3.bf16.msra.mxu1 %v1174_v38  ;;  %v419_v50 = vsel %vm418_vm12, %v417_v43, %v416_v33  ;;  %v410_v51 = vsel %vm409_vm13, %v408_v44, %v407_v34  ;;  %vm765_vm12 = vcmask 1041408  }
  0xb5   : > { %v257_v40 = vpop.permute.xlu1 %256  ;;  %v245_v42 = vpop.permute.xlu0 %244 }
  0xb6   : > { %v246_v45 = vrot.slane %v245_v42, 4  ;;  %v258_v52 = vrot.slane %v257_v40, 4 }
  0xb8   : > { %v248_v47 = vsel %vm247_vm11, %v246_v45, %v245_v42  ;;  %v260_v55 = vsel %vm259_vm14, %v258_v52, %v257_v40  ;;  %vm825_vm14 = vcmask 647168  }
  0xb9   : > { %v349_v48 = vpop.permute.xlu1 %348  ;;  %v343_v49 = vpop.permute.xlu0 %342  ;;  %253 = vst.msk [vmem:[#allocation2] sm:$0xff] %vm1316_vm5, %v248_v47 }
  0xba   : > { %351 = vst.msk [vmem:[#allocation2 + $0x28] sm:$0xf] %vm332_vm9, %v349_v48  ;;  %345 = vst.msk [vmem:[#allocation2 + $0x1c] sm:$0xf] %vm332_vm9, %v343_v49  ;;  %v734_v49 = vsel %vm1422_vm8, %v731_v35, %v707_v22 }
  0xbb   : > { %421 = vst.msk [vmem:[#allocation2 + $0x28] sm:$0xff] %vm1323_vm10, %v419_v50  ;;  %412 = vst.msk [vmem:[#allocation2 + $0x1c] sm:$0xff] %vm1323_vm10, %v410_v51 }
  0xbd   : > { %v386_v53 = vpop.permute.xlu1 %385  ;;  %v196_v54 = vpop.permute.xlu0 %195 }
  0xbe   : > { %v387_v56 = vrot.slane %v386_v53, 4  ;;  %198 = vst.msk [vmem:[#allocation2 + $0xc] sm:$0xf] %vm191_vm0, %v196_v54 }
  0xbf   : > { %262 = vst.msk [vmem:[#allocation2 + $0xc] sm:$0xff] %vm1316_vm5, %v260_v55 }
  0xc0   : > { %v389_v57 = vsel %vm388_vm15, %v387_v56, %v386_v53  ;;  %vm769_vm15 = vcmask 517120  }
  0xc1   : > { %v330_v58 = vpop.permute.xlu1 %329  ;;  %v398_v59 = vpop.permute.xlu0 %397 }
  0xc2   : > { %333 = vst.msk [vmem:[#allocation2 + $0x4] sm:$0xf] %vm332_vm9, %v330_v58  ;;  %v399_v60 = vrot.slane %v398_v59, 4  ;;  %v474_v61 = vld [vmem:[#allocation2 + $0x18] sm:$0xff]  ;;  %v476_v62 = vld [vmem:[#allocation2 + $0x24] sm:$0xff] }
  0xc3   : > { %v1176_v63 = vld [vmem:[#allocation2 + $0x1c] ss:$12 sps:$4 sm:$0xff]   ;;  %394 = vst.msk [vmem:[#allocation2 + $0x4] sm:$0xff] %vm1323_vm10, %v389_v57  ;;  %v1178_v0 = vld [vmem:[#allocation2 + $0x20] ss:$12 sps:$4 sm:$0xff]   ;;  %v1036_v1 = vcombine.low %v474_v61, %v476_v62 }
  0xc4   : > { %597 = vmatprep.subr.bf16.mxu0 %v1176_v63  ;;  %1101 = vmatprep.subr.bf16.mxu1 %v1178_v0  ;;  %v401_v41 = vsel %vm400_vm2, %v399_v60, %v398_v59  ;;  %vm1457_vm2 = vcmp.lt.s32.totalorder %v734_v49, 8 }
  0xc5   : > { %v337_v2 = vpop.permute.xlu0 %336  ;;  %598 = vmatpush1.bf16.msra.mxu0 %v1036_v1  ;;  %1102 = vmatpush3.bf16.msra.mxu1 %v1178_v0 }
  0xc6   : > { %339 = vst.msk [vmem:[#allocation2 + $0x10] sm:$0xf] %vm332_vm9, %v337_v2  ;;  %v1182_v5 = vld [vmem:[#allocation2] ss:$12 sps:$4 sm:$0xff]  }
  0xc7   : > { %403 = vst.msk [vmem:[#allocation2 + $0x10] sm:$0xff] %vm1323_vm10, %v401_v41 }
  0xce   : > { %v1179_v3 = vld [vmem:[#allocation2 + $0x4] ss:$12 sps:$4 sm:$0xff]   ;;  %v1181_v4 = vld [vmem:[#allocation2 + $0x8] ss:$12 sps:$4 sm:$0xff]  }
  0xcf   : > { %599 = vmatprep.subr.bf16.mxu0 %v1179_v3  ;;  %1103 = vmatprep.subr.bf16.mxu1 %v1181_v4 }
  0xd0   : > { %600 = vmatpush1.bf16.msra.mxu0 %v1182_v5  ;;  %1104 = vmatpush3.bf16.msra.mxu1 %v1181_v4 }
  0xd3   : > { %1049 = vmatmul.mubr.msk.bf16.vlgmr.msra.gmra.mxu0 %vm568_vm1, %v1311_v36  ;;  %1106 = vmatmul.mubr.msk.bf16.vlgmr.msra.gmra.mxu1 %vm568_vm1, %v1184_v6  ;;  %v716_v36 = vshrl.u32 %v1386_v10, 3 }
  0xd4   : > { %627 = vmatprep.mubr.bf16.mxu0 %v1228_v37  ;;  %v694_v37 = vshrl.u32 %v1389_v13, 3 }
  0xd5   : > { %v717_v16 = vmul.u32 10, %v716_v36 }
  0xd6   : > { %v695_v18 = vmul.u32 10, %v694_v37 }
  0xd7   : > { %v718_v19 = vsub.s32 %v687_v8, %v717_v16 }
  0xd8   : > { %v696_v21 = vsub.s32 %v685_v7, %v695_v18 }
  0xd9   : > { %vm726_vm5 = vcmp.lt.s32.totalorder %v718_v19, 0  ;;  %v732_v23 = vadd.s32 10, %v718_v19 }
  0xda   : > { %vm721_vm9 = vcmp.ne.s32.totalorder %v696_v21, 0  ;;  %vm724_vm10 = vcmp.lt.s32.totalorder %v696_v21, 0  ;;  %v730_v26 = vadd.s32 10, %v696_v21 }
  0xdb   : > { %1050 = vmatmul.mubr.msk.bf16.gmra.mxu0 %vm568_vm1, %v1184_v6  ;;  %vm723_vm1 = vcmp.ne.s32.totalorder %v718_v19, 0  ;;  %vm1413_vm7 = vmand %vm724_vm10, %vm721_vm9  ;;  %vm892_vm9 = vcmask 130048   ;;  %vm774_vm10 = vcmask 7168  }
  0xdc   : > { %vm1405_vm3 = vmand %vm726_vm5, %vm723_vm1  ;;  %v733_v40 = vsel %vm1413_vm7, %v730_v26, %v696_v21  ;;  %vm755_vm1 = vcmask 523264   ;;  %vm846_vm5 = vcmask 392192  }
  0xdd   : > { %v735_v31 = vsel %vm1405_vm3, %v732_v23, %v718_v19  ;;  %vm1443_vm13 = vcmp.lt.s32.totalorder %v733_v40, 8  ;;  %vm805_vm3 = vcmask 15368  }
  0xde   : > { %vm1430_vm11 = vcmp.lt.s32.totalorder %v735_v31, 8 }
 0x193   : > { %v1403_v24 = vpop.f32.mrf.mxu0  ;;  %v1411_v28 = vpop.f32.mrf.mxu1 }
 0x194   : > { %v1076_v27 = vpack.c.bf16 %v1403_v24, %v1403_v24  ;;  %v753_v47 = vsel %vm1430_vm11, %v1411_v28, 0.0  ;;  %v745_v13 = vsel %vm1443_vm13, %v1403_v24, 0.0 }
 0x195   : > { %v621_v30 = vpop.f32.mrf.mxu0  ;;  %v670_v32 = vpop.f32.mrf.mxu1  ;;  %v787_v54 = vmul.f32 %v753_v47, %v753_v47  ;;  %v770_v61 = vsel %vm769_vm15, %v753_v47, 0.0  ;;  %v779_v29 = vmul.f32 %v745_v13, %v745_v13 }
 0x196   : > { %823 = vst.msk [vmem:[%s1401_s10] sm:$0xf] %vm191_vm0, %v1076_v27  ;;  %v1082_v33 = vpack.c.bf16 %v621_v30, %v621_v30  ;;  %v1079_v34 = vpack.c.bf16 %v621_v30, %v1403_v24  ;;  %v1085_v48 = vpack.c.bf16 %v670_v32, %v621_v30  ;;  %v746_v10 = vsel %vm1457_vm2, %v621_v30, 0.0 }
 0x197   : > { %v623_v38 = vpop.f32.mrf.mxu0  ;;  %v1108_v43 = vpop.f32.mrf.mxu1  ;;  %v801_v4 = vsel %vm769_vm15, %v787_v54, 0.0  ;;  %v747_v11 = vsel %vm1430_vm11, %v670_v32, 0.0  ;;  %v754_v36 = vadd.f32 %v746_v10, %v745_v13  ;;  %v780_v26 = vmul.f32 %v746_v10, %v746_v10 }
 0x198   : > { %v1077_v42 = vpack.c.bf16 %v623_v38, %v623_v38  ;;  %860 = vrot.lane.b32.xlu1 %v1082_v33, %s1229_s14  ;;  %837 = vrot.lane.b32.xlu0 %v1079_v34, %s1230_s11  ;;  %v748_v12 = vsel %vm1443_vm13, %v623_v38, 0.0  ;;  %v756_v37 = vsel %vm755_vm1, %v747_v11, 0.0  ;;  %v781_v27 = vmul.f32 %v747_v11, %v747_v11 }
 0x199   : > { %v1434_v45 = vpop.f32.mrf.mxu0  ;;  %v673_v7 = vpop.f32.mrf.mxu1  ;;  %v757_v17 = vadd.f32 %v756_v37, %v754_v36  ;;  %v782_v23 = vmul.f32 %v748_v12, %v748_v12  ;;  %v788_v31 = vadd.f32 %v780_v26, %v779_v29 }
 0x19a   : > { %824 = vst.msk [vmem:[%s1401_s10 + $0x4] sm:$0xf] %vm191_vm0, %v1077_v42  ;;  %v749_v8 = vsel %vm1457_vm2, %v1434_v45, 0.0  ;;  %v750_v9 = vsel %vm1430_vm11, %v673_v7, 0.0  ;;  %v1080_v18 = vpack.c.bf16 %v1434_v45, %v623_v38  ;;  %v1086_v19 = vpack.c.bf16 %v673_v7, %v1434_v45 }
 0x19b   : > { %v1447_v51 = vpop.f32.mrf.mxu0  ;;  %v760_v14 = vadd.f32 %v749_v8, %v748_v12  ;;  %v761_v15 = vsel %vm755_vm1, %v750_v9, 0.0  ;;  %v783_v21 = vmul.f32 %v749_v8, %v749_v8  ;;  %v784_v22 = vmul.f32 %v750_v9, %v750_v9 }
 0x19c   : > { %883 = vrot.lane.b32.xlu0 %v1085_v48, %s1231_s15  ;;  %v751_v52 = vsel %vm1443_vm13, %v1447_v51, 0.0  ;;  %v1078_v53 = vpack.c.bf16 %v1447_v51, %v1447_v51  ;;  %v1083_v33 = vpack.c.bf16 %v1434_v45, %v1434_v45 }
 0x19d   : > { %v785_v55 = vmul.f32 %v751_v52, %v751_v52  ;;  %v1455_v56 = vpop.f32.mrf.mxu0  ;;  %v766_v58 = vsel %vm765_vm12, %v751_v52, 0.0  ;;  %v762_v16 = vadd.f32 %v761_v15, %v760_v14  ;;  %v793_v24 = vadd.f32 %v783_v21, %v782_v23 }
 0x19e   : > { %v752_v59 = vsel %vm1457_vm2, %v1455_v56, 0.0  ;;  %826 = vst.msk [vmem:[%s1401_s10 + $0x8] sm:$0x1] %vm825_vm14, %v1078_v53  ;;  %v1081_v63 = vpack.c.bf16 %v1455_v56, %v1447_v51  ;;  %v1087_v20 = vpack.c.bf16 %v1411_v28, %v1455_v56  ;;  %v794_v25 = vsel %vm755_vm1, %v784_v22, 0.0 }
 0x19f   : > { %v767_v60 = vsel %vm765_vm12, %v752_v59, 0.0  ;;  %v633_v62 = vpop.f32.mrf.mxu0  ;;  %v786_v0 = vmul.f32 %v752_v59, %v752_v59  ;;  %v798_v2 = vsel %vm765_vm12, %v785_v55, 0.0  ;;  %v795_v30 = vadd.f32 %v794_v25, %v793_v24 }
 0x1a0   : > { %v768_v1 = vadd.f32 %v767_v60, %v766_v58  ;;  %v789_v28 = vsel %vm755_vm1, %v781_v27, 0.0  ;;  %v1084_v44 = vpack.c.bf16 %v1455_v56, %v1455_v56 }
 0x1a1   : > { %v634_v41 = vpop.f32.mrf.mxu0  ;;  %v799_v3 = vsel %vm765_vm12, %v786_v0, 0.0  ;;  %v790_v32 = vadd.f32 %v789_v28, %v788_v31 }
 0x1a2   : > { %v771_v5 = vadd.f32 %v770_v61, %v768_v1  ;;  %v800_v6 = vadd.f32 %v799_v3, %v798_v2 }
 0x1a4   : > { %v802_v46 = vadd.f32 %v801_v4, %v800_v6 }
 0x1bb   : > { %763 = vadd.xlane.f32.xlu0 %v762_v16 }
 0x1bc   : > { %758 = vadd.xlane.f32.xlu1 %v757_v17 }
 0x1cd   : > { %839 = vrot.lane.b32.xlu1 %v1080_v18, %s1230_s11 }
 0x1d1   : > { %885 = vrot.lane.b32.xlu1 %v1086_v19, %s1231_s15  ;;  %887 = vrot.lane.b32.xlu0 %v1087_v20, %s1231_s15 }
 0x1f0   : > { %796 = vadd.xlane.f32.xlu0 %v795_v30 }
 0x1f4   : > { %772 = vadd.xlane.f32.xlu0 %v771_v5 }
 0x1f5   : > { %791 = vadd.xlane.f32.xlu1 %v790_v32 }
 0x206   : > { %841 = vrot.lane.b32.xlu1 %v1081_v63, %s1230_s11 }
 0x20a   : > { %v838_v34 = vpop.permute.xlu0 %837  ;;  %862 = vrot.lane.b32.xlu0 %v1083_v33, %s1229_s14  ;;  %v861_v39 = vpop.permute.xlu1 %860 }
 0x20b   : > { %v843_v35 = vrot.slane %v838_v34, 4  ;;  %1065 = vst.msk [vmem:[%s1401_s10 + $0x18] sm:$0xf] %vm191_vm0, %v861_v39 }
 0x20d   : > { %v847_v38 = vsel %vm846_vm5, %v838_v34, %v843_v35 }
 0x20e   : > { %1059 = vst.msk [vmem:[%s1401_s10 + $0xc] sm:$0xf] %vm191_vm0, %v847_v38  ;;  %v884_v40 = vpop.permute.xlu0 %883 }
 0x20f   : > { %v889_v42 = vrot.slane %v884_v40, 4 }
 0x211   : > { %v893_v43 = vsel %vm892_vm9, %v884_v40, %v889_v42 }
 0x212   : > { %1071 = vst.msk [vmem:[%s1401_s10 + $0x24] sm:$0xf] %vm191_vm0, %v893_v43 }
 0x22a   : > { %803 = vadd.xlane.f32.xlu1 %v802_v46 }
 0x23b   : > { %864 = vrot.lane.b32.xlu1 %v1084_v44, %s1229_s14 }
 0x244   : > { %v764_v45 = vpop.xlane.xlu0 %763 }
 0x245   : > { %776 = vst.msk [vmem:[%s1519_s20 + $0x8] sm:$0xff] %vm774_vm10, %v764_v45  ;;  %v759_v47 = vpop.xlane.xlu1 %758 }
 0x246   : > { %775 = vst.msk [vmem:[%s1519_s20] sm:$0xff] %vm774_vm10, %v759_v47 }
 0x248   : > { %v888_v48 = vpop.permute.xlu0 %887 }
 0x249   : > { %v891_v49 = vrot.slane %v888_v48, 4  ;;  %v840_v50 = vpop.permute.xlu1 %839 }
 0x24a   : > { %v844_v51 = vrot.slane %v840_v50, 4 }
 0x24b   : > { %v895_v52 = vsel %vm892_vm9, %v888_v48, %v891_v49 }
 0x24c   : > { %v848_v53 = vsel %vm846_vm5, %v840_v50, %v844_v51  ;;  %1073 = vst.msk [vmem:[%s1401_s10 + $0x2c] sm:$0x1] %vm825_vm14, %v895_v52 }
 0x24d   : > { %1060 = vst.msk [vmem:[%s1401_s10 + $0x10] sm:$0xf] %vm191_vm0, %v848_v53  ;;  %v886_v55 = vpop.permute.xlu1 %885 }
 0x24e   : > { %v890_v57 = vrot.slane %v886_v55, 4 }
 0x250   : > { %v894_v60 = vsel %vm892_vm9, %v886_v55, %v890_v57 }
 0x251   : > { %1072 = vst.msk [vmem:[%s1401_s10 + $0x28] sm:$0xf] %vm191_vm0, %v894_v60 }
 0x279   : > { %v797_v54 = vpop.xlane.xlu0 %796 }
 0x27a   : > { %807 = vst.msk [vmem:[%s1519_s20 + $0x8] sm:$0xff] %vm805_vm3, %v797_v54 }
 0x27d   : > { %v773_v56 = vpop.xlane.xlu0 %772 }
 0x27e   : > { %778 = vst.msk [vmem:[%s1519_s20 + $0x10] sm:$0x3] %vm777_vm4, %v773_v56  ;;  %v792_v58 = vpop.xlane.xlu1 %791 }
 0x27f   : > { %806 = vst.msk [vmem:[%s1519_s20] sm:$0xff] %vm805_vm3, %v792_v58 }
 0x281   : > { %v863_v59 = vpop.permute.xlu0 %862 }
 0x282   : > { %1066 = vst.msk [vmem:[%s1401_s10 + $0x1c] sm:$0xf] %vm191_vm0, %v863_v59  ;;  %v842_v61 = vpop.permute.xlu1 %841 }
 0x283   : > { %v845_v62 = vrot.slane %v842_v61, 4 }
 0x285   : > { %v849_v63 = vsel %vm846_vm5, %v842_v61, %v845_v62 }
 0x286   : > { %1061 = vst.msk [vmem:[%s1401_s10 + $0x14] sm:$0x1] %vm825_vm14, %v849_v63 }
 0x2b3   : > { %v804_v0 = vpop.xlane.xlu1 %803 }
 0x2b4   : > { %809 = vst.msk [vmem:[%s1519_s20 + $0x10] sm:$0x3] %vm808_vm6, %v804_v0 }
 0x2b7   : > { %v865_v1 = vpop.permute.xlu1 %864 }
 0x2b8   : > { %1067 = vst.msk [vmem:[%s1401_s10 + $0x20] sm:$0x1] %vm825_vm14, %v865_v1 }
 0x2b9 PF: > { %s14_s12 = sadd.s32 1, %s1191_s12  }
 0x2ba   : > { %p11_p5 = scmp.ge.s32.totalorder %s14_s12, 4  }
 0x2bc   :  { %13 = sbr.rel (!%p11_p5) target bundleno = 1 (0x1), region = 76 }

// kernel: r2plus1d_forward.16
= control target key start
LH: loop header
LB: loop body
LE: loop exit
PB: predicated region body
PF: predicated region fallthrough
CT: control target
= control target key end

     0   :  { %s1364_s15 = smov 0   ;;  %s1712_s0 = inlined_call_operand.vmem [shape: bf16[8,18,80], index: 0, kind: input, shape index: {}]   ;;  %s1713_s1 = inlined_call_operand.vmem [shape: f32[18,2], index: 1, kind: input, shape index: {}]   ;;  %s1714_s2 = inlined_call_operand.vmem [shape: bf16[8,54], index: 2, kind: input, shape index: {}]   ;;  %s1715_s3 = inlined_call_operand.vmem [shape: bf16[8,8,80], index: 3, kind: output, shape index: {0}]   ;;  %s1716_s4 = inlined_call_operand.vmem [shape: f32[2,8,2], index: 4, kind: output, shape index: {1}]  }
   0x1 LB: > { %s1370_s16 = sadd.s32 4294967295, %s1327_s15   ;;  %p1121_p0 = scmp.ge.s32.totalorder %s1327_s15, 1  ;;  %s1327_s15 = sphi %s1364_s15, %s15_s15  }
   0x2   : > { %p167_p1 = scmp.lt.s32.totalorder %s1327_s15, 3 }
   0x4   : > { %p168_p2 = pnand %p1121_p0, %p167_p1 }
   0x5   : > { %s1122_s23 = sshll.u32 (!%p168_p2), %s1370_s16, 2  ;;  %s1331_s28 = smov (!%p168_p2), 80  }
   0x6   : > { %171 = sbr.rel (%p168_p2) target bundleno = 674 (0x2a2), region = 32  ;;  %p199_p3 = scmp.lt.s32.totalorder (!%p168_p2), %s1122_s23, 7 }
   0x7   : > { %s1332_s29 = smov (!%p168_p2), 112   ;;  %s1333_s30 = smov (!%p168_p2), 32  }
   0x8   : > { %s1336_s11 = smov (!%p168_p2), 16   ;;  %s1337_s12 = smov (!%p168_p2), 96  }
   0x9   : > { %s1338_s13 = smov (!%p168_p2), 48   ;;  %p211_p4 = scmp.lt.s32.totalorder (!%p168_p2), %s1370_s16, 1 }
   0xb   : > { %v217_v0 = vld [vmem:[%s1713_s1 + $0x8] sm:$0xff]  ;;  %v1329_v1 = vmov 1   ;;  %v1330_v2 = vmov 0   ;;  %v218_v3 = vld [vmem:[%s1713_s1 + $0x10] sm:$0x3]  ;;  %v216_v4 = vld [vmem:[%s1713_s1] sm:$0xff] }
   0xc   : > { %1303 = vset.pattern.permute.xlu1 %v1329_v1  ;;  %1302 = vset.pattern.permute.xlu0 %v1330_v2  ;;  %vm1717_vm0 = vcmask 650240   ;;  %s1736_s23 = smov (!%p199_p3, %s1122_s23), 7  ;;  %vm417_vm1 = vcmask 1040384   ;;  %vm418_vm2 = vcmask 1044484   ;;  %vm619_vm3 = vcmask 1041408   ;;  %s1738_s16 = smov (!%p211_p4, %s1370_s16), 1 }
   0xd   : > { %253 = vperm.xlu1 %1303, %v217_v0   ;;  %237 = vperm.xlu0 %1302, %v217_v0   ;;  %220 = vst.msk [vmem:[#allocation2] sm:$0xf] %vm1717_vm0, %v1330_v2  ;;  %221 = vst.msk [vmem:[#allocation2 + $0xc] sm:$0xf] %vm1717_vm0, %v1330_v2  ;;  %s1277_s24 = smul.u32 12, %s1736_s23  ;;  %vm620_vm4 = vcmask 1045508  }
   0xe   : > { %865 = vmatprep.mubr.bf16.mxu0 %v1330_v2  ;;  %vm1512_vm5 = vmor %vm417_vm1, %vm418_vm2  ;;  %vm222_vm6 = vcmask 647168   ;;  %vm632_vm7 = vcmask 650242   ;;  %vm430_vm8 = vcmask 650241   ;;  %vm635_vm10 = vcmask 649216   ;;  %s1125_s7 = sshll.u32 %s1736_s23, 2  ;;  %s1126_s14 = sshll.u32 %s1738_s16, 3 }
   0xf   : > { %s1397_s27 = scalar_lea.vmem %s1712_s0, %s1277_s24  ;;  %223 = vst.msk [vmem:[#allocation2 + $0x18] sm:$0x1] %vm222_vm6, %v1330_v2  ;;  %vm1535_vm9 = vmor %vm619_vm3, %vm620_vm4  ;;  %vm433_vm11 = vcmask 648192   ;;  %vm1335_vm12 = vmmov 0   ;;  %vm297_vm13 = vcmask 1041024   ;;  %vm298_vm14 = vcmask 258052   ;;  %s1692_s10 = scalar_lea.vmem %s1715_s3, %s1125_s7 }
  0x10   : > { %v226_v7 = vld [vmem:[%s1397_s27 + $0x8] sm:$0x1]  ;;  %v1238_v8 = vld [vmem:[%s1397_s27] sm:$0xff]   ;;  %v1132_v10 = vld [vmem:[%s1397_s27 + $0x14] sm:$0x1]  ;;  %vm292_vm15 = vcmask 1044096   ;;  %s214_s19 = scalar_lea.vmem %s1716_s4, %s1126_s14 }
  0x11   : > { %1304 = vset.pattern.permute.xlu1 %v1330_v2  ;;  %242 = vperm.xlu0 %1302, %v218_v3   ;;  %v1138_v9 = vld [vmem:[%s1397_s27 + $0x20] sm:$0x1]  ;;  %v1145_v11 = vld [vmem:[%s1397_s27 + $0xc] sm:$0xff]   ;;  %v229_v13 = vunpack.c.l.bf16 %v226_v7  ;;  %v1240_v15 = vunpack.c.h.bf16 %v1238_v8  ;;  %v1259_v16 = vld [vmem:[%s1397_s27 + $0x18] sm:$0xff]   ;;  %v1239_v18 = vunpack.c.l.bf16 %v1238_v8  ;;  %v307_v19 = vunpack.c.l.bf16 %v1132_v10 }
  0x12   : > { %232 = vperm.xlu1 %1304, %v216_v4   ;;  %v347_v14 = vunpack.c.l.bf16 %v1138_v9  ;;  %v438_v20 = vunpack.c.l.bf16 %v1145_v11  ;;  %v439_v21 = vunpack.c.h.bf16 %v1145_v11  ;;  %v1157_v22 = vld [vmem:[%s1397_s27 + $0x24] sm:$0xff]   ;;  %v1255_v23 = vunpack.c.l.bf16 %v1259_v16  ;;  %v1147_v27 = vld [vmem:[%s1397_s27 + $0x14] sm:$0x1]  ;;  %v1419_v28 = vld [vmem:[%s1397_s27 + $0x20] sm:$0x1] }
  0x13   : > { %v1256_v24 = vunpack.c.h.bf16 %v1259_v16  ;;  %v541_v25 = vunpack.c.l.bf16 %v1157_v22  ;;  %v1415_v26 = vld [vmem:[%s1397_s27 + $0x24] sm:$0xff]   ;;  %v440_v41 = vunpack.c.l.bf16 %v1147_v27  ;;  %v642_v42 = vunpack.c.l.bf16 %v1419_v28  ;;  %v1159_v55 = vld [vmem:[%s1397_s27 + $0x2c] sm:$0x1]  ;;  %vm299_vm3 = vmor %vm298_vm14, %vm297_vm13 }
  0x14   : > { %v696_v32 = vunpack.c.l.bf16 %v1415_v26  ;;  %v542_v46 = vunpack.c.h.bf16 %v1157_v22  ;;  %v1177_v56 = vld [vmem:[%s1397_s27 + $0x2c] sm:$0x1]  ;;  %v697_v7 = vunpack.c.h.bf16 %v1415_v26  ;;  %vm293_vm1 = vcmask 261124  }
  0x15   : > { %1305 = vset.pattern.permute.xlu0 %v1329_v1  ;;  %v698_v8 = vunpack.c.l.bf16 %v1177_v56  ;;  %v1163_v28 = vld [vmem:[%s1397_s27 + $0xc] sm:$0xff]   ;;  %vm285_vm2 = vcmask 654336   ;;  %vm388_vm4 = vcmask 1041280   ;;  %vm1624_vm6 = vmor %vm293_vm1, %vm292_vm15  ;;  %vm685_vm13 = vcmask 261126  }
  0x16   : > { %257 = vperm.xlu0 %1305, %v218_v3   ;;  %1306 = vset.pattern.permute.xlu1 %v1329_v1  ;;  %v1153_v1 = vld [vmem:[%s1397_s27 + $0x20] sm:$0x1]  ;;  %vm739_vm15 = vcmask 1044354   ;;  %vm740_vm1 = vcmask 523270  }
  0x17   : > { %249 = vperm.xlu1 %1306, %v216_v4   ;;  %v543_v4 = vunpack.c.l.bf16 %v1159_v55 }
  0x88   : > { %v1399_v5 = vpop.permute.xlu1 %253  ;;  %v1401_v6 = vpop.permute.xlu0 %237 }
  0x89   : > { %v246_v31 = vmul.f32 %v1240_v15, %v1401_v6  ;;  %v442_v37 = vmul.f32 %v439_v21, %v1401_v6  ;;  %v644_v50 = vmul.f32 %v1256_v24, %v1401_v6  ;;  %v700_v26 = vmul.f32 %v697_v7, %v1401_v6 }
  0x8b   : > { %v261_v48 = vadd.f32 %v1399_v5, %v246_v31  ;;  %v445_v54 = vadd.f32 %v442_v37, %v1399_v5  ;;  %v647_v11 = vadd.f32 %v644_v50, %v1399_v5  ;;  %v1165_v50 = vld [vmem:[%s1397_s27 + $0x14] sm:$0x1] }
  0x8c   : > { %v1408_v12 = vpop.permute.xlu0 %242 }
  0x8d   : > { %v1411_v17 = vpop.permute.xlu1 %232  ;;  %v247_v29 = vmul.f32 %v1408_v12, %v229_v13  ;;  %v350_v30 = vmul.f32 %v347_v14, %v1408_v12  ;;  %v310_v35 = vmul.f32 %v307_v19, %v1408_v12  ;;  %v443_v60 = vmul.f32 %v440_v41, %v1408_v12  ;;  %v1462_v14 = vld [vmem:[%s1397_s27 + $0xc] sm:$0xff]  }
  0x8e   : > { %v245_v34 = vmul.f32 %v1239_v18, %v1411_v17  ;;  %v441_v36 = vmul.f32 %v438_v20, %v1411_v17  ;;  %v643_v49 = vmul.f32 %v1255_v23, %v1411_v17  ;;  %v544_v52 = vmul.f32 %v541_v25, %v1411_v17 }
  0x8f   : > { %v699_v53 = vmul.f32 %v696_v32, %v1411_v17  ;;  %v264_v9 = vmax.f32 %v261_v48, 0.0  ;;  %v545_v13 = vmul.f32 %v542_v46, %v1401_v6  ;;  %v448_v18 = vmax.f32 %v445_v54, 0.0 }
  0x90   : > { %v496_v19 = vunpack.c.l.bf16 %v1153_v1  ;;  %v305_v23 = vunpack.c.l.bf16 %v1462_v14  ;;  %v645_v25 = vmul.f32 %v642_v42, %v1408_v12  ;;  %v306_v27 = vunpack.c.h.bf16 %v1462_v14 }
  0x91   : > { %v1425_v33 = vpop.permute.xlu0 %257  ;;  %v650_v31 = vmax.f32 %v647_v11, 0.0  ;;  %v548_v32 = vadd.f32 %v545_v13, %v1399_v5  ;;  %v546_v37 = vmul.f32 %v543_v4, %v1408_v12  ;;  %v701_v41 = vmul.f32 %v698_v8, %v1408_v12 }
  0x92   : > { %v1431_v38 = vpop.permute.xlu1 %249  ;;  %v262_v39 = vadd.f32 %v1425_v33, %v247_v29  ;;  %v353_v40 = vadd.f32 %v350_v30, %v1425_v33  ;;  %v313_v44 = vadd.f32 %v310_v35, %v1425_v33  ;;  %v446_v3 = vadd.f32 %v443_v60, %v1425_v33 }
  0x93   : > { %v260_v43 = vadd.f32 %v1431_v38, %v245_v34  ;;  %v444_v45 = vadd.f32 %v441_v36, %v1431_v38  ;;  %v646_v59 = vadd.f32 %v643_v49, %v1431_v38  ;;  %v547_v0 = vadd.f32 %v544_v52, %v1431_v38 }
  0x94   : > { %v265_v47 = vmax.f32 %v262_v39, 0.0  ;;  %v356_v58 = vmax.f32 %v353_v40, 0.0  ;;  %v316_v62 = vmax.f32 %v313_v44, 0.0  ;;  %v702_v10 = vadd.f32 %v699_v53, %v1431_v38 }
  0x95   : > { %v263_v51 = vmax.f32 %v260_v43, 0.0  ;;  %v447_v63 = vmax.f32 %v444_v45, 0.0  ;;  %v649_v16 = vmax.f32 %v646_v59, 0.0  ;;  %v550_v22 = vmax.f32 %v547_v0, 0.0 }
  0x96   : > { %v1206_v57 = vpack.c.bf16 %v265_v47, %v265_v47  ;;  %v1212_v15 = vpack.c.bf16 %v356_v58, %v356_v58  ;;  %v1209_v20 = vpack.c.bf16 %v316_v62, %v316_v62  ;;  %v449_v24 = vmax.f32 %v446_v3, 0.0 }
  0x97   : > { %v1449_v61 = vpack.c.bf16 %v263_v51, %v263_v51  ;;  %v1464_v21 = vpack.c.bf16 %v447_v63, %v447_v63  ;;  %v1473_v29 = vpack.c.bf16 %v264_v9, %v264_v9  ;;  %v705_v30 = vmax.f32 %v702_v10, 0.0  ;;  %v394_v51 = vld [vmem:[%s1397_s27 + $0x8] sm:$0x1] }
  0x98   : > { %280 = vrot.lane.b32.xlu1 %v1206_v57, %s1331_s28  ;;  %v1476_v34 = vpack.c.bf16 %v649_v16, %v649_v16  ;;  %v1478_v35 = vpack.c.bf16 %v448_v18, %v448_v18  ;;  %v648_v36 = vadd.f32 %v645_v25, %v1425_v33  ;;  %v1483_v40 = vpack.c.bf16 %v550_v22, %v550_v22 }
  0x99   : > { %276 = vrot.lane.b32.xlu0 %v1449_v61, %s1331_s28  ;;  %v460_v39 = vrot.slane %v1464_v21, 7  ;;  %v598_v42 = vunpack.c.h.bf16 %v1163_v28  ;;  %v1218_v43 = vpack.c.bf16 %v449_v24, %v449_v24  ;;  %v549_v44 = vadd.f32 %v546_v37, %v1425_v33 }
  0x9a   : > { %v703_v45 = vadd.f32 %v700_v26, %v1399_v5  ;;  %v1493_v46 = vpack.c.bf16 %v705_v30, %v705_v30  ;;  %v551_v47 = vmax.f32 %v548_v32, 0.0  ;;  %v704_v48 = vadd.f32 %v701_v41, %v1425_v33 }
  0x9b   : > { %v499_v49 = vmul.f32 %v496_v19, %v1408_v12  ;;  %v662_v52 = vrot.slane %v1476_v34, 6  ;;  %v462_v53 = vrot.slane %v1478_v35, 7  ;;  %v1501_v54 = vpack.c.bf16 %v650_v31, %v650_v31 }
  0x9c   : > { %371 = vrot.lane.b32.xlu1 %v1212_v15, %s1332_s29  ;;  %v651_v55 = vmax.f32 %v648_v36, 0.0  ;;  %v563_v56 = vrot.slane %v1483_v40, 7  ;;  %v597_v58 = vunpack.c.l.bf16 %v1163_v28  ;;  %v601_v59 = vmul.f32 %v598_v42, %v1401_v6 }
  0x9d   : > { %331 = vrot.lane.b32.xlu0 %v1209_v20, %s1333_s30  ;;  %v502_v57 = vadd.f32 %v499_v49, %v1425_v33  ;;  %v465_v60 = vrot.slane %v1218_v43, 7  ;;  %v552_v62 = vmax.f32 %v549_v44, 0.0  ;;  %v599_v63 = vunpack.c.l.bf16 %v1165_v50 }
  0x9e   : > { %v397_v0 = vunpack.c.l.bf16 %v394_v51  ;;  %v1516_v3 = vpack.c.bf16 %v551_v47, %v551_v47  ;;  %v706_v4 = vmax.f32 %v703_v45, 0.0  ;;  %v707_v7 = vmax.f32 %v704_v48, 0.0 }
  0x9f   : > { %v718_v8 = vrot.slane %v1493_v46, 6  ;;  %v464_v9 = vrot.slane %v462_v53, 4  ;;  %v664_v10 = vrot.slane %v1501_v54, 6  ;;  %v1230_v11 = vpack.c.bf16 %v651_v55, %v651_v55 }
  0xa0   : > { %278 = vrot.lane.b32.xlu1 %v1473_v29, %s1331_s28  ;;  %v663_v13 = vrot.slane %v662_v52, 4  ;;  %v505_v15 = vmax.f32 %v502_v57, 0.0  ;;  %v604_v16 = vadd.f32 %v601_v59, %v1399_v5  ;;  %v1224_v19 = vpack.c.bf16 %v552_v62, %v552_v62 }
  0xa1   : > { %467 = vrot.lane.b32.xlu0 %v460_v39, %s1331_s28  ;;  %v466_v18 = vsel %vm1512_vm5, %v464_v9, %v465_v60  ;;  %v600_v20 = vmul.f32 %v597_v58, %v1411_v17  ;;  %v565_v22 = vrot.slane %v1516_v3, 7  ;;  %v1530_v24 = vpack.c.bf16 %v706_v4, %v706_v4 }
  0xa2   : > { %v1233_v25 = vpack.c.bf16 %v707_v7, %v707_v7  ;;  %v516_v26 = vrot.slane %v1476_v34, 7  ;;  %v666_v30 = vrot.slane %v664_v10, 4  ;;  %v667_v31 = vrot.slane %v1230_v11, 6 }
  0xa3   : > { %v603_v32 = vadd.f32 %v600_v20, %v1431_v38  ;;  %v665_v36 = vsel %vm1535_vm9, %v663_v13, %v664_v10  ;;  %v1221_v37 = vpack.c.bf16 %v505_v15, %v505_v15  ;;  %v518_v41 = vrot.slane %v1501_v54, 7 }
  0xa4   : > { %669 = vrot.lane.b32.xlu1 %v662_v52, %s1331_s28  ;;  %v568_v42 = vrot.slane %v1224_v19, 7  ;;  %v602_v44 = vmul.f32 %v599_v63, %v1408_v12  ;;  %v607_v45 = vmax.f32 %v604_v16, 0.0  ;;  %v567_v46 = vrot.slane %v565_v22, 4 }
  0xa5   : > { %570 = vrot.lane.b32.xlu0 %v563_v56, %s1332_s29  ;;  %v606_v43 = vmax.f32 %v603_v32, 0.0  ;;  %v720_v47 = vrot.slane %v1530_v24, 6  ;;  %v723_v48 = vrot.slane %v1233_v25, 6  ;;  %v668_v49 = vsel %vm1535_vm9, %v666_v30, %v667_v31 }
  0xa6   : > { %v605_v51 = vadd.f32 %v602_v44, %v1425_v33  ;;  %v1226_v52 = vpack.c.bf16 %v607_v45, %v607_v45  ;;  %v521_v55 = vrot.slane %v1221_v37, 7  ;;  %v420_v57 = vrot.slane %v1449_v61, 7 }
  0xa7   : > { %v1225_v50 = vpack.c.bf16 %v606_v43, %v606_v43  ;;  %v400_v58 = vmul.f32 %v397_v0, %v1408_v12  ;;  %v569_v59 = vsel %vm1512_vm5, %v567_v46, %v568_v42  ;;  %v722_v4 = vrot.slane %v720_v47, 4 }
  0xa8   : > { %725 = vrot.lane.b32.xlu1 %v718_v8, %s1333_s30  ;;  %v608_v62 = vmax.f32 %v605_v51, 0.0  ;;  %v624_v63 = vrot.slane %v1226_v52, 6  ;;  %431 = vst.msk [vmem:[#allocation2 + $0x18] sm:$0xe] %vm430_vm8, %v420_v57  ;;  %v520_v61 = vrot.slane %v518_v41, 4  ;;  %v421_v0 = vrot.slane %v420_v57, 4 }
  0xa9   : > { %471 = vrot.lane.b32.xlu0 %v466_v18, %s1331_s28  ;;  %v622_v60 = vrot.slane %v1225_v50, 6  ;;  %v403_v7 = vadd.f32 %v400_v58, %v1425_v33  ;;  %v461_v10 = vrot.slane %v460_v39, 4  ;;  %v724_v11 = vsel %vm1535_vm9, %v722_v4, %v723_v48 }
  0xaa   : > { %v1227_v9 = vpack.c.bf16 %v608_v62, %v608_v62  ;;  %v422_v15 = vrot.slane %v1473_v29, 7  ;;  %v719_v16 = vrot.slane %v718_v8, 4  ;;  %v522_v33 = vsel %vm1512_vm5, %v520_v61, %v521_v55 }
  0xab   : > { %v623_v12 = vrot.slane %v622_v60, 4  ;;  %633 = vst.msk [vmem:[#allocation2 + $0x30] sm:$0xc] %vm632_vm7, %v622_v60  ;;  %v406_v13 = vmax.f32 %v403_v7, 0.0  ;;  %v626_v18 = vrot.slane %v624_v63, 4  ;;  %v309_v39 = vmul.f32 %v306_v27, %v1401_v6 }
  0xac   : > { %523 = vrot.lane.b32.xlu1 %v516_v26, %s1333_s30  ;;  %v627_v19 = vrot.slane %v1227_v9, 6  ;;  %v423_v8 = vsel %vm1512_vm5, %v421_v0, %v422_v15  ;;  %v564_v24 = vrot.slane %v563_v56, 4  ;;  %v463_v25 = vsel %vm1512_vm5, %v461_v10, %v462_v53 }
  0xad   : > { %671 = vrot.lane.b32.xlu0 %v665_v36, %s1331_s28  ;;  %v1215_v20 = vpack.c.bf16 %v406_v13, %v406_v13  ;;  %v625_v21 = vsel %vm1535_vm9, %v623_v12, %v624_v63  ;;  %v424_v30 = vrot.slane %v422_v15, 4  ;;  %v1334_v27 = vmov 0.0   ;;  %432 = vst.msk [vmem:[#allocation2 + $0x24] sm:$0xf] %vm1717_vm0, %v423_v8 }
  0xae   : > { %v628_v29 = vsel %vm1535_vm9, %v626_v18, %v627_v19  ;;  %634 = vst.msk [vmem:[#allocation2 + $0x3c] sm:$0xf] %vm1717_vm0, %v625_v21  ;;  %1265 = vmatprep.subr.bf16.mxu1 %v1334_v27  ;;  %v721_v40 = vsel %vm1535_vm9, %v719_v16, %v720_v47  ;;  %v308_v35 = vmul.f32 %v305_v23, %v1411_v17  ;;  %v517_v14 = vrot.slane %v516_v26, 4 }
  0xaf   : > { %636 = vst.msk [vmem:[#allocation2 + $0x48] sm:$0x7] %vm635_vm10, %v628_v29  ;;  %v425_v6 = vrot.slane %v1215_v20, 7  ;;  %v566_v31 = vsel %vm1512_vm5, %v564_v24, %v565_v22  ;;  %v312_v28 = vadd.f32 %v309_v39, %v1399_v5  ;;  %1273 = vmatprep.mubr.msk.bf16.mxu1 %vm1335_vm12, %v1334_v27  ;;  %vm339_vm7 = vcmask 909568  }
  0xb0   : > { %673 = vrot.lane.b32.xlu1 %v668_v49, %s1331_s28  ;;  %v311_v56 = vadd.f32 %v308_v35, %v1431_v38  ;;  %v519_v38 = vsel %vm1512_vm5, %v517_v14, %v518_v41  ;;  %vm1718_vm8 = vcmask 916480   ;;  %vm482_vm10 = vcmask 1044097  }
  0xb1   : > { %574 = vrot.lane.b32.xlu0 %v569_v59, %s1332_s29  ;;  %v426_v53 = vsel %vm1512_vm5, %v424_v30, %v425_v6  ;;  %v315_v23 = vmax.f32 %v312_v28, 0.0  ;;  %vm389_vm5 = vcmask 520196   ;;  %vm684_vm12 = vcmask 1044098  }
  0xb2   : > { %434 = vst.msk [vmem:[#allocation2 + $0x30] sm:$0x3] %vm433_vm11, %v426_v53  ;;  %v314_v17 = vmax.f32 %v311_v56, 0.0  ;;  %vm390_vm9 = vmor %vm389_vm5, %vm388_vm4  ;;  %vm483_vm11 = vcmask 261125   ;;  %vm734_vm4 = vcmask 912642   ;;  %vm532_vm0 = vcmask 912641  }
  0xb3   : > { %v1208_v3 = vpack.c.bf16 %v315_v23, %v315_v23  ;;  %vm484_vm14 = vmor %vm483_vm11, %vm482_vm10  ;;  %vm585_vm10 = vcmask 1044353   ;;  %vm586_vm11 = vcmask 523269  }
  0xb4   : > { %729 = vrot.lane.b32.xlu1 %v724_v11, %s1333_s30  ;;  %v1207_v5 = vpack.c.bf16 %v314_v17, %v314_v17  ;;  %vm741_vm5 = vmor %vm740_vm1, %vm739_vm15  ;;  %vm690_vm15 = vcmask 260100   ;;  %vm744_vm1 = vcmask 1043328  }
  0xb5   : > { %527 = vrot.lane.b32.xlu0 %v522_v33, %s1333_s30 }
  0xb8   : > { %469 = vrot.lane.b32.xlu1 %v463_v25, %s1331_s28 }
  0xb9   : > { %727 = vrot.lane.b32.xlu0 %v721_v40, %s1333_s30 }
  0xbc   : > { %572 = vrot.lane.b32.xlu1 %v566_v31, %s1332_s29 }
  0xbd   : > { %369 = vrot.lane.b32.xlu0 %v1501_v54, %s1332_s29 }
  0xc0   : > { %367 = vrot.lane.b32.xlu1 %v1476_v34, %s1332_s29 }
  0xc1   : > { %525 = vrot.lane.b32.xlu0 %v519_v38, %s1333_s30 }
  0xc4   : > { %327 = vrot.lane.b32.xlu1 %v1207_v5, %s1333_s30 }
  0xc5   : > { %329 = vrot.lane.b32.xlu0 %v1208_v3, %s1333_s30 }
 0x10a   : > { %v281_v34 = vpop.permute.xlu1 %280 }
 0x10b   : > { %v284_v54 = vrot.slane %v281_v34, 4  ;;  %v277_v1 = vpop.permute.xlu0 %276 }
 0x10c   : > { %v282_v22 = vrot.slane %v277_v1, 4 }
 0x10d   : > { %v288_v32 = vsel %vm285_vm2, %v284_v54, %v281_v34 }
 0x10e   : > { %v286_v36 = vsel %vm285_vm2, %v282_v22, %v277_v1  ;;  %v372_v37 = vpop.permute.xlu1 %371  ;;  %300 = vst.msk [vmem:[#allocation2 + $0x18] sm:$0x11] %vm299_vm3, %v288_v32  ;;  %vm686_vm3 = vmor %vm685_vm13, %vm684_vm12  ;;  %vm1725_vm13 = vcmask 916480  }
 0x10f   : > { %v375_v41 = vrot.slane %v372_v37, 4  ;;  %v332_v42 = vpop.permute.xlu0 %331  ;;  %295 = vst.msk [vmem:[#allocation2] sm:$0xff] %vm1624_vm6, %v286_v36  ;;  %vm587_vm12 = vmor %vm586_vm11, %vm585_vm10  ;;  %vm383_vm11 = vcmask 1044352  }
 0x110   : > { %340 = vst.msk [vmem:[#allocation2 + $0x1c] sm:$0x1] %vm339_vm7, %v332_v42  ;;  %vm487_vm7 = vcmask 1042048  }
 0x111   : > { %v379_v43 = vsel %vm1718_vm8, %v375_v41, %v372_v37 }
 0x112   : > { %391 = vst.msk [vmem:[#allocation2 + $0x1c] sm:$0x11] %vm390_vm9, %v379_v43  ;;  %v279_v44 = vpop.permute.xlu1 %278  ;;  %vm488_vm9 = vcmask 259076   ;;  %v748_v43 = vld [vmem:[%s1714_s2] sm:$0xf] }
 0x113   : > { %v283_v45 = vrot.slane %v279_v44, 4  ;;  %v468_v46 = vpop.permute.xlu0 %467  ;;  %vm489_vm8 = vmor %vm488_vm9, %vm487_vm7  ;;  %vm591_vm7 = vcmask 521220   ;;  %vm535_vm9 = vcmask 910592  }
 0x114   : > { %v473_v47 = vrot.slane %v468_v46, 4 }
 0x115   : > { %v287_v48 = vsel %vm285_vm2, %v283_v45, %v279_v44  ;;  %v914_v44 = vlaneseq }
 0x116   : > { %v476_v49 = vsel %vm285_vm2, %v473_v47, %v468_v46  ;;  %v670_v50 = vpop.permute.xlu1 %669  ;;  %296 = vst.msk [vmem:[#allocation2 + $0xc] sm:$0xff] %vm1624_vm6, %v287_v48 }
 0x117   : > { %v675_v51 = vrot.slane %v670_v50, 4  ;;  %v571_v52 = vpop.permute.xlu0 %570  ;;  %485 = vst.msk [vmem:[#allocation2 + $0x18] sm:$0xee] %vm484_vm14, %v476_v49  ;;  %vm689_vm14 = vcmask 1043072   ;;  %v915_v45 = vand.u32 127, %v914_v44 }
 0x118   : > { %v576_v58 = vrot.slane %v571_v52, 4 }
 0x119   : > { %v678_v55 = vsel %vm285_vm2, %v675_v51, %v670_v50  ;;  %v917_v46 = vadd.s32 256, %v915_v45  ;;  %v916_v47 = vadd.s32 128, %v915_v45 }
 0x11a   : > { %687 = vst.msk [vmem:[#allocation2 + $0x30] sm:$0xcc] %vm686_vm3, %v678_v55  ;;  %v726_v57 = vpop.permute.xlu1 %725  ;;  %v579_v4 = vsel %vm1725_vm13, %v576_v58, %v571_v52  ;;  %vm745_vm3 = vcmask 522244   ;;  %v1676_v48 = vmul.u32.u64.low 3435973837, %v915_v45  ;;  %v1677_v49 = vmul.u32.u64.high 3435973837, %v915_v45, %v1676_v48 }
 0x11b   : > { %735 = vst.msk [vmem:[#allocation2 + $0x34] sm:$0xc] %vm734_vm4, %v726_v57  ;;  %v472_v59 = vpop.permute.xlu0 %471  ;;  %vm691_vm4 = vmor %vm690_vm15, %vm689_vm14  ;;  %vm336_vm14 = vcmask 912640   ;;  %v1682_v51 = vmul.u32.u64.low 3435973837, %v916_v47  ;;  %v1683_v52 = vmul.u32.u64.high 3435973837, %v916_v47, %v1682_v51 }
 0x11c   : > { %742 = vst.msk [vmem:[#allocation2 + $0x34] sm:$0xcc] %vm741_vm5, %v1330_v2  ;;  %v475_v60 = vrot.slane %v472_v59, 4  ;;  %vm590_vm5 = vcmask 1042304   ;;  %v924_v55 = vshrl.u32 %v1677_v49, 3 }
 0x11d   : > { %vm592_vm10 = vmor %vm591_vm7, %vm590_vm5  ;;  %v1320_v42 = vld [vmem:[#allocation2] ss:$12 sps:$4 sm:$0xff]   ;;  %v935_v58 = vshrl.u32 %v1683_v52, 3 }
 0x11e   : > { %v478_v62 = vsel %vm285_vm2, %v475_v60, %v472_v59  ;;  %v524_v63 = vpop.permute.xlu1 %523  ;;  %v925_v59 = vmul.u32 10, %v924_v55 }
 0x11f   : > { %533 = vst.msk [vmem:[#allocation2 + $0x1c] sm:$0xe] %vm532_vm0, %v524_v63  ;;  %v672_v7 = vpop.permute.xlu0 %671  ;;  %vm737_vm0 = vcmask 911616  }
 0x120   : > { %490 = vst.msk [vmem:[#allocation2 + $0x30] sm:$0x33] %vm489_vm8, %v478_v62  ;;  %v676_v61 = vrot.slane %v672_v7, 4  ;;  %vm746_vm8 = vmor %vm745_vm3, %vm744_vm1  ;;  %vm823_vm1 = vcmask 1042432   ;;  %v936_v62 = vmul.u32 10, %v935_v58  ;;  %v926_v63 = vsub.s32 %v915_v45, %v925_v59 }
 0x121   : > { %588 = vst.msk [vmem:[#allocation2 + $0x1c] sm:$0xee] %vm587_vm12, %v579_v4  ;;  %vm384_vm12 = vcmask 523268  }
 0x122   : > { %v679_v12 = vsel %vm285_vm2, %v676_v61, %v672_v7  ;;  %v674_v0 = vpop.permute.xlu1 %673  ;;  %vm1647_vm15 = vmor %vm384_vm12, %vm383_vm11  ;;  %v937_v7 = vsub.s32 %v916_v47, %v936_v62  ;;  %vm951_vm5 = vcmp.ne.s32.totalorder %v926_v63, 0  ;;  %vm954_vm7 = vcmp.lt.s32.totalorder %v926_v63, 0 }
 0x123   : > { %v677_v9 = vrot.slane %v674_v0, 4  ;;  %v575_v10 = vpop.permute.xlu0 %574  ;;  %688 = vst.msk [vmem:[#allocation2 + $0x3c] sm:$0xff] %vm1624_vm6, %v679_v12  ;;  %v960_v12 = vadd.s32 10, %v926_v63 }
 0x124   : > { %v578_v11 = vrot.slane %v575_v10, 4  ;;  %vm955_vm11 = vcmp.lt.s32.totalorder %v937_v7, 0 }
 0x125   : > { %v680_v13 = vsel %vm285_vm2, %v677_v9, %v674_v0  ;;  %v961_v0 = vadd.s32 10, %v937_v7 }
 0x126   : > { %692 = vst.msk [vmem:[#allocation2 + $0x48] sm:$0x77] %vm691_vm4, %v680_v13  ;;  %v730_v15 = vpop.permute.xlu1 %729  ;;  %v581_v33 = vsel %vm1725_vm13, %v578_v11, %v575_v10  ;;  %vm819_vm4 = vcmask 441344  }
 0x127   : > { %738 = vst.msk [vmem:[#allocation2 + $0x4c] sm:$0x7] %vm737_vm0, %v730_v15  ;;  %v528_v16 = vpop.permute.xlu0 %527 }
 0x128   : > { %747 = vst.msk [vmem:[#allocation2 + $0x4c] sm:$0x77] %vm746_vm8, %v1330_v2 }
 0x129   : > { %536 = vst.msk [vmem:[#allocation2 + $0x34] sm:$0x3] %vm535_vm9, %v528_v16  ;;  %vm957_vm9 = vmand %vm954_vm7, %vm951_vm5  ;;  %vm1007_vm5 = vcmask 392192   ;;  %vm1025_vm7 = vcmask 130048  }
 0x12a   : > { %593 = vst.msk [vmem:[#allocation2 + $0x34] sm:$0x33] %vm592_vm10, %v581_v33  ;;  %v470_v18 = vpop.permute.xlu1 %469  ;;  %vm952_vm10 = vcmp.ne.s32.totalorder %v937_v7, 0  ;;  %v963_v10 = vsel %vm957_vm9, %v960_v12, %v926_v63 }
 0x12b   : > { %v474_v20 = vrot.slane %v470_v18, 4  ;;  %v728_v21 = vpop.permute.xlu0 %727 }
 0x12c   : > { %736 = vst.msk [vmem:[#allocation2 + $0x40] sm:$0xf] %vm336_vm14, %v728_v21 }
 0x12d   : > { %v477_v39 = vsel %vm285_vm2, %v474_v20, %v470_v18  ;;  %743 = vst.msk [vmem:[#allocation2 + $0x40] sm:$0xff] %vm1647_vm15, %v1330_v2  ;;  %vm1728_vm2 = vmmov %vm1725_vm13 }
 0x12e   : > { %v573_v29 = vpop.permute.xlu1 %572  ;;  %486 = vst.msk [vmem:[#allocation2 + $0x24] sm:$0xff] %vm1624_vm6, %v477_v39  ;;  %vm1729_vm6 = vmmov %vm1728_vm2 }
 0x12f   : > { %v370_v8 = vpop.permute.xlu0 %369  ;;  %v761_v24 = vld [vmem:[#allocation2 + $0x48] sm:$0x77]  ;;  %v577_v25 = vrot.slane %v573_v29, 4  ;;  %v1309_v40 = vld [vmem:[#allocation2 + $0x50] ss:$0 sps:$4 sm:$0x77]   ;;  %vm1730_vm3 = vmmov %vm1728_vm2 }
 0x130   : > { %v1191_v30 = vcombine.high %v761_v24, %v761_v24  ;;  %v1190_v6 = vcombine.low %v761_v24, %v761_v24  ;;  %v831_v56 = vsel %vm823_vm1, %v1309_v40, 0  ;;  %v374_v17 = vrot.slane %v370_v8, 4  ;;  %vm958_vm13 = vmand %vm955_vm11, %vm952_vm10 }
 0x131   : > { %1266 = vmatpush3.bf16.msra.mxu1 %v831_v56  ;;  %v757_v2 = vld [vmem:[#allocation2 + $0x30] sm:$0xff]  ;;  %v580_v14 = vsel %vm1728_vm2, %v577_v25, %v573_v29  ;;  %v964_v11 = vsel %vm958_vm13, %v961_v0, %v937_v7  ;;  %vm979_vm2 = vcmask 523264  }
 0x132   : > { %1193 = vmatprep.subr.msk.bf16.mxu0 %vm823_vm1, %v1191_v30  ;;  %v368_v35 = vpop.permute.xlu1 %367  ;;  %v825_v53 = vsel %vm823_vm1, %v1190_v6, 0  ;;  %1267 = vmatprep.subr.bf16.mxu1 %v1334_v27  ;;  %v378_v22 = vsel %vm1730_vm3, %v374_v17, %v370_v8  ;;  %vm967_vm1 = vcmp.lt.s32.totalorder %v964_v11, 8  ;;  %vm984_vm3 = vcmask 7168  }
 0x133   : > { %v373_v31 = vrot.slane %v368_v35, 4  ;;  %842 = vmatpush1.bf16.msra.mxu0 %v825_v53  ;;  %v526_v28 = vpop.permute.xlu0 %525 }
 0x134   : > { %534 = vst.msk [vmem:[#allocation2 + $0x28] sm:$0xf] %vm336_vm14, %v526_v28  ;;  %v759_v23 = vld [vmem:[#allocation2 + $0x3c] sm:$0xff]  ;;  %v1312_v5 = vld [vmem:[#allocation2 + $0x38] ss:$12 sps:$4 sm:$0xff]  }
 0x135   : > { %v1310_v38 = vld [vmem:[#allocation2 + $0x34] ss:$12 sps:$4 sm:$0xff]   ;;  %589 = vst.msk [vmem:[#allocation2 + $0x28] sm:$0xff] %vm1647_vm15, %v580_v14  ;;  %v1187_v3 = vcombine.low %v757_v2, %v759_v23  ;;  %v377_v54 = vsel %vm1729_vm6, %v373_v31, %v368_v35  ;;  %1268 = vmatpush3.bf16.msra.mxu1 %v1312_v5  ;;  %v1316_v36 = vld [vmem:[#allocation2 + $0x18] ss:$12 sps:$4 sm:$0xff]   ;;  %vm1731_vm6 = vcmask 650240  }
 0x136   : > { %v328_v34 = vpop.permute.xlu1 %327  ;;  %843 = vmatprep.subr.bf16.mxu0 %v1310_v38  ;;  %1269 = vmatprep.subr.bf16.mxu1 %v1334_v27 }
 0x137   : > { %337 = vst.msk [vmem:[#allocation2 + $0x4] sm:$0xf] %vm336_vm14, %v328_v34  ;;  %v330_v1 = vpop.permute.xlu0 %329  ;;  %844 = vmatpush1.bf16.msra.mxu0 %v1187_v3 }
 0x138   : > { %386 = vst.msk [vmem:[#allocation2 + $0x4] sm:$0xff] %vm1647_vm15, %v377_v54 }
 0x139   : > { %338 = vst.msk [vmem:[#allocation2 + $0x10] sm:$0xf] %vm336_vm14, %v330_v1 }
 0x13a   : > { %387 = vst.msk [vmem:[#allocation2 + $0x10] sm:$0xff] %vm1647_vm15, %v378_v22  ;;  %vm966_vm15 = vcmp.lt.s32.totalorder %v963_v10, 8 }
 0x13c   : > { %v1313_v26 = vld [vmem:[#allocation2 + $0x1c] ss:$12 sps:$4 sm:$0xff]   ;;  %v1315_v32 = vld [vmem:[#allocation2 + $0x20] ss:$12 sps:$4 sm:$0xff]  }
 0x13d   : > { %845 = vmatprep.subr.bf16.mxu0 %v1313_v26  ;;  %1270 = vmatpush3.bf16.msra.mxu1 %v1315_v32 }
 0x13e   : > { %846 = vmatpush1.bf16.msra.mxu0 %v1316_v36  ;;  %1271 = vmatprep.subr.bf16.mxu1 %v1334_v27  ;;  %v1679_v27 = vmul.u32.u64.low 3435973837, %v917_v46  ;;  %v1680_v50 = vmul.u32.u64.high 3435973837, %v917_v46, %v1679_v27 }
 0x140   : > { %v946_v57 = vshrl.u32 %v1680_v50, 3 }
 0x141   : > { %v1317_v37 = vld [vmem:[#allocation2 + $0x4] ss:$12 sps:$4 sm:$0xff]   ;;  %v1319_v41 = vld [vmem:[#allocation2 + $0x8] ss:$12 sps:$4 sm:$0xff]  }
 0x142   : > { %847 = vmatprep.subr.bf16.mxu0 %v1317_v37  ;;  %1272 = vmatpush3.bf16.msra.mxu1 %v1319_v41  ;;  %v947_v60 = vmul.u32 10, %v946_v57 }
 0x143   : > { %848 = vmatpush1.bf16.msra.mxu0 %v1320_v42 }
 0x144   : > { %v948_v4 = vsub.s32 %v917_v46, %v947_v60 }
 0x145   : > { %1274 = vmatmul.mubr.msk.bf16.vlgmr.msra.gmra.mxu1 %vm819_vm4, %v748_v43 }
 0x146   : > { %1194 = vmatmul.mubr.msk.bf16.vlgmr.msra.gmra.mxu0 %vm819_vm4, %v748_v43  ;;  %vm953_vm0 = vcmp.ne.s32.totalorder %v948_v4, 0  ;;  %vm956_vm8 = vcmp.lt.s32.totalorder %v948_v4, 0  ;;  %v962_v61 = vadd.s32 10, %v948_v4  ;;  %vm994_vm4 = vcmask 15368  }
 0x147   : > { %vm959_vm12 = vmand %vm956_vm8, %vm953_vm0 }
 0x148   : > { %v965_v9 = vsel %vm959_vm12, %v962_v61, %v948_v4  ;;  %vm1732_vm0 = vmmov %vm1731_vm6 }
 0x149   : > { %vm968_vm14 = vcmp.lt.s32.totalorder %v965_v9, 8  ;;  %vm1733_vm8 = vmmov %vm1732_vm0 }
 0x14a   : > { %vm1734_vm9 = vmmov %vm1732_vm0 }
 0x205   : > { %v908_v13 = vpop.f32.mrf.mxu1 }
 0x206   : > { %v867_v15 = vpop.f32.mrf.mxu0  ;;  %v977_v16 = vsel %vm968_vm14, %v908_v13, 0.0 }
 0x207   : > { %v975_v33 = vsel %vm966_vm15, %v867_v15, 0.0  ;;  %v996_v18 = vpack.c.bf16 %v867_v15, %v867_v15  ;;  %v988_v19 = vmul.f32 %v977_v16, %v977_v16  ;;  %v1275_v20 = vpop.f32.mrf.mxu1  ;;  %v980_v29 = vsel %vm979_vm2, %v977_v16, 0.0 }
 0x208   : > { %v869_v21 = vpop.f32.mrf.mxu0  ;;  %v986_v8 = vmul.f32 %v975_v33, %v975_v33 }
 0x209   : > { %v976_v39 = vsel %vm967_vm1, %v869_v21, 0.0  ;;  %997 = vst.msk [vmem:[%s1692_s10] sm:$0xf] %vm1731_vm6, %v996_v18  ;;  %v911_v24 = vpop.f32.mrf.mxu1  ;;  %v990_v40 = vsel %vm979_vm2, %v988_v19, 0.0  ;;  %v1236_v2 = vpack.c.bf16 %v908_v13, %v869_v21  ;;  %v1235_v14 = vpack.c.bf16 %v869_v21, %v869_v21 }
 0x20a   : > { %v871_v25 = vpop.f32.mrf.mxu0  ;;  %v978_v30 = vadd.f32 %v976_v39, %v975_v33  ;;  %v987_v6 = vmul.f32 %v976_v39, %v976_v39  ;;  %v1234_v17 = vpack.c.bf16 %v869_v21, %v867_v15 }
 0x20b   : > { %v1276_v35 = vpop.f32.mrf.mxu1 }
 0x20c   : > { %v872_v53 = vpop.f32.mrf.mxu0  ;;  %v981_v56 = vadd.f32 %v980_v29, %v978_v30  ;;  %v989_v31 = vadd.f32 %v987_v6, %v986_v8 }
 0x20e   : > { %982 = vadd.xlane.f32.xlu1 %v981_v56  ;;  %v991_v28 = vadd.f32 %v990_v40, %v989_v31 }
 0x210   : > { %992 = vadd.xlane.f32.xlu0 %v991_v28 }
 0x21f   : > { %1022 = vrot.lane.b32.xlu1 %v1236_v2, %s1336_s11 }
 0x223   : > { %1013 = vrot.lane.b32.xlu1 %v1235_v14, %s1337_s12 }
 0x226   : > { %1004 = vrot.lane.b32.xlu0 %v1234_v17, %s1338_s13 }
 0x297   : > { %v983_v23 = vpop.xlane.xlu1 %982 }
 0x298   : > { %985 = vst.msk [vmem:[%s214_s19] sm:$0xff] %vm984_vm3, %v983_v23 }
 0x299   : > { %v993_v38 = vpop.xlane.xlu0 %992 }
 0x29a   : > { %995 = vst.msk [vmem:[%s214_s19] sm:$0xff] %vm994_vm4, %v993_v38 }
 0x29b   : > { %v1023_v5 = vpop.permute.xlu1 %1022 }
 0x29c   : > { %v1024_v34 = vrot.slane %v1023_v5, 4 }
 0x29d   : > { %v1005_v3 = vpop.permute.xlu0 %1004 }
 0x29e   : > { %v1006_v54 = vrot.slane %v1005_v3, 4  ;;  %v1026_v26 = vsel %vm1025_vm7, %v1023_v5, %v1024_v34 }
 0x29f   : > { %v1014_v22 = vpop.permute.xlu1 %1013  ;;  %1201 = vst.msk [vmem:[%s1692_s10 + $0xc] sm:$0xf] %vm1734_vm9, %v1026_v26 }
 0x2a0   : > { %v1008_v1 = vsel %vm1007_vm5, %v1005_v3, %v1006_v54  ;;  %1199 = vst.msk [vmem:[%s1692_s10 + $0x8] sm:$0xf] %vm1733_vm8, %v1014_v22 }
 0x2a1   : > { %1197 = vst.msk [vmem:[%s1692_s10 + $0x4] sm:$0xf] %vm1732_vm0, %v1008_v1 }
 0x2a2 PF: > { %s15_s15 = sadd.s32 1, %s1327_s15  }
 0x2a3   : > { %p12_p5 = scmp.ge.s32.totalorder %s15_s15, 4  }
 0x2a5   :  { %14 = sbr.rel (!%p12_p5) target bundleno = 1 (0x1), region = 80 }

</bundles_post_ra>
